<compile_context>
chip_gen: v7x
topology: tpu7x:2x2x1
jax: 0.10.0
libtpu: 0.0.40
codegen_flags: <defaults>
</compile_context>

<pallas_src>
import jax
import jax.numpy as jnp
from jax.experimental import pallas as pl
from jax.experimental.pallas import tpu as pltpu


# ------------------------------- Pallas kernel -------------------------------
def bottleneck_kernel(x_ref, w1_ref, s1_ref, b1_ref,
                      w2_ref, s2_ref, b2_ref,
                      w3_ref, s3_ref, b3_ref,
                      out_ref, pad_ref):
    # x_ref: (1, H, W, Cin_p); out_ref: (1, H, W, Cout_p) with Cout_p == Cin_p
    _, H, W, Cin = x_ref.shape
    Cmid = w1_ref.shape[1]
    HW = H * W
    HPW = (H + 2) * W
    cdt = w1_ref.dtype                         # bf16 compute dtype for MXU inputs

    # ---- conv1 (1x1) + bn1 + relu  (bf16 dot inputs, f32 accumulate/BN) -----
    x0 = x_ref[0].reshape(HW, Cin)
    h1 = jnp.dot(x0.astype(cdt), w1_ref[...],
                 preferred_element_type=jnp.float32)                # (HW, Cmid)
    h1 = jnp.maximum(h1 * s1_ref[...] + b1_ref[...], 0.0)

    # ---- conv2 (3x3, stride=1, pad=1) + bn2 + relu --------------------------
    # Scratch padded along H only -> every slice below is tile-aligned.
    # Zero just the two halo rows; the interior is fully overwritten each step.
    pad_ref[0:1, :, :] = jnp.zeros((1, W, Cmid), jnp.float32)
    pad_ref[H + 1:H + 2, :, :] = jnp.zeros((1, W, Cmid), jnp.float32)
    pad_ref[1:H + 1, :, :] = h1.reshape(H, W, Cmid)

    # Flatten padded rows onto the sublane axis: ((H+2)*W, Cmid).
    q = pad_ref[...].reshape(HPW, Cmid)
    col = jax.lax.broadcasted_iota(jnp.int32, (HPW, Cmid), 0) % W   # x position
    # Column taps via XLU rolls (+1 -> read x-1; HPW-1 == -1 -> read x+1),
    # with the wrapped edge column zeroed (that is the conv's zero padding).
    q_l = jnp.where(col == 0, 0.0, pltpu.roll(q, shift=1, axis=0))
    q_r = jnp.where(col == W - 1, 0.0, pltpu.roll(q, shift=HPW - 1, axis=0))
    taps = (q_l, q, q_r)                        # kx = 0, 1, 2

    # 9 tile-aligned row windows (offsets multiples of W, W % 8 == 0),
    # concatenated along lanes -> ONE matmul with K = 9*Cmid.
    windows = [taps[kx][ky * W: ky * W + HW, :]
               for ky in range(3) for kx in range(3)]
    cat = jnp.concatenate(windows, axis=1).astype(cdt)              # (HW, 9*Cmid)
    h2 = jnp.dot(cat, w2_ref[...], preferred_element_type=jnp.float32)
    h2 = jnp.maximum(h2 * s2_ref[...] + b2_ref[...], 0.0)           # (HW, Cmid)

    # ---- conv3 (1x1) + bn3 ---------------------------------------------------
    h3 = jnp.dot(h2.astype(cdt), w3_ref[...],
                 preferred_element_type=jnp.float32)                # (HW, Cout)
    h3 = h3 * s3_ref[...] + b3_ref[...]

    # ---- residual add + relu (residual reloaded here: short live range) -----
    res = x_ref[0].reshape(HW, Cin).astype(jnp.float32)
    out = jnp.maximum(h3 + res, 0.0)
    out_ref[0] = out.reshape(H, W, Cin).astype(out_ref.dtype)


# ------------------------------ pallas_call wrapper ---------------------------
def bottleneck_pallas(x_nhwc, params):
    w1, s1, b1 = params["w1"], params["s1"], params["b1"]
    w2, s2, b2 = params["w2"], params["s2"], params["b2"]
    w3, s3, b3 = params["w3"], params["s3"], params["b3"]

    N, H, W, Cin_p = x_nhwc.shape
    Cmid_p = w1.shape[1]
    Cout_p = w3.shape[1]
    assert Cout_p == Cin_p, "identity residual needs padded Cout == padded Cin"
    assert W % 8 == 0, "W must be a multiple of 8 (sublane-aligned row windows)"

    def full(a):
        return pl.BlockSpec(a.shape, lambda n: (0,) * a.ndim)

    flops = int(2 * N * H * W * (Cin_p * Cmid_p + 9 * Cmid_p * Cmid_p
                                 + Cmid_p * Cout_p))
    bytes_accessed = int(x_nhwc.nbytes) + int(N * H * W * Cout_p * 4) + sum(
        int(a.nbytes) for a in (w1, s1, b1, w2, s2, b2, w3, s3, b3))

    return pl.pallas_call(
        bottleneck_kernel,
        out_shape=jax.ShapeDtypeStruct((N, H, W, Cout_p), x_nhwc.dtype),
        grid_spec=pltpu.PrefetchScalarGridSpec(
            num_scalar_prefetch=0,
            grid=(N,),
            in_specs=[
                pl.BlockSpec((1, H, W, Cin_p), lambda n: (n, 0, 0, 0)),
                full(w1), full(s1), full(b1),
                full(w2), full(s2), full(b2),
                full(w3), full(s3), full(b3),
            ],
            out_specs=pl.BlockSpec((1, H, W, Cout_p), lambda n: (n, 0, 0, 0)),
            scratch_shapes=[pltpu.VMEM((H + 2, W, Cmid_p), jnp.float32)],
        ),
        compiler_params=pltpu.CompilerParams(
            dimension_semantics=("parallel",),
            vmem_limit_bytes=48 * 1024 * 1024),
        cost_estimate=pl.CostEstimate(flops=flops, transcendentals=0,
                                      bytes_accessed=bytes_accessed),
    )(x_nhwc, w1, s1, b1, w2, s2, b2, w3, s3, b3)


# ---------------------------- parameter preparation ---------------------------
def _round_up(x, m):
    return (x + m - 1) // m * m


def fold_bn(gamma, beta, mean, var, eps=1e-5):
    scale = gamma / jnp.sqrt(var + eps)
    bias = beta - mean * scale
    return scale, bias


def prepare_bottleneck_params(w1_oihw, bn1, w2_oihw, bn2, w3_oihw, bn3,
                              compute_dtype=jnp.bfloat16):
    """Fold BN, convert conv weights to matmul layout, pad channels to 128."""
    Cmid, Cin = w1_oihw.shape[0], w1_oihw.shape[1]
    Cout = w3_oihw.shape[0]
    Cin_p, Cmid_p, Cout_p = (_round_up(c, 128) for c in (Cin, Cmid, Cout))

    w1 = jnp.zeros((Cin_p, Cmid_p), jnp.float32)
    w1 = w1.at[:Cin, :Cmid].set(jnp.transpose(w1_oihw[:, :, 0, 0], (1, 0)))

    # (3,3,Cmid,Cmid) OIHW -> flat (9*Cmid_p, Cmid_p) matching the in-kernel
    # lane-concat order (ky-major, kx-minor, then input channel).
    w2 = jnp.zeros((9 * Cmid_p, Cmid_p), jnp.float32)
    for ky in range(3):
        for kx in range(3):
            blk = jnp.transpose(w2_oihw[:, :, ky, kx], (1, 0))      # (ci, co)
            off = (ky * 3 + kx) * Cmid_p
            w2 = w2.at[off:off + Cmid, :Cmid].set(blk)

    w3 = jnp.zeros((Cmid_p, Cout_p), jnp.float32)
    w3 = w3.at[:Cmid, :Cout].set(jnp.transpose(w3_oihw[:, :, 0, 0], (1, 0)))

    def pad_sb(scale, bias, cp):
        c = scale.shape[0]
        s = jnp.zeros((1, cp), jnp.float32).at[0, :c].set(scale)
        b = jnp.zeros((1, cp), jnp.float32).at[0, :c].set(bias)
        return s, b

    s1, b1 = pad_sb(*bn1, Cmid_p)
    s2, b2 = pad_sb(*bn2, Cmid_p)
    s3, b3 = pad_sb(*bn3, Cout_p)

    return dict(
        w1=w1.astype(compute_dtype), s1=s1, b1=b1,
        w2=w2.astype(compute_dtype), s2=s2, b2=b2,
        w3=w3.astype(compute_dtype), s3=s3, b3=b3,
        cin=Cin, cout=Cout,
    )


def bottleneck_forward(x_nchw, params):
    """PyTorch-layout entry point: NCHW in/out, identity shortcut (stride=1)."""
    N, Cin, H, W = x_nchw.shape
    assert Cin == params["cin"] and params["cout"] == Cin, (
        "identity residual requires in_channel == out_channel * expansion")
    Cin_p = params["w1"].shape[0]
    x_nhwc = jnp.transpose(x_nchw, (0, 2, 3, 1))
    x_nhwc = jnp.pad(x_nhwc, ((0, 0), (0, 0), (0, 0), (0, Cin_p - Cin)))
    out = bottleneck_pallas(x_nhwc, params)
    out = out[..., :params["cout"]]
    return jnp.transpose(out, (0, 3, 1, 2))


# ------------------------------ plain-JAX reference ---------------------------
def _conv_nchw(x, w, stride=1, pad=0):
    return jax.lax.conv_general_dilated(
        x, w, window_strides=(stride, stride),
        padding=[(pad, pad), (pad, pad)],
        dimension_numbers=("NCHW", "OIHW", "NCHW"))


def bottleneck_ref_nchw(x, w1_oihw, bn1, w2_oihw, bn2, w3_oihw, bn3):
    def bn_apply(y, scale, bias):
        return y * scale[None, :, None, None] + bias[None, :, None, None]
    out = jax.nn.relu(bn_apply(_conv_nchw(x, w1_oihw), *bn1))
    out = jax.nn.relu(bn_apply(_conv_nchw(out, w2_oihw, stride=1, pad=1), *bn2))
    out = bn_apply(_conv_nchw(out, w3_oihw), *bn3)
    return jax.nn.relu(out + x)


if __name__ == "__main__":
    key = jax.random.PRNGKey(0)
    N, out_channel, H, W = 2, 8, 16, 16
    expansion = 4
    Cmid = out_channel
    Cin = out_channel * expansion      # identity residual needs in == out*expansion
    Cout = out_channel * expansion

    ks = jax.random.split(key, 8)
    # PyTorch-style OIHW conv weights (bias=False), deterministic init.
    w1_oihw = 0.1 * jax.random.normal(ks[0], (Cmid, Cin, 1, 1), jnp.float32)
    w2_oihw = 0.1 * jax.random.normal(ks[1], (Cmid, Cmid, 3, 3), jnp.float32)
    w3_oihw = 0.1 * jax.random.normal(ks[2], (Cout, Cmid, 1, 1), jnp.float32)

    def bn_params(k, c):
        k0, k1, k2, k3 = jax.random.split(k, 4)
        gamma = jax.random.uniform(k0, (c,), jnp.float32, 0.5, 1.5)
        beta = 0.1 * jax.random.normal(k1, (c,), jnp.float32)
        mean = 0.1 * jax.random.normal(k2, (c,), jnp.float32)
        var = jax.random.uniform(k3, (c,), jnp.float32, 0.5, 1.5)
        return gamma, beta, mean, var

    bn1 = fold_bn(*bn_params(ks[3], Cmid))
    bn2 = fold_bn(*bn_params(ks[4], Cmid))
    bn3 = fold_bn(*bn_params(ks[5], Cout))

    params = prepare_bottleneck_params(w1_oihw, bn1, w2_oihw, bn2, w3_oihw, bn3,
                                       compute_dtype=jnp.bfloat16)

    x_nchw = jax.random.normal(ks[6], (N, Cin, H, W), jnp.float32)

    out = bottleneck_forward(x_nchw, params)
    out = jax.block_until_ready(out)

    ref = bottleneck_ref_nchw(x_nchw, w1_oihw, bn1, w2_oihw, bn2, w3_oihw, bn3)
    assert out.shape == ref.shape
    max_err = float(jnp.max(jnp.abs(out - ref)))
    # Tolerance sized for bf16 MXU inputs (accumulation, BN and residual in f32).
    assert jnp.allclose(out, ref, atol=2e-2, rtol=2e-2), max_err

    print("KERNEL_OK")
</pallas_src>

<mosaic_0001>
module attributes {stable_mosaic.version = 11 : i64} {
  func.func @bottleneck_kernel(%arg0: i32, %arg1: memref<1x16x16x128xf32, #tpu.memory_space<vmem>>, %arg2: memref<128x128xbf16, #tpu.memory_space<vmem>>, %arg3: memref<1x128xf32, #tpu.memory_space<vmem>>, %arg4: memref<1x128xf32, #tpu.memory_space<vmem>>, %arg5: memref<1152x128xbf16, #tpu.memory_space<vmem>>, %arg6: memref<1x128xf32, #tpu.memory_space<vmem>>, %arg7: memref<1x128xf32, #tpu.memory_space<vmem>>, %arg8: memref<128x128xbf16, #tpu.memory_space<vmem>>, %arg9: memref<1x128xf32, #tpu.memory_space<vmem>>, %arg10: memref<1x128xf32, #tpu.memory_space<vmem>>, %arg11: memref<1x16x16x128xf32, #tpu.memory_space<vmem>>, %arg12: memref<18x16x128xf32, #tpu.memory_space<vmem>>) attributes {dimension_semantics = [#tpu.dimension_semantics<parallel>], iteration_bounds = array<i64: 2>, scalar_prefetch = 0 : i64, scratch_operands = 1 : i64, tpu.core_type = #tpu.core_type<tc>, window_params = [{transform_indices = @transform_0, window_bounds = array<i64: 1, 16, 16, 128>}, {pipeline_mode = #tpu.pipeline_mode<synchronous>, transform_indices = @transform_1, window_bounds = array<i64: 128, 128>}, {pipeline_mode = #tpu.pipeline_mode<synchronous>, transform_indices = @transform_2, window_bounds = array<i64: 1, 128>}, {pipeline_mode = #tpu.pipeline_mode<synchronous>, transform_indices = @transform_3, window_bounds = array<i64: 1, 128>}, {pipeline_mode = #tpu.pipeline_mode<synchronous>, transform_indices = @transform_4, window_bounds = array<i64: 1152, 128>}, {pipeline_mode = #tpu.pipeline_mode<synchronous>, transform_indices = @transform_5, window_bounds = array<i64: 1, 128>}, {pipeline_mode = #tpu.pipeline_mode<synchronous>, transform_indices = @transform_6, window_bounds = array<i64: 1, 128>}, {pipeline_mode = #tpu.pipeline_mode<synchronous>, transform_indices = @transform_7, window_bounds = array<i64: 128, 128>}, {pipeline_mode = #tpu.pipeline_mode<synchronous>, transform_indices = @transform_8, window_bounds = array<i64: 1, 128>}, {pipeline_mode = #tpu.pipeline_mode<synchronous>, transform_indices = @transform_9, window_bounds = array<i64: 1, 128>}, {transform_indices = @transform_10, window_bounds = array<i64: 1, 16, 16, 128>}]} {
    %c0 = arith.constant 0 : index
    %c0_0 = arith.constant 0 : index
    %c0_1 = arith.constant 0 : index
    %c0_2 = arith.constant 0 : index
    %0 = vector.load %arg1[%c0, %c0_0, %c0_1, %c0_2] : memref<1x16x16x128xf32, #tpu.memory_space<vmem>>, vector<1x16x16x128xf32>
    %1 = vector.shape_cast %0 : vector<1x16x16x128xf32> to vector<16x16x128xf32>
    %2 = vector.shape_cast %1 : vector<16x16x128xf32> to vector<256x128xf32>
    %3 = arith.truncf %2 : vector<256x128xf32> to vector<256x128xbf16>
    %c0_3 = arith.constant 0 : index
    %c0_4 = arith.constant 0 : index
    %4 = vector.load %arg2[%c0_3, %c0_4] : memref<128x128xbf16, #tpu.memory_space<vmem>>, vector<128x128xbf16>
    %cst = arith.constant dense<0.000000e+00> : vector<256x128xf32>
    %5 = tpu.matmul %3, %4, %cst {dimension_numbers = #tpu.dot_dimension_numbers<[1], [0], [0], [1], [0, 0, 1, 1], [], []>} : vector<256x128xbf16>, vector<128x128xbf16>, vector<256x128xf32> -> vector<256x128xf32>
    %c0_5 = arith.constant 0 : index
    %c0_6 = arith.constant 0 : index
    %6 = vector.load %arg3[%c0_5, %c0_6] : memref<1x128xf32, #tpu.memory_space<vmem>>, vector<1x128xf32>
    %7 = vector.broadcast %6 : vector<1x128xf32> to vector<256x128xf32>
    %8 = arith.mulf %5, %7 : vector<256x128xf32>
    %c0_7 = arith.constant 0 : index
    %c0_8 = arith.constant 0 : index
    %9 = vector.load %arg4[%c0_7, %c0_8] : memref<1x128xf32, #tpu.memory_space<vmem>>, vector<1x128xf32>
    %10 = vector.broadcast %9 : vector<1x128xf32> to vector<256x128xf32>
    %11 = arith.addf %8, %10 : vector<256x128xf32>
    %cst_9 = arith.constant 0.000000e+00 : f32
    %12 = vector.broadcast %cst_9 : f32 to vector<256x128xf32>
    %13 = arith.maximumf %11, %12 : vector<256x128xf32>
    %cst_10 = arith.constant 0.000000e+00 : f32
    %14 = vector.broadcast %cst_10 : f32 to vector<1x16x128xf32>
    %c0_11 = arith.constant 0 : index
    %c0_12 = arith.constant 0 : index
    %c0_13 = arith.constant 0 : index
    %15 = vector.load %arg12[%c0_11, %c0_12, %c0_13] : memref<18x16x128xf32, #tpu.memory_space<vmem>>, vector<1x16x128xf32>
    tpu.vector_store %arg12[%c0_11, %c0_12, %c0_13], %14 {strides = array<i32>} : memref<18x16x128xf32, #tpu.memory_space<vmem>>, vector<1x16x128xf32>,
    %cst_14 = arith.constant 0.000000e+00 : f32
    %16 = vector.broadcast %cst_14 : f32 to vector<1x16x128xf32>
    %c17 = arith.constant 17 : index
    %c0_15 = arith.constant 0 : index
    %c0_16 = arith.constant 0 : index
    %17 = vector.load %arg12[%c17, %c0_15, %c0_16] : memref<18x16x128xf32, #tpu.memory_space<vmem>>, vector<1x16x128xf32>
    tpu.vector_store %arg12[%c17, %c0_15, %c0_16], %16 {strides = array<i32>} : memref<18x16x128xf32, #tpu.memory_space<vmem>>, vector<1x16x128xf32>,
    %18 = vector.shape_cast %13 : vector<256x128xf32> to vector<16x16x128xf32>
    %c1 = arith.constant 1 : index
    %c0_17 = arith.constant 0 : index
    %c0_18 = arith.constant 0 : index
    %19 = vector.load %arg12[%c1, %c0_17, %c0_18] : memref<18x16x128xf32, #tpu.memory_space<vmem>>, vector<16x16x128xf32>
    tpu.vector_store %arg12[%c1, %c0_17, %c0_18], %18 {strides = array<i32>} : memref<18x16x128xf32, #tpu.memory_space<vmem>>, vector<16x16x128xf32>,
    %c0_19 = arith.constant 0 : index
    %c0_20 = arith.constant 0 : index
    %c0_21 = arith.constant 0 : index
    %20 = vector.load %arg12[%c0_19, %c0_20, %c0_21] : memref<18x16x128xf32, #tpu.memory_space<vmem>>, vector<18x16x128xf32>
    %21 = vector.shape_cast %20 : vector<18x16x128xf32> to vector<288x128xf32>
    %22 = tpu.iota {dimensions = array<i32: 0>} : vector<288x128xi32>
    %c16_i32 = arith.constant 16 : i32
    %c0_i32 = arith.constant 0 : i32
    %23 = arith.cmpi eq, %c16_i32, %c0_i32 : i32
    %c1_i32 = arith.constant 1 : i32
    %24 = arith.select %23, %c1_i32, %c16_i32 : i32
    %25 = vector.broadcast %24 : i32 to vector<288x128xi32>
    %26 = arith.remsi %22, %25 : vector<288x128xi32>
    %c0_i32_22 = arith.constant 0 : i32
    %27 = vector.broadcast %c0_i32_22 : i32 to vector<288x128xi32>
    %28 = arith.cmpi ne, %26, %27 : vector<288x128xi32>
    %c0_i32_23 = arith.constant 0 : i32
    %29 = vector.broadcast %c0_i32_23 : i32 to vector<288x128xi32>
    %30 = arith.cmpi slt, %26, %29 : vector<288x128xi32>
    %c0_i32_24 = arith.constant 0 : i32
    %31 = arith.cmpi slt, %24, %c0_i32_24 : i32
    %32 = vector.broadcast %31 : i1 to vector<288x128xi1>
    %33 = vector.broadcast %32 : vector<288x128xi1> to vector<288x128xi1>
    %34 = arith.xori %30, %33 : vector<288x128xi1>
    %35 = arith.andi %34, %28 : vector<288x128xi1>
    %36 = vector.broadcast %24 : i32 to vector<288x128xi32>
    %37 = arith.addi %26, %36 : vector<288x128xi32>
    %38 = arith.select %35, %37, %26 : vector<288x128xi1>, vector<288x128xi32>
    %c0_i32_25 = arith.constant 0 : i32
    %39 = vector.broadcast %c0_i32_25 : i32 to vector<288x128xi32>
    %40 = arith.cmpi eq, %38, %39 : vector<288x128xi32>
    %c1_i32_26 = arith.constant 1 : i32
    %41 = tpu.dynamic_rotate %21 by %c1_i32_26 dim 0 : vector<288x128xf32>, i32 -> vector<288x128xf32>
    %cst_27 = arith.constant 0.000000e+00 : f32
    %42 = vector.broadcast %cst_27 : f32 to vector<288x128xf32>
    %43 = arith.select %40, %42, %41 : vector<288x128xi1>, vector<288x128xf32>
    %c15_i32 = arith.constant 15 : i32
    %44 = vector.broadcast %c15_i32 : i32 to vector<288x128xi32>
    %45 = arith.cmpi eq, %38, %44 : vector<288x128xi32>
    %c287_i32 = arith.constant 287 : i32
    %46 = tpu.dynamic_rotate %21 by %c287_i32 dim 0 : vector<288x128xf32>, i32 -> vector<288x128xf32>
    %cst_28 = arith.constant 0.000000e+00 : f32
    %47 = vector.broadcast %cst_28 : f32 to vector<288x128xf32>
    %48 = arith.select %45, %47, %46 : vector<288x128xi1>, vector<288x128xf32>
    %49 = vector.extract_strided_slice %43 {offsets = [0, 0], sizes = [256, 128], strides = [1, 1]} : vector<288x128xf32> to vector<256x128xf32>
    %50 = vector.extract_strided_slice %21 {offsets = [0, 0], sizes = [256, 128], strides = [1, 1]} : vector<288x128xf32> to vector<256x128xf32>
    %51 = vector.extract_strided_slice %48 {offsets = [0, 0], sizes = [256, 128], strides = [1, 1]} : vector<288x128xf32> to vector<256x128xf32>
    %52 = vector.extract_strided_slice %43 {offsets = [16, 0], sizes = [256, 128], strides = [1, 1]} : vector<288x128xf32> to vector<256x128xf32>
    %53 = vector.extract_strided_slice %21 {offsets = [16, 0], sizes = [256, 128], strides = [1, 1]} : vector<288x128xf32> to vector<256x128xf32>
    %54 = vector.extract_strided_slice %48 {offsets = [16, 0], sizes = [256, 128], strides = [1, 1]} : vector<288x128xf32> to vector<256x128xf32>
    %55 = vector.extract_strided_slice %43 {offsets = [32, 0], sizes = [256, 128], strides = [1, 1]} : vector<288x128xf32> to vector<256x128xf32>
    %56 = vector.extract_strided_slice %21 {offsets = [32, 0], sizes = [256, 128], strides = [1, 1]} : vector<288x128xf32> to vector<256x128xf32>
    %57 = vector.extract_strided_slice %48 {offsets = [32, 0], sizes = [256, 128], strides = [1, 1]} : vector<288x128xf32> to vector<256x128xf32>
    %58 = tpu.concatenate %49, %50, %51, %52, %53, %54, %55, %56, %57 in 1 : vector<256x128xf32>, vector<256x128xf32>, vector<256x128xf32>, vector<256x128xf32>, vector<256x128xf32>, vector<256x128xf32>, vector<256x128xf32>, vector<256x128xf32>, vector<256x128xf32> -> vector<256x1152xf32>
    %59 = arith.truncf %58 : vector<256x1152xf32> to vector<256x1152xbf16>
    %c0_29 = arith.constant 0 : index
    %c0_30 = arith.constant 0 : index
    %60 = vector.load %arg5[%c0_29, %c0_30] : memref<1152x128xbf16, #tpu.memory_space<vmem>>, vector<1152x128xbf16>
    %cst_31 = arith.constant dense<0.000000e+00> : vector<256x128xf32>
    %61 = tpu.matmul %59, %60, %cst_31 {dimension_numbers = #tpu.dot_dimension_numbers<[1], [0], [0], [1], [0, 0, 1, 1], [], []>} : vector<256x1152xbf16>, vector<1152x128xbf16>, vector<256x128xf32> -> vector<256x128xf32>
    %c0_32 = arith.constant 0 : index
    %c0_33 = arith.constant 0 : index
    %62 = vector.load %arg6[%c0_32, %c0_33] : memref<1x128xf32, #tpu.memory_space<vmem>>, vector<1x128xf32>
    %63 = vector.broadcast %62 : vector<1x128xf32> to vector<256x128xf32>
    %64 = arith.mulf %61, %63 : vector<256x128xf32>
    %c0_34 = arith.constant 0 : index
    %c0_35 = arith.constant 0 : index
    %65 = vector.load %arg7[%c0_34, %c0_35] : memref<1x128xf32, #tpu.memory_space<vmem>>, vector<1x128xf32>
    %66 = vector.broadcast %65 : vector<1x128xf32> to vector<256x128xf32>
    %67 = arith.addf %64, %66 : vector<256x128xf32>
    %cst_36 = arith.constant 0.000000e+00 : f32
    %68 = vector.broadcast %cst_36 : f32 to vector<256x128xf32>
    %69 = arith.maximumf %67, %68 : vector<256x128xf32>
    %70 = arith.truncf %69 : vector<256x128xf32> to vector<256x128xbf16>
    %c0_37 = arith.constant 0 : index
    %c0_38 = arith.constant 0 : index
    %71 = vector.load %arg8[%c0_37, %c0_38] : memref<128x128xbf16, #tpu.memory_space<vmem>>, vector<128x128xbf16>
    %cst_39 = arith.constant dense<0.000000e+00> : vector<256x128xf32>
    %72 = tpu.matmul %70, %71, %cst_39 {dimension_numbers = #tpu.dot_dimension_numbers<[1], [0], [0], [1], [0, 0, 1, 1], [], []>} : vector<256x128xbf16>, vector<128x128xbf16>, vector<256x128xf32> -> vector<256x128xf32>
    %c0_40 = arith.constant 0 : index
    %c0_41 = arith.constant 0 : index
    %73 = vector.load %arg9[%c0_40, %c0_41] : memref<1x128xf32, #tpu.memory_space<vmem>>, vector<1x128xf32>
    %74 = vector.broadcast %73 : vector<1x128xf32> to vector<256x128xf32>
    %75 = arith.mulf %72, %74 : vector<256x128xf32>
    %c0_42 = arith.constant 0 : index
    %c0_43 = arith.constant 0 : index
    %76 = vector.load %arg10[%c0_42, %c0_43] : memref<1x128xf32, #tpu.memory_space<vmem>>, vector<1x128xf32>
    %77 = vector.broadcast %76 : vector<1x128xf32> to vector<256x128xf32>
    %78 = arith.addf %75, %77 : vector<256x128xf32>
    %c0_44 = arith.constant 0 : index
    %c0_45 = arith.constant 0 : index
    %c0_46 = arith.constant 0 : index
    %c0_47 = arith.constant 0 : index
    %79 = vector.load %arg1[%c0_44, %c0_45, %c0_46, %c0_47] : memref<1x16x16x128xf32, #tpu.memory_space<vmem>>, vector<1x16x16x128xf32>
    %80 = vector.shape_cast %79 : vector<1x16x16x128xf32> to vector<16x16x128xf32>
    %81 = vector.shape_cast %80 : vector<16x16x128xf32> to vector<256x128xf32>
    %82 = arith.addf %78, %81 : vector<256x128xf32>
    %cst_48 = arith.constant 0.000000e+00 : f32
    %83 = vector.broadcast %cst_48 : f32 to vector<256x128xf32>
    %84 = arith.maximumf %82, %83 : vector<256x128xf32>
    %85 = vector.shape_cast %84 : vector<256x128xf32> to vector<16x16x128xf32>
    %c0_49 = arith.constant 0 : index
    %c0_50 = arith.constant 0 : index
    %c0_51 = arith.constant 0 : index
    %c0_52 = arith.constant 0 : index
    %86 = vector.load %arg11[%c0_49, %c0_50, %c0_51, %c0_52] : memref<1x16x16x128xf32, #tpu.memory_space<vmem>>, vector<1x16x16x128xf32>
    %87 = vector.shape_cast %86 : vector<1x16x16x128xf32> to vector<16x16x128xf32>
    %88 = vector.shape_cast %85 : vector<16x16x128xf32> to vector<1x16x16x128xf32>
    tpu.vector_store %arg11[%c0_49, %c0_50, %c0_51, %c0_52], %88 {strides = array<i32>} : memref<1x16x16x128xf32, #tpu.memory_space<vmem>>, vector<1x16x16x128xf32>,
    return
  }
  func.func @transform_0(%arg0: i32) -> (i32, i32, i32, i32) {
    %c0_i32 = arith.constant 0 : i32
    %c0_i32_0 = arith.constant 0 : i32
    %c0_i32_1 = arith.constant 0 : i32
    %c0_i32_2 = arith.constant 0 : i32
    return %arg0, %c0_i32, %c0_i32_0, %c0_i32_1 : i32, i32, i32, i32
  }
  func.func @transform_1(%arg0: i32) -> (i32, i32) {
    %c0_i32 = arith.constant 0 : i32
    %c0_i32_0 = arith.constant 0 : i32
    %c0_i32_1 = arith.constant 0 : i32
    return %c0_i32, %c0_i32_0 : i32, i32
  }
  func.func @transform_2(%arg0: i32) -> (i32, i32) {
    %c0_i32 = arith.constant 0 : i32
    %c0_i32_0 = arith.constant 0 : i32
    %c0_i32_1 = arith.constant 0 : i32
    return %c0_i32, %c0_i32_0 : i32, i32
  }
  func.func @transform_3(%arg0: i32) -> (i32, i32) {
    %c0_i32 = arith.constant 0 : i32
    %c0_i32_0 = arith.constant 0 : i32
    %c0_i32_1 = arith.constant 0 : i32
    return %c0_i32, %c0_i32_0 : i32, i32
  }
  func.func @transform_4(%arg0: i32) -> (i32, i32) {
    %c0_i32 = arith.constant 0 : i32
    %c0_i32_0 = arith.constant 0 : i32
    %c0_i32_1 = arith.constant 0 : i32
    return %c0_i32, %c0_i32_0 : i32, i32
  }
  func.func @transform_5(%arg0: i32) -> (i32, i32) {
    %c0_i32 = arith.constant 0 : i32
    %c0_i32_0 = arith.constant 0 : i32
    %c0_i32_1 = arith.constant 0 : i32
    return %c0_i32, %c0_i32_0 : i32, i32
  }
  func.func @transform_6(%arg0: i32) -> (i32, i32) {
    %c0_i32 = arith.constant 0 : i32
    %c0_i32_0 = arith.constant 0 : i32
    %c0_i32_1 = arith.constant 0 : i32
    return %c0_i32, %c0_i32_0 : i32, i32
  }
  func.func @transform_7(%arg0: i32) -> (i32, i32) {
    %c0_i32 = arith.constant 0 : i32
    %c0_i32_0 = arith.constant 0 : i32
    %c0_i32_1 = arith.constant 0 : i32
    return %c0_i32, %c0_i32_0 : i32, i32
  }
  func.func @transform_8(%arg0: i32) -> (i32, i32) {
    %c0_i32 = arith.constant 0 : i32
    %c0_i32_0 = arith.constant 0 : i32
    %c0_i32_1 = arith.constant 0 : i32
    return %c0_i32, %c0_i32_0 : i32, i32
  }
  func.func @transform_9(%arg0: i32) -> (i32, i32) {
    %c0_i32 = arith.constant 0 : i32
    %c0_i32_0 = arith.constant 0 : i32
    %c0_i32_1 = arith.constant 0 : i32
    return %c0_i32, %c0_i32_0 : i32, i32
  }
  func.func @transform_10(%arg0: i32) -> (i32, i32, i32, i32) {
    %c0_i32 = arith.constant 0 : i32
    %c0_i32_0 = arith.constant 0 : i32
    %c0_i32_1 = arith.constant 0 : i32
    %c0_i32_2 = arith.constant 0 : i32
    return %arg0, %c0_i32, %c0_i32_0, %c0_i32_1 : i32, i32, i32, i32
  }
}

</mosaic_0001>

<bundles_post_ra>
// kernel: tpu_custom_call.1
= control target key start
LH: loop header
LB: loop body
LE: loop exit
PB: predicated region body
PF: predicated region fallthrough
CT: control target
= control target key end

     0   :  { %s7456_s0 = inlined_call_operand.hbm [shape: f32[2,16,16,128], index: 0, kind: input, shape index: {}]   ;;  %s7457_s1 = inlined_call_operand.hbm [shape: bf16[128,128], index: 1, kind: input, shape index: {}]   ;;  %s7458_s2 = inlined_call_operand.vmem [shape: f32[1,128], index: 2, kind: input, shape index: {}]   ;;  %s7459_s3 = inlined_call_operand.vmem [shape: f32[1,128], index: 3, kind: input, shape index: {}]   ;;  %s7460_s4 = inlined_call_operand.hbm [shape: bf16[1152,128], index: 4, kind: input, shape index: {}]   ;;  %s7461_s5 = inlined_call_operand.vmem [shape: f32[1,128], index: 5, kind: input, shape index: {}]   ;;  %s7462_s6 = inlined_call_operand.vmem [shape: f32[1,128], index: 6, kind: input, shape index: {}]   ;;  %s7463_s7 = inlined_call_operand.hbm [shape: bf16[128,128], index: 7, kind: input, shape index: {}]   ;;  %s7464_s8 = inlined_call_operand.vmem [shape: f32[1,128], index: 8, kind: input, shape index: {}]   ;;  %s7465_s9 = inlined_call_operand.vmem [shape: f32[1,128], index: 9, kind: input, shape index: {}]   ;;  %s7466_s10 = inlined_call_operand.hbm [shape: f32[2,16,16,128], index: 10, kind: output, shape index: {}]  }
   0x1   :  { %7542 = sst [smem:[#allocation48_spill]] %s7465_s9 }
   0x2   :  { %7543 = sst [smem:[#allocation49_spill]] %s7466_s10 }
   0x3   :  { %15 = vsyncpa [#allocation4], 0 }
   0x4   :  { %17 = vsyncpa [#allocation4 + $0x1], 0 }
   0x5   :  { %18 = vsyncpa [#allocation7], 0 }
   0x6   :  { %19 = vsyncpa [#allocation10], 0 }
   0x7   :  { %20 = vsyncpa [#allocation5], 0 }
   0x8   :  { %22 = vsyncpa [#allocation5 + $0x1], 0  ;;  %s5396_s13 = smov 0   ;;  %s5398_s14 = smov 0  }
   0x9   :  { %s5400_s15 = smov 0   ;;  %s5402_s16 = smov 0  }
   0xa LB: > { %7544 = sst [smem:[#allocation16_spill]] %s5313_s13  ;;  %s5417_s17 = sadd.s32 4294967295, %s5325_s16   ;;  %s5325_s16 = sphi %s5402_s16, %s7842_s16   ;;  %s5321_s15 = sphi %s5400_s15, %s7841_s15   ;;  %s5317_s14 = sphi %s5398_s14, %s7840_s14   ;;  %s5313_s13 = sphi %s5396_s13, %s7839_s13  }
   0xb   : > { %s3747_s18 = sadd.s32 4294967294, %s5325_s16   ;;  %p48_p0 = scmp.ne.s32.totalorder %s5317_s14, %s5313_s13 }
   0xc   : > { %p7467_p1 = scmp.eq.s32.totalorder %s5417_s17, 0  ;;  %p267_p3 = scmp.eq.s32.totalorder %s3747_s18, 1 }
   0xd   : > { %p3748_p5 = scmp.ge.s32.totalorder %s5325_s16, 1  ;;  %p274_p7 = scmp.lt.s32.totalorder %s5325_s16, 3 }
   0xe   : > { %p5426_p4 = por %p7467_p1, %p48_p0  ;;  %p5431_p6 = por %p267_p3, %p48_p0 }
   0xf   : > { %p5436_p8 = pnand %p3748_p5, %p274_p7  ;;  %s5327_s22 = smov [#allocation6]  }
  0x10   : > { %s7545_s19 = scalar_select %p5426_p4, 1, 0 }
  0x11   : > { %s7546_s20 = scalar_select %p5431_p6, 1, 0 }
  0x12   : > { %s7548_s21 = scalar_select %p5436_p8, 1, 0 }
  0x13   : > { %7547 = sst [smem:[#allocation17_spill]] %s7546_s20  ;;  %s286_s23 = sshll.u32 %s5327_s22, 4  ;;  %s5440_s23 = int_to_ptr.vmem [resolvable:$true] %s286_s23 }
  0x14   : > { %p4979_p9 = pneg %p5436_p8  ;;  %s5328_s25 = smov [#allocation8]  }
  0x15   : > { %s305_s26 = sshll.u32 %s5328_s25, 4  ;;  %s5329_s27 = smov [#allocation9]   ;;  %s5451_s26 = int_to_ptr.vmem [resolvable:$true] %s305_s26 }
  0x16   : > { %p5447_p11 = pnand %p4979_p9, %p7467_p1  ;;  %s5453_s28 = sshll.u32 %s5329_s27, 4  ;;  %s325_s28 = int_to_ptr.vmem [resolvable:$true] %s5453_s28 }
  0x17   : > { %s5137_s11 = scalar_lea.hbm %s7457_s1, 1024 }
  0x18   : > { %p5138_p12 = scmp.ne.s32.totalorder %s7457_s1, %s5137_s11  ;;  %p5463_p13 = pneg %p5447_p11 }
  0x19   : > { %p5144_p5 = scmp.lt.u32.totalorder %s5137_s11, %s7457_s1 }
  0x1a   : > { %p5140_p0 = pnand %p5463_p13, %p5138_p12 }
  0x1c   : > { %p5141_p3 = pneg %p5140_p0 }
  0x1e   : > { %p5146_p7 = pnand %p5144_p5, %p5141_p3 }
  0x20   : > { %5149 = shalt.err (!%p5146_p7)
}
  0x21   : > { %s5150_s29 = scalar_lea.vmem %s5440_s23, 1024  ;;  %p5158_p2 = scmp.lt.s32.totalorder %s5440_s23, %s5440_s23 }
  0x22   : > { %p5151_p9 = scmp.ne.s32.totalorder %s5440_s23, %s5150_s29  ;;  %p5159_p6 = scmp.lt.s32.totalorder %s5150_s29, %s5150_s29 }
  0x24   : > { %p5153_p10 = pnand %p5151_p9, %p5463_p13  ;;  %p5160_p12 = por %p5159_p6, %p5158_p2 }
  0x26   : > { %p5154_p1 = pneg %p5153_p10 }
  0x28   : > { %p5161_p0 = pnand %p5160_p12, %p5154_p1 }
  0x2a   : > { %5164 = shalt.err (!%p5161_p0)
}
  0x2b   : > { %s5330_s30 = smov 64   ;;  %s5331_s11 = smov 4  }
  0x2c   : > { %4982 = dma.hbm_to_vmem [thread:$0]  (!%p5447_p11), %s7457_s1, 1024, %s5440_s23, [#allocation7], %s5330_s30, %s5330_s30, %s5331_s11  }
  0x2d   : > { %s5165_s29 = scalar_lea.hbm %s7460_s4, 9216 }
  0x2e   : > { %p5166_p1 = scmp.ne.s32.totalorder %s7460_s4, %s5165_s29  ;;  %p5172_p10 = scmp.lt.u32.totalorder %s5165_s29, %s7460_s4 }
  0x30   : > { %p5168_p2 = pnand %p5166_p1, %p5463_p13 }
  0x32   : > { %p5169_p6 = pneg %p5168_p2 }
  0x34   : > { %p5174_p3 = pnand %p5172_p10, %p5169_p6 }
  0x36   : > { %5177 = shalt.err (!%p5174_p3)
}
  0x37   : > { %s5178_s23 = scalar_lea.vmem %s5451_s26, 9216  ;;  %p5186_p12 = scmp.lt.s32.totalorder %s5451_s26, %s5451_s26 }
  0x38   : > { %p5179_p5 = scmp.ne.s32.totalorder %s5451_s26, %s5178_s23  ;;  %p5187_p0 = scmp.lt.s32.totalorder %s5178_s23, %s5178_s23 }
  0x3a   : > { %p5181_p7 = pnand %p5179_p5, %p5463_p13  ;;  %p5188_p1 = por %p5187_p0, %p5186_p12 }
  0x3c   : > { %p5182_p9 = pneg %p5181_p7 }
  0x3e   : > { %p5189_p2 = pnand %p5188_p1, %p5182_p9 }
  0x40   : > { %5192 = shalt.err (!%p5189_p2)
}
  0x41   : > { %4985 = dma.hbm_to_vmem [thread:$0]  (!%p5447_p11), %s7460_s4, 9216, %s5451_s26, [#allocation7], %s5330_s30, %s5330_s30, %s5331_s11  }
  0x42   : > { %s5193_s12 = scalar_lea.hbm %s7463_s7, 1024 }
  0x43   : > { %p5194_p6 = scmp.ne.s32.totalorder %s7463_s7, %s5193_s12  ;;  %p5200_p5 = scmp.lt.u32.totalorder %s5193_s12, %s7463_s7 }
  0x45   : > { %p5196_p10 = pnand %p5194_p6, %p5463_p13 }
  0x47   : > { %p5197_p3 = pneg %p5196_p10 }
  0x49   : > { %p5202_p7 = pnand %p5200_p5, %p5197_p3 }
  0x4b   : > { %5205 = shalt.err (!%p5202_p7)
}
  0x4c   : > { %s5206_s23 = scalar_lea.vmem %s325_s28, 1024  ;;  %p5214_p1 = scmp.lt.s32.totalorder %s325_s28, %s325_s28 }
  0x4d   : > { %p5207_p9 = scmp.ne.s32.totalorder %s325_s28, %s5206_s23  ;;  %p5215_p2 = scmp.lt.s32.totalorder %s5206_s23, %s5206_s23 }
  0x4f   : > { %p5209_p12 = pnand %p5207_p9, %p5463_p13  ;;  %p5216_p4 = por %p5215_p2, %p5214_p1 }
  0x51   : > { %p5210_p0 = pneg %p5209_p12 }
  0x53   : > { %p5217_p8 = pnand %p5216_p4, %p5210_p0 }
  0x55   : > { %5220 = shalt.err (!%p5217_p8)
}
  0x56   : > { %4988 = dma.hbm_to_vmem [thread:$0]  (!%p5447_p11), %s7463_s7, 1024, %s325_s28, [#allocation10], %s5330_s30, %s5330_s30, %s5331_s11  }
  0x57   : > { %s5536_s22 = sadd.s32 1, %s5325_s16   ;;  %s35_s10 = sadd.s32 1, %s5321_s15 }
  0x58   : > { %s32_s24 = ssub.s32 %s5325_s16, %s5536_s22  ;;  %p42_p8 = scmp.ne.s32.totalorder %s5321_s15, %s5317_s14 }
  0x59   : > { %p33_p4 = scmp.eq.s32.totalorder %s32_s24, 0  ;;  %p43_p13 = scmp.eq.s32.totalorder %s5325_s16, 0 }
  0x5a   : > { %p5000_p6 = scmp.lt.s32.totalorder %s5325_s16, 2  ;;  %p7551_p3 = scmp.eq.s32.totalorder %s5417_s17, 1 }
  0x5b   : > { %s5546_s13 = scalar_select %p33_p4, %s5321_s15, %s35_s10  }
  0x5c   : > { %p44_p10 = por %p43_p13, %p42_p8  ;;  %p5550_p5 = por %p7551_p3, %p42_p8 }
  0x5d   : > { %s344_s12 = sand.u32 1, %s5321_s15   ;;  %s4245_s18 = sshll.u32 %s5325_s16, 12 }
  0x5e   : > { %s3753_s28 = sshll.u32 %s344_s12, 8  ;;  %s5559_s25 = scalar_lea.hbm %s7456_s0, %s4245_s18 }
  0x5f   : > { %s348_s27 = scalar_lea.vmem [#allocation3], %s3753_s28  ;;  %p5561_p11 = pnand %p5000_p6, %p44_p10 }
  0x60   : > { %s355_s29 = sshll.u32 %s348_s27, 4  ;;  %s5567_s26 = scalar_lea.sflag [#allocation4], %s344_s12  ;;  %s5565_s29 = int_to_ptr.vmem [resolvable:$true] %s355_s29 }
  0x61   : > { %s5221_s9 = scalar_lea.hbm %s5559_s25, 4096  ;;  %p5223_p9 = pneg %p5561_p11 }
  0x62   : > { %p5222_p7 = scmp.ne.s32.totalorder %s5559_s25, %s5221_s9  ;;  %s5226_s18 = scalar_lea.hbm %s7456_s0, 8192 }
  0x63   : > { %p5227_p1 = scmp.lt.u32.totalorder %s5559_s25, %s7456_s0  ;;  %p5228_p2 = scmp.lt.u32.totalorder %s5226_s18, %s5221_s9 }
  0x64   : > { %p5224_p12 = pnand %p5223_p9, %p5222_p7  ;;  %p5230_p8 = scmp.lt.u32.totalorder %s5221_s9, %s5559_s25 }
  0x65   : > { %p5229_p4 = por %p5228_p2, %p5227_p1 }
  0x66   : > { %p5225_p0 = pneg %p5224_p12 }
  0x67   : > { %p5231_p13 = por %p5230_p8, %p5229_p4 }
  0x69   : > { %p5232_p6 = pnand %p5231_p13, %p5225_p0 }
  0x6b   : > { %5235 = shalt.err (!%p5232_p6)
}
  0x6c   : > { %s5236_s12 = scalar_lea.vmem %s5565_s29, 4096  ;;  %s5332_s11 = smov [#allocation3]  }
  0x6d   : > { %p5237_p10 = scmp.ne.s32.totalorder %s5565_s29, %s5236_s12  ;;  %s5241_s27 = sshll.u32 %s5332_s11, 4  ;;  %s5242_s27 = int_to_ptr.vmem [resolvable:$false] %s5241_s27 }
  0x6e   : > { %s5243_s24 = scalar_lea.vmem %s5242_s27, 8192  ;;  %p5244_p12 = scmp.lt.s32.totalorder %s5565_s29, %s5242_s27 }
  0x6f   : > { %p5239_p3 = pnand %p5237_p10, %p5223_p9  ;;  %p5245_p1 = scmp.lt.s32.totalorder %s5243_s24, %s5236_s12 }
  0x71   : > { %p5240_p7 = pneg %p5239_p3  ;;  %p5246_p2 = por %p5245_p1, %p5244_p12 }
  0x73   : > { %p5247_p4 = pnand %p5246_p2, %p5240_p7 }
  0x75   : > { %5250 = shalt.err (!%p5247_p4)
}
  0x76   : > { %s5333_s9 = smov 128   ;;  %s5334_s10 = smov 8  }
  0x77   : > { %4992 = dma.hbm_to_vmem [thread:$0]  (!%p5561_p11), %s5559_s25, 4096, %s5565_s29, %s5567_s26, %s5333_s9, %s5333_s9, %s5334_s10  }
  0x78   : > { %p7554_p9 = scmp.ne.s32.totalorder %s7548_s21, 0 }
  0x7a   : > { %367 = sbr.rel (%p7554_p9) target bundleno = 1178 (0x49a), region = 60 }
  0x81   : > { %s5598_s18 = sand.u32 1, %s5317_s14   ;;  %p7555_p0 = scmp.ne.s32.totalorder %s7545_s19, 0 }
  0x82   : > { %s3757_s28 = sshll.u32 %s5598_s18, 8  ;;  %s370_s30 = scalar_lea.sflag [#allocation4], %s5598_s18 }
  0x83   : > { %s5604_s12 = scalar_lea.vmem [#allocation3], %s3757_s28 }
  0x84   : > { %5296 = dma.done.wait (%p7555_p0), %s370_s30, 4096  }
  0x85   : > { %5298 = vsyncadd (%p7555_p0), %s370_s30, 4294963200  ;;  %p7556_p11 = scmp.eq.s32.totalorder %s5417_s17, 0 }
  0x87   : > { %5300 = dma.done.wait (%p7556_p11), [#allocation7], 10240   ;;  %p7557_p8 = pmov %p7556_p11 }
  0x89   : > { %5302 = vsyncadd (%p7557_p8), [#allocation7], 4294957056  ;;  %p7558_p13 = pmov %p7557_p8 }
  0x8a   : > { %p7559_p6 = pmov %p7557_p8 }
  0x8b   : > { %5304 = dma.done.wait (%p7558_p13), [#allocation10], 1024  }
  0x8c   : > { %5306 = vsyncadd (%p7559_p6), [#allocation10], 4294966272  ;;  %v5049_v0 = vld [vmem:[#allocation6] sm:$0xff]   ;;  %v5050_v1 = vld [vmem:[#allocation6 + $0x8] sm:$0xff]   ;;  %vm7503_vm1 = vmmov 1   ;;  %s7832_s19 = sld [smem:[#allocation48_spill]] }
  0x8d   : > { %4803 = vmatprep.subr.bf16.mxu0 %v5049_v0  ;;  %4947 = vmatprep.subr.bf16.mxu1 %v5049_v0  ;;  %v5051_v2 = vld [vmem:[#allocation6 + $0x10] sm:$0xff]   ;;  %v5052_v3 = vld [vmem:[#allocation6 + $0x18] sm:$0xff]   ;;  %v423_v4 = vld [vmem:[%s5604_s12] sm:$0xff]  ;;  %s7287_s21 = scalar_lea.vmem [#allocation11], %s3757_s28  ;;  %s4246_s28 = sshll.u32 %s5417_s17, 12 }
  0x8e   : > { %4804 = vmatpush3.bf16.msra.mxu0 %v5049_v0  ;;  %4955 = vmatpush3.bf16.msra.mxu1 %v5049_v0  ;;  %v424_v5 = vld [vmem:[%s5604_s12 + $0x8] sm:$0xff]  ;;  %v5053_v7 = vld [vmem:[#allocation6 + $0x20] sm:$0xff]   ;;  %v5055_v12 = vld [vmem:[#allocation6 + $0x30] sm:$0xff]   ;;  %s3645_s25 = sshll.u32 %s7287_s21, 4  ;;  %s7833_s26 = sld [smem:[#allocation49_spill]]  ;;  %s7409_s25 = int_to_ptr.vmem [resolvable:$true] %s3645_s25 }
  0x8f   : > { %4805 = vmatprep.subr.bf16.mxu0 %v5050_v1  ;;  %4948 = vmatprep.subr.bf16.mxu1 %v5050_v1  ;;  %v455_v6 = vpack.c.bf16 %v424_v5, %v423_v4  ;;  %v439_v8 = vld [vmem:[%s5604_s12 + $0x80] sm:$0xff]  ;;  %v440_v9 = vld [vmem:[%s5604_s12 + $0x88] sm:$0xff]  ;;  %v5056_v13 = vld [vmem:[#allocation6 + $0x38] sm:$0xff]   ;;  %s3632_s17 = scalar_lea.sflag [#allocation5], %s5598_s18  ;;  %s5338_s27 = smov [#allocation11]  }
  0x90   : > { %v463_v10 = vpack.c.bf16 %v440_v9, %v439_v8  ;;  %v5054_v11 = vld [vmem:[#allocation6 + $0x28] sm:$0xff]   ;;  %v425_v14 = vld [vmem:[%s5604_s12 + $0x10] sm:$0xff]  ;;  %v426_v15 = vld [vmem:[%s5604_s12 + $0x18] sm:$0xff]  ;;  %s5255_s24 = sshll.u32 %s5338_s27, 4  ;;  %s5256_s24 = int_to_ptr.vmem [resolvable:$false] %s5255_s24 }
  0x91   : > { %4819 = vmatprep.mubr.bf16.mxu0 %v455_v6  ;;  %v427_v16 = vld [vmem:[%s5604_s12 + $0x20] sm:$0xff]  ;;  %v428_v17 = vld [vmem:[%s5604_s12 + $0x28] sm:$0xff]  ;;  %v441_v18 = vld [vmem:[%s5604_s12 + $0x90] sm:$0xff]  ;;  %v456_v24 = vpack.c.bf16 %v426_v15, %v425_v14  ;;  %v880_v14 = vlaneseq  ;;  %s5257_s9 = scalar_lea.vmem %s5256_s24, 8192  ;;  %p5258_p12 = scmp.lt.s32.totalorder %s7409_s25, %s5256_s24 }
  0x92   : > { %4806 = vmatpush3.bf16.msra.mxu0 %v5050_v1  ;;  %4956 = vmatpush3.bf16.msra.mxu1 %v5050_v1  ;;  %v442_v19 = vld [vmem:[%s5604_s12 + $0x98] sm:$0xff]  ;;  %v443_v20 = vld [vmem:[%s5604_s12 + $0xa0] sm:$0xff]  ;;  %v444_v21 = vld [vmem:[%s5604_s12 + $0xa8] sm:$0xff]  ;;  %v457_v25 = vpack.c.bf16 %v428_v17, %v427_v16 }
  0x93   : > { %4807 = vmatprep.subr.bf16.mxu0 %v5051_v2  ;;  %4949 = vmatprep.subr.bf16.mxu1 %v5051_v2  ;;  %v5064_v22 = vld [vmem:[#allocation8 + $0xc0] sm:$0xff]   ;;  %v464_v26 = vpack.c.bf16 %v442_v19, %v441_v18  ;;  %v465_v28 = vpack.c.bf16 %v444_v21, %v443_v20  ;;  %v5059_v29 = vld [vmem:[#allocation8 + $0x48] sm:$0xff]   ;;  %v429_v30 = vld [vmem:[%s5604_s12 + $0x30] sm:$0xff]  ;;  %v5650_v17 = vshrl.u32 %v880_v14, 7  ;;  %v5335_v20 = vmov 0.0  }
  0x94   : > { %4835 = vmatprep.mubr.bf16.mxu1 %v463_v10  ;;  %v5057_v23 = vld [vmem:[#allocation8 + $0x40] sm:$0xff]   ;;  %v430_v31 = vld [vmem:[%s5604_s12 + $0x38] sm:$0xff]  ;;  %v432_v34 = vld [vmem:[%s5604_s12 + $0x48] sm:$0xff]  ;;  %v5653_v21 = vrot.slane %v5335_v20, 7  ;;  %s7407_s11 = scalar_lea.hbm %s7833_s26, %s4246_s28 }
  0x95   : > { %v5058_v27 = vld [vmem:[#allocation8] sm:$0xff]   ;;  %v445_v35 = vld [vmem:[%s5604_s12 + $0xb0] sm:$0xff]  ;;  %v446_v36 = vld [vmem:[%s5604_s12 + $0xb8] sm:$0xff]  ;;  %v458_v43 = vpack.c.bf16 %v430_v31, %v429_v30  ;;  %vm7505_vm3 = vcmp.lt.s32.totalorder %v5650_v17, 7  ;;  %vm7499_vm4 = vcmp.lt.s32.totalorder %v5650_v17, 1 }
  0x96   : > { %4808 = vmatpush3.bf16.msra.mxu0 %v5051_v2  ;;  %4957 = vmatpush3.bf16.msra.mxu1 %v5051_v2  ;;  %v5066_v32 = vld [vmem:[#allocation8 + $0x80] sm:$0xff]   ;;  %v5068_v37 = vld [vmem:[#allocation8 + $0xc8] sm:$0xff]   ;;  %v5061_v41 = vld [vmem:[#allocation8 + $0x50] sm:$0xff]   ;;  %v466_v47 = vpack.c.bf16 %v446_v36, %v445_v35  ;;  %7560 = vst [vmem:[#allocation18_spill] sm:$0xff] %v5653_v21 }
  0x97   : > { %4809 = vmatprep.subr.bf16.mxu0 %v5052_v3  ;;  %4950 = vmatprep.subr.bf16.mxu1 %v5052_v3  ;;  %v431_v33 = vld [vmem:[%s5604_s12 + $0x40] sm:$0xff]  ;;  %v448_v39 = vld [vmem:[%s5604_s12 + $0xc8] sm:$0xff]  ;;  %v5062_v44 = vld [vmem:[#allocation8 + $0x10] sm:$0xff]  }
  0x98   : > { %v447_v38 = vld [vmem:[%s5604_s12 + $0xc0] sm:$0xff]  ;;  %v5060_v40 = vld [vmem:[#allocation8 + $0x8] sm:$0xff]   ;;  %v5072_v45 = vld [vmem:[#allocation8 + $0xd0] sm:$0xff]   ;;  %v459_v46 = vpack.c.bf16 %v432_v34, %v431_v33 }
  0x99   : > { %v5070_v42 = vld [vmem:[#allocation8 + $0x88] sm:$0xff]   ;;  %v5063_v48 = vld [vmem:[#allocation8 + $0x58] sm:$0xff]   ;;  %v5074_v49 = vld [vmem:[#allocation8 + $0x90] sm:$0xff]   ;;  %v467_v50 = vpack.c.bf16 %v448_v39, %v447_v38 }
  0x9a   : > { %4810 = vmatpush3.bf16.msra.mxu0 %v5052_v3  ;;  %4958 = vmatpush3.bf16.msra.mxu1 %v5052_v3  ;;  %v5076_v51 = vld [vmem:[#allocation8 + $0xd8] sm:$0xff]   ;;  %v433_v52 = vld [vmem:[%s5604_s12 + $0x50] sm:$0xff]  ;;  %v435_v54 = vld [vmem:[%s5604_s12 + $0x60] sm:$0xff] }
  0x9b   : > { %4811 = vmatprep.subr.bf16.mxu0 %v5053_v7  ;;  %4951 = vmatprep.subr.bf16.mxu1 %v5053_v7  ;;  %v434_v53 = vld [vmem:[%s5604_s12 + $0x58] sm:$0xff]  ;;  %v436_v55 = vld [vmem:[%s5604_s12 + $0x68] sm:$0xff]  ;;  %v449_v56 = vld [vmem:[%s5604_s12 + $0xd0] sm:$0xff] }
  0x9c   : > { %v450_v57 = vld [vmem:[%s5604_s12 + $0xd8] sm:$0xff]  ;;  %v451_v59 = vld [vmem:[%s5604_s12 + $0xe0] sm:$0xff]  ;;  %v452_v60 = vld [vmem:[%s5604_s12 + $0xe8] sm:$0xff]  ;;  %v460_v63 = vpack.c.bf16 %v434_v53, %v433_v52  ;;  %v461_v1 = vpack.c.bf16 %v436_v55, %v435_v54  ;;  %v5667_v52 = vadd.s32 48, %v5650_v17  ;;  %v5670_v53 = vadd.s32 40, %v5650_v17 }
  0x9d   : > { %v5065_v58 = vld [vmem:[#allocation8 + $0x18] sm:$0xff]   ;;  %v5067_v61 = vld [vmem:[#allocation8 + $0x60] sm:$0xff]   ;;  %v468_v2 = vpack.c.bf16 %v450_v57, %v449_v56  ;;  %v5071_v3 = vld [vmem:[#allocation8 + $0x68] sm:$0xff]   ;;  %v469_v4 = vpack.c.bf16 %v452_v60, %v451_v59  ;;  %v5673_v54 = vadd.s32 64, %v5650_v17  ;;  %v5676_v55 = vadd.s32 56, %v5650_v17 }
  0x9e   : > { %4812 = vmatpush3.bf16.msra.mxu0 %v5053_v7  ;;  %4959 = vmatpush3.bf16.msra.mxu1 %v5053_v7  ;;  %v5078_v62 = vld [vmem:[#allocation8 + $0x98] sm:$0xff]   ;;  %v5069_v0 = vld [vmem:[#allocation8 + $0x20] sm:$0xff]   ;;  %v437_v5 = vld [vmem:[%s5604_s12 + $0x70] sm:$0xff]  ;;  %v5679_v56 = vadd.s32 80, %v5650_v17  ;;  %v5682_v57 = vadd.s32 72, %v5650_v17  ;;  %v5688_v59 = vadd.s32 88, %v5650_v17 }
  0x9f   : > { %4813 = vmatprep.subr.bf16.mxu0 %v5054_v11  ;;  %4952 = vmatprep.subr.bf16.mxu1 %v5054_v11  ;;  %v438_v6 = vld [vmem:[%s5604_s12 + $0x78] sm:$0xff]  ;;  %v453_v7 = vld [vmem:[%s5604_s12 + $0xf0] sm:$0xff]  ;;  %v5073_v9 = vld [vmem:[#allocation8 + $0x28] sm:$0xff]   ;;  %v5691_v60 = vadd.s32 112, %v5650_v17 }
  0xa0   : > { %v454_v8 = vld [vmem:[%s5604_s12 + $0xf8] sm:$0xff]  ;;  %v5075_v10 = vld [vmem:[#allocation8 + $0x70] sm:$0xff]   ;;  %v5080_v16 = vld [vmem:[#allocation8 + $0xe0] sm:$0xff]  }
  0xa1   : > { %v5079_v15 = vld [vmem:[#allocation8 + $0x78] sm:$0xff]   ;;  %v5082_v19 = vld [vmem:[#allocation8 + $0xa0] sm:$0xff]   ;;  %v5091_v33 = vld [vmem:[#allocation8 + $0x148] sm:$0xff]  }
  0xa2   : > { %4814 = vmatpush3.bf16.msra.mxu0 %v5054_v11  ;;  %4960 = vmatpush3.bf16.msra.mxu1 %v5054_v11  ;;  %v462_v11 = vpack.c.bf16 %v438_v6, %v437_v5  ;;  %v5081_v18 = vld [vmem:[#allocation8 + $0x38] sm:$0xff]   ;;  %v5086_v30 = vld [vmem:[#allocation8 + $0x100] sm:$0xff]   ;;  %v5092_v34 = vld [vmem:[#allocation8 + $0x108] sm:$0xff]   ;;  %v5707_v5 = vadd.s32 128, %v5650_v17 }
  0xa3   : > { %4815 = vmatprep.subr.bf16.mxu0 %v5055_v12  ;;  %4953 = vmatprep.subr.bf16.mxu1 %v5055_v12  ;;  %v5089_v31 = vld [vmem:[#allocation8 + $0xf8] sm:$0xff]   ;;  %v5093_v35 = vld [vmem:[#allocation8 + $0x150] sm:$0xff]   ;;  %v5097_v39 = vld [vmem:[#allocation8 + $0x1c0] sm:$0xff]  }
  0xa4   : > { %v5094_v36 = vld [vmem:[#allocation8 + $0x110] sm:$0xff]   ;;  %v5096_v38 = vld [vmem:[#allocation8 + $0x118] sm:$0xff]   ;;  %v5712_v6 = vld [vmem:[%s7459_s3] ss:$0 sm:$0xff] }
  0xa6   : > { %4816 = vmatpush3.bf16.msra.mxu0 %v5055_v12  ;;  %4961 = vmatpush3.bf16.msra.mxu1 %v5055_v12  ;;  %v5077_v12 = vld [vmem:[#allocation8 + $0x30] sm:$0xff]  }
  0xa7   : > { %4817 = vmatprep.subr.bf16.mxu0 %v5056_v13  ;;  %4954 = vmatprep.subr.bf16.mxu1 %v5056_v13 }
  0xaa   : > { %4818 = vmatpush3.bf16.msra.mxu0 %v5056_v13  ;;  %4962 = vmatpush3.bf16.msra.mxu1 %v5056_v13  ;;  %v470_v13 = vpack.c.bf16 %v454_v8, %v453_v7  ;;  %v956_v7 = vand.u32 15, %v5670_v53  ;;  %v977_v8 = vand.u32 15, %v5673_v54 }
  0xab   : > { %4419 = vmatprep.subr.bf16.mxu0 %v5064_v22  ;;  %4307 = vmatprep.subr.bf16.mxu1 %v5057_v23  ;;  %v921_v22 = vand.u32 15, %v5650_v17  ;;  %v3846_v23 = vpack.c.bf16 %v5653_v21, %v5653_v21 }
  0xac   : > { %vm5908_vm13 = vcmp.ne.s32.totalorder %v956_v7, 15  ;;  %vm5926_vm14 = vcmp.ne.s32.totalorder %v977_v8, 0  ;;  %v5116_v7 = vld [vmem:[#allocation8 + $0x1a8] sm:$0xff]  }
  0xad   : > { %4820 = vmatmul.mubr.bf16.vlgmr.msra.gmra.mrb[0].mxu0 %v456_v24  ;;  %4836 = vmatmul.mubr.bf16.vlgmr.msra.gmra.mrb[0].mxu1 %v464_v26  ;;  %vm4247_vm0 = vcmp.ne.s32.totalorder %v921_v22, 0  ;;  %v5083_v24 = vld [vmem:[#allocation8 + $0xe8] sm:$0xff]  }
  0xae   : > { %4823 = vmatprep.mubr.bf16.mxu0 %v457_v25  ;;  %4839 = vmatprep.mubr.bf16.mxu1 %v465_v28  ;;  %v7473_v25 = vmov 0.0|0.0   ;;  %vm3845_vm2 = vmpackc.low %vm7503_vm1, %vm4247_vm0  ;;  %v5084_v26 = vld [vmem:[#allocation8 + $0xa8] sm:$0xff]   ;;  %v5088_v28 = vld [vmem:[#allocation8 + $0xb0] sm:$0xff]  }
  0xaf   : > { %4308 = vmatpush3.bf16.msra.mxu1 %v5058_v27  ;;  %4420 = vmatpush3.bf16.msra.mxu0 %v5066_v32  ;;  %v5087_v27 = vld [vmem:[#allocation8 + $0xf0] sm:$0xff]   ;;  %v5090_v32 = vld [vmem:[#allocation8 + $0xb8] sm:$0xff]  }
  0xb0   : > { %4309 = vmatprep.subr.bf16.mxu1 %v5059_v29  ;;  %4421 = vmatprep.subr.bf16.mxu0 %v5068_v37  ;;  %v5085_v29 = vld [vmem:[#allocation8 + $0x140] sm:$0xff]   ;;  %v5095_v37 = vld [vmem:[#allocation8 + $0x158] sm:$0xff]  }
  0xb3   : > { %4310 = vmatpush3.bf16.msra.mxu1 %v5060_v40  ;;  %4422 = vmatpush3.bf16.msra.mxu0 %v5070_v42  ;;  %v5099_v40 = vld [vmem:[#allocation8 + $0x160] sm:$0xff]   ;;  %v5103_v42 = vld [vmem:[#allocation8 + $0x168] sm:$0xff]  }
  0xb4   : > { %4311 = vmatprep.subr.bf16.mxu1 %v5061_v41  ;;  %4423 = vmatprep.subr.bf16.mxu0 %v5072_v45  ;;  %v5100_v41 = vld [vmem:[#allocation8 + $0x120] sm:$0xff]   ;;  %v5108_v45 = vld [vmem:[#allocation8 + $0x130] sm:$0xff]  }
  0xb5   : > { %4824 = vmatmul.mubr.bf16.gmra.mrb[4].mxu0 %v458_v43  ;;  %4840 = vmatmul.mubr.bf16.gmra.mrb[4].mxu1 %v466_v47  ;;  %v5104_v43 = vld [vmem:[#allocation8 + $0x128] sm:$0xff]   ;;  %v5112_v47 = vld [vmem:[#allocation8 + $0x138] sm:$0xff]  }
  0xb6   : > { %4827 = vmatprep.mubr.bf16.mxu0 %v459_v46  ;;  %4843 = vmatprep.mubr.bf16.mxu1 %v467_v50  ;;  %v5111_v46 = vld [vmem:[#allocation8 + $0x178] sm:$0xff]   ;;  %v885_v50 = vadd.s32 32, %v5650_v17 }
  0xb7   : > { %4312 = vmatpush3.bf16.msra.mxu1 %v5062_v44  ;;  %4424 = vmatpush3.bf16.msra.mxu0 %v5074_v49  ;;  %v5107_v44 = vld [vmem:[#allocation8 + $0x170] sm:$0xff]   ;;  %v882_v49 = vadd.s32 8, %v5650_v17 }
  0xb8   : > { %4313 = vmatprep.subr.bf16.mxu1 %v5063_v48  ;;  %4425 = vmatprep.subr.bf16.mxu0 %v5076_v51  ;;  %v883_v48 = vadd.s32 16, %v5650_v17  ;;  %v5664_v51 = vadd.s32 24, %v5650_v17 }
  0xbb   : > { %4314 = vmatpush3.bf16.msra.mxu1 %v5065_v58  ;;  %4426 = vmatpush3.bf16.msra.mxu0 %v5078_v62  ;;  %v5685_v58 = vadd.s32 96, %v5650_v17  ;;  %v935_v62 = vand.u32 15, %v883_v48 }
  0xbc   : > { %4315 = vmatprep.subr.bf16.mxu1 %v5067_v61  ;;  %4427 = vmatprep.subr.bf16.mxu0 %v5080_v16  ;;  %v5694_v61 = vrot.slane %v5335_v20, 1 }
  0xbd   : > { %4828 = vmatmul.mubr.bf16.gmra.mrb[8].mxu0 %v460_v63  ;;  %4844 = vmatmul.mubr.bf16.gmra.mrb[8].mxu1 %v468_v2  ;;  %v928_v63 = vand.u32 15, %v882_v49  ;;  %v949_v2 = vand.u32 15, %v885_v50  ;;  %vm5725_vm5 = vcmp.ne.s32.totalorder %v935_v62, 0 }
  0xbe   : > { %4831 = vmatprep.mubr.bf16.mxu0 %v461_v1  ;;  %4847 = vmatprep.mubr.bf16.mxu1 %v469_v4  ;;  %7561 = vst [vmem:[#allocation19_spill] sm:$0xff] %v5694_v61  ;;  %v5702_v1 = vld [vmem:[%s7458_s2] ss:$0 sm:$0xff]  ;;  %v963_v4 = vand.u32 15, %v5667_v52  ;;  %vm5833_vm10 = vmpackc.low %vm7503_vm1, %vm5725_vm5 }
  0xbf   : > { %4316 = vmatpush3.bf16.msra.mxu1 %v5069_v0  ;;  %4428 = vmatpush3.bf16.msra.mxu0 %v5082_v19  ;;  %v5697_v0 = vadd.s32 104, %v5650_v17  ;;  %vm5737_vm6 = vcmp.ne.s32.totalorder %v928_v63, 15  ;;  %vm5750_vm7 = vcmp.ne.s32.totalorder %v949_v2, 0 }
  0xc0   : > { %4317 = vmatprep.subr.bf16.mxu1 %v5071_v3  ;;  %4429 = vmatprep.subr.bf16.mxu0 %v5083_v24  ;;  %v942_v3 = vand.u32 15, %v5664_v51  ;;  %v5734_v24 = vadd.s32 144, %v5650_v17  ;;  %vm5817_vm9 = vcmp.ne.s32.totalorder %v963_v4, 0  ;;  %vm5846_vm11 = vmpackc.low %vm5737_vm6, %vm7503_vm1 }
  0xc1   : > { %vm5862_vm12 = vmpackc.low %vm7503_vm1, %vm5750_vm7 }
  0xc2   : > { %vm5803_vm8 = vcmp.ne.s32.totalorder %v942_v3, 15  ;;  %vm5964_vm0 = vmpackc.low %vm7503_vm1, %vm5817_vm9 }
  0xc3   : > { %4318 = vmatpush3.bf16.msra.mxu1 %v5073_v9  ;;  %4430 = vmatpush3.bf16.msra.mxu0 %v5084_v26  ;;  %vm5948_vm15 = vmpackc.low %vm5803_vm8, %vm7503_vm1 }
  0xc4   : > { %4319 = vmatprep.subr.bf16.mxu1 %v5075_v10  ;;  %4431 = vmatprep.subr.bf16.mxu0 %v5087_v27  ;;  %vm6058_vm6 = vmpackc.low %vm5908_vm13, %vm7503_vm1 }
  0xc5   : > { %4832 = vmatmul.mubr.bf16.gmra.mrb[12].mxu0 %v462_v11  ;;  %4848 = vmatmul.mubr.bf16.gmra.mrb[12].mxu1 %v470_v13  ;;  %vm6072_vm7 = vmpackc.low %vm7503_vm1, %vm5926_vm14 }
  0xc6   : > { %2301 = vmatprep.mubr.bf16.mxu1 %v7473_v25 }
  0xc7   : > { %4320 = vmatpush3.bf16.msra.mxu1 %v5077_v12  ;;  %4432 = vmatpush3.bf16.msra.mxu0 %v5088_v28  ;;  %v7580_v28 = vmov 0 }
  0xc8   : > { %4321 = vmatprep.subr.bf16.mxu1 %v5079_v15  ;;  %4433 = vmatprep.subr.bf16.mxu0 %v5089_v31  ;;  %v7581_v28 = vsel %vm5862_vm12, 4294967295, %v7580_v28  ;;  %v5101_v15 = vld [vmem:[#allocation8 + $0x1c8] sm:$0xff]  }
  0xc9   : > { %7582 = vst [vmem:[#allocation24_spill] sm:$0xff] %v7581_v28 }
  0xcb   : > { %4322 = vmatpush3.bf16.msra.mxu1 %v5081_v18  ;;  %4434 = vmatpush3.bf16.msra.mxu0 %v5090_v32  ;;  %v5744_v32 = vadd.s32 136, %v5650_v17 }
  0xcc   : > { %4531 = vmatprep.subr.bf16.mxu1 %v5085_v29  ;;  %4643 = vmatprep.subr.bf16.mxu0 %v5097_v39 }
  0xce   : > { %3847 = vmatmul.mubr.msk.bf16.vlgmr.msra.gmra.mrb[16].mxu1 %vm3845_vm2, %v3846_v23  ;;  %v5731_v23 = vadd.s32 120, %v5650_v17 }
  0xcf   : > { %4532 = vmatpush3.bf16.msra.mxu1 %v5086_v30 }
  0xd0   : > { %4533 = vmatprep.subr.bf16.mxu1 %v5091_v33  ;;  %v5746_v33 = vld [vmem:[#allocation8 + $0x200] sm:$0xff]  }
  0xd1   : > { %7566 = vst [vmem:[#allocation20_spill] sm:$0xff] %v5746_v33 }
  0xd3   : > { %4534 = vmatpush3.bf16.msra.mxu1 %v5092_v34 }
  0xd4   : > { %4535 = vmatprep.subr.bf16.mxu1 %v5093_v35 }
  0xd7   : > { %4536 = vmatpush3.bf16.msra.mxu1 %v5094_v36 }
  0xd8   : > { %4537 = vmatprep.subr.bf16.mxu1 %v5095_v37 }
  0xdb   : > { %4538 = vmatpush3.bf16.msra.mxu1 %v5096_v38 }
  0xdc   : > { %4539 = vmatprep.subr.bf16.mxu1 %v5099_v40  ;;  %v5756_v40 = vadd.s32 160, %v5650_v17 }
  0xde   : > { %7569 = vst [vmem:[#allocation21_spill] sm:$0xff] %v5756_v40 }
  0xdf   : > { %4540 = vmatpush3.bf16.msra.mxu1 %v5100_v41 }
  0xe0   : > { %4541 = vmatprep.subr.bf16.mxu1 %v5103_v42 }
  0xe3   : > { %4542 = vmatpush3.bf16.msra.mxu1 %v5104_v43 }
  0xe4   : > { %4543 = vmatprep.subr.bf16.mxu1 %v5107_v44 }
  0xe7   : > { %4544 = vmatpush3.bf16.msra.mxu1 %v5108_v45 }
  0xe8   : > { %4545 = vmatprep.subr.bf16.mxu1 %v5111_v46 }
  0xeb   : > { %4546 = vmatpush3.bf16.msra.mxu1 %v5112_v47 }
  0xec   : > { %4851 = vmatprep.subr.bf16.mxu1 %v5746_v33 }
 0x180   : > { %v4821_v11 = vpop.f32.mrb[0].mxu0  ;;  %v4837_v20 = vpop.f32.mrb[0].mxu1 }
 0x181   : > { %v705_v16 = vmul.f32 %v4821_v11, %v5702_v1  ;;  %v569_v18 = vpop.f32.mrb[1].mxu0  ;;  %v721_v29 = vmul.f32 %v4837_v20, %v5702_v1  ;;  %v633_v30 = vpop.f32.mrb[1].mxu1 }
 0x182   : > { %v703_v26 = vmul.f32 %v5702_v1, %v569_v18  ;;  %v4822_v27 = vpop.f32.mrb[2].mxu0  ;;  %v719_v38 = vmul.f32 %v5702_v1, %v633_v30  ;;  %v4838_v39 = vpop.f32.mrb[2].mxu1 }
 0x183   : > { %v744_v34 = vadd.f32 %v5712_v6, %v705_v16  ;;  %v706_v35 = vmul.f32 %v4822_v27, %v5702_v1  ;;  %v572_v36 = vpop.f32.mrb[3].mxu0  ;;  %v760_v43 = vadd.f32 %v5712_v6, %v721_v29  ;;  %v722_v44 = vmul.f32 %v4838_v39, %v5702_v1  ;;  %v5762_v45 = vpop.f32.mrb[3].mxu1 }
 0x184   : > { %v742_v41 = vadd.f32 %v5712_v6, %v703_v26  ;;  %v704_v42 = vmul.f32 %v5702_v1, %v572_v36  ;;  %v5782_v18 = vadd.f32 %v5712_v6, %v719_v38 }
 0x185   : > { %v5765_v46 = vmax.f32 %v744_v34, 0.0  ;;  %v745_v47 = vadd.f32 %v5712_v6, %v706_v35  ;;  %v5774_v63 = vadd.f32 %v5712_v6, %v722_v44  ;;  %v5779_v16 = vmax.f32 %v760_v43, 0.0 }
 0x186   : > { %v5770_v50 = vmax.f32 %v742_v41, 0.0  ;;  %v743_v62 = vadd.f32 %v5712_v6, %v704_v42 }
 0x187   : > { %v5777_v11 = vmax.f32 %v745_v47, 0.0  ;;  %v1389_v26 = vrot.slane %v5765_v46, 7  ;;  %v7474_v35 = vrot.slane %v5765_v46, 1 }
 0x188   : > { %v1387_v27 = vrot.slane %v5770_v50, 7  ;;  %v1532_v29 = vrot.slane %v5770_v50, 1  ;;  %v775_v30 = vmax.f32 %v743_v62, 0.0  ;;  %v4825_v34 = vpop.f32.mrb[4].mxu0  ;;  %v5795_v42 = vpop.f32.mrb[4].mxu1 }
 0x189   : > { %v1390_v36 = vrot.slane %v5777_v11, 7  ;;  %v709_v39 = vmul.f32 %v4825_v34, %v5702_v1  ;;  %v585_v41 = vpop.f32.mrb[5].mxu0  ;;  %v5793_v38 = vpack.c.bf16 %v5777_v11, %v5765_v46  ;;  %v5807_v20 = vpop.f32.mrb[5].mxu1  ;;  %v7596_v34 = vmov 0 }
 0x18a   : > { %v1600_v43 = vsel %vm7505_vm3, %v5694_v61, %v1532_v29  ;;  %v1388_v44 = vrot.slane %v775_v30, 7  ;;  %v1533_v47 = vrot.slane %v775_v30, 1  ;;  %v707_v62 = vmul.f32 %v5702_v1, %v585_v41  ;;  %v4826_v25 = vpop.f32.mrb[6].mxu0  ;;  %v5821_v3 = vpop.f32.mrb[6].mxu1 }
 0x18b   : > { %7570 = vst [vmem:[#allocation22_spill] sm:$0xff] %v5793_v38  ;;  %v3914_v2 = vpack.c.bf16 %v1600_v43, %v5694_v61  ;;  %v748_v49 = vadd.f32 %v5712_v6, %v709_v39  ;;  %v710_v48 = vmul.f32 %v4826_v25, %v5702_v1  ;;  %v588_v31 = vpop.f32.mrb[7].mxu0  ;;  %v5813_v22 = vpack.c.bf16 %v775_v30, %v5770_v50  ;;  %v5837_v4 = vpop.f32.mrb[7].mxu1 }
 0x18c   : > { %v746_v41 = vadd.f32 %v5712_v6, %v707_v62  ;;  %v708_v43 = vmul.f32 %v5702_v1, %v588_v31  ;;  %v1454_v39 = vsel %vm7499_vm4, %v1387_v27, %v1388_v44  ;;  %v1455_v25 = vsel %vm7499_vm4, %v5653_v21, %v1387_v27  ;;  %v5098_v62 = vld [vmem:[#allocation8 + $0x180] sm:$0xff]  }
 0x18d   : > { %7573 = vst [vmem:[#allocation23_spill] sm:$0xff] %v5813_v22  ;;  %v5839_v50 = vmax.f32 %v748_v49, 0.0  ;;  %v749_v31 = vadd.f32 %v5712_v6, %v710_v48  ;;  %2309 = vmatprep.mubr.bf16.mxu1 %v5813_v22  ;;  %v3850_v30 = vpack.c.bf16 %v1454_v39, %v1455_v25  ;;  %v1452_v19 = vsel %vm7499_vm4, %v1389_v26, %v1390_v36 }
 0x18e   : > { %v5854_v49 = vmax.f32 %v746_v41, 0.0  ;;  %v747_v48 = vadd.f32 %v5712_v6, %v708_v43  ;;  %v1453_v39 = vsel %vm7499_vm4, %v1388_v44, %v1389_v26  ;;  %v1598_v25 = vsel %vm7505_vm3, %v1533_v47, %v7474_v35 }
 0x18f   : > { %v1535_v41 = vrot.slane %v5777_v11, 1  ;;  %v1393_v43 = vrot.slane %v5839_v50, 7  ;;  %v5872_v14 = vmax.f32 %v749_v31, 0.0  ;;  %3851 = vmatmul.mubr.msk.bf16.gmra.mrb[20].mxu1 %vm5833_vm10, %v3850_v30  ;;  %3911 = vmatprep.mubr.msk.bf16.mxu0 %vm5833_vm10, %v3850_v30  ;;  %v5878_v37 = vpack.c.bf16 %v1452_v19, %v1453_v39 }
 0x190   : > { %v1391_v26 = vrot.slane %v5854_v49, 7  ;;  %v7475_v44 = vrot.slane %v5854_v49, 1  ;;  %v5882_v13 = vmax.f32 %v747_v48, 0.0  ;;  %v4829_v12 = vpop.f32.mrb[8].mxu0  ;;  %2317 = vmatprep.mubr.bf16.mxu1 %v5793_v38  ;;  %3915 = vmatmul.mubr.msk.bf16.vlgmr.msra.gmra.mrb[16].mxu0 %vm5846_vm11, %v3914_v2  ;;  %v1599_v31 = vsel %vm7505_vm3, %v1532_v29, %v1533_v47  ;;  %v5897_v10 = vpop.f32.mrb[8].mxu1  ;;  %v5102_v2 = vld [vmem:[#allocation8 + $0x188] sm:$0xff]  }
 0x191   : > { %7583 = vst [vmem:[#allocation25_spill] sm:$0xff] %v5878_v37  ;;  %v713_v19 = vmul.f32 %v4829_v12, %v5702_v1  ;;  %v601_v39 = vpop.f32.mrb[9].mxu0  ;;  %3919 = vmatprep.mubr.msk.bf16.mxu0 %vm5862_vm12, %v5878_v37  ;;  %v5895_v48 = vpack.c.bf16 %v1598_v25, %v1599_v31  ;;  %4644 = vmatpush3.bf16.msra.mxu0 %v5098_v62  ;;  %v5912_v62 = vpop.f32.mrb[9].mxu1  ;;  %v5105_v31 = vld [vmem:[#allocation8 + $0x1d0] sm:$0xff]   ;;  %v7597_v34 = vsel %vm5964_vm0, 4294967295, %v7596_v34  ;;  %v7602_v28 = vrot.slane %v5854_v49, 1 }
 0x192   : > { %v1392_v27 = vrot.slane %v5882_v13, 7  ;;  %v1537_v29 = vrot.slane %v5882_v13, 1  ;;  %v711_v47 = vmul.f32 %v5702_v1, %v601_v39  ;;  %v4830_v9 = vpop.f32.mrb[10].mxu0  ;;  %v5904_v12 = vpack.c.bf16 %v5882_v13, %v5854_v49  ;;  %4645 = vmatprep.subr.bf16.mxu0 %v5101_v15  ;;  %v5930_v15 = vpop.f32.mrb[10].mxu1  ;;  %v5106_v38 = vld [vmem:[#allocation8 + $0x190] sm:$0xff]   ;;  %7598 = vst [vmem:[#allocation31_spill] sm:$0xff] %v7597_v34 }
 0x193   : > { %7584 = vst [vmem:[#allocation26_spill] sm:$0xff] %v5895_v48  ;;  %v752_v52 = vadd.f32 %v5712_v6, %v713_v19  ;;  %v714_v30 = vmul.f32 %v4830_v9, %v5702_v1  ;;  %v604_v39 = vpop.f32.mrb[11].mxu0  ;;  %v1451_v13 = vsel %vm7499_vm4, %v1390_v36, %v1391_v26  ;;  %v5922_v53 = vpack.c.bf16 %v5872_v14, %v5839_v50  ;;  %v5940_v35 = vpop.f32.mrb[11].mxu1 }
 0x194   : > { %7585 = vst [vmem:[#allocation27_spill] sm:$0xff] %v5904_v12  ;;  %v750_v9 = vadd.f32 %v5712_v6, %v711_v47  ;;  %v712_v19 = vmul.f32 %v5702_v1, %v604_v39  ;;  %v1450_v11 = vsel %vm7499_vm4, %v1391_v26, %v1392_v27  ;;  %v1596_v36 = vsel %vm7505_vm3, %v1535_v41, %v7475_v44 }
 0x195   : > { %7588 = vst [vmem:[#allocation28_spill] sm:$0xff] %v5922_v53  ;;  %v5942_v54 = vmax.f32 %v752_v52, 0.0  ;;  %v753_v8 = vadd.f32 %v5712_v6, %v714_v30  ;;  %v7591_v47 = vmov 0  ;;  %v5952_v39 = vpack.c.bf16 %v1450_v11, %v1451_v13  ;;  %4646 = vmatpush3.bf16.msra.mxu0 %v5102_v2  ;;  %v5109_v2 = vld [vmem:[#allocation8 + $0x1d8] sm:$0xff]  }
 0x196   : > { %v7592_v47 = vsel %vm5948_vm15, 4294967295, %v7591_v47  ;;  %v7595_v26 = vrot.slane %v5765_v46, 1  ;;  %v5958_v52 = vmax.f32 %v750_v9, 0.0  ;;  %v751_v30 = vadd.f32 %v5712_v6, %v712_v19  ;;  %4647 = vmatprep.subr.bf16.mxu0 %v5105_v31 }
 0x197   : > { %7593 = vst [vmem:[#allocation29_spill] sm:$0xff] %v7592_v47  ;;  %7594 = vst [vmem:[#allocation30_spill] sm:$0xff] %v5952_v39  ;;  %v7600_v46 = vrot.slane %v5872_v14, 7  ;;  %3855 = vmatmul.mubr.msk.bf16.gmra.mrb[24].mxu1 %vm5862_vm12, %v5878_v37  ;;  %v1449_v51 = vsel %vm7499_vm4, %v1392_v27, %v1393_v43  ;;  %v5981_v19 = vmax.f32 %v5782_v18, 0.0  ;;  %v7603_v37 = vand.u32 15, %v5676_v55 }
 0x198   : > { %v1597_v44 = vsel %vm7505_vm3, %v7595_v26, %v1535_v41  ;;  %v1395_v31 = vrot.slane %v5958_v52, 7  ;;  %3923 = vmatmul.mubr.msk.bf16.gmra.mrb[20].mxu0 %vm5948_vm15, %v5895_v48  ;;  %2325 = vmatprep.mubr.bf16.mxu1 %v5904_v12  ;;  %v6005_v11 = vpop.f32.mrb[12].mxu1  ;;  %v7607_v55 = vand.u32 15, %v5679_v56  ;;  %v5114_v48 = vld [vmem:[#allocation8 + $0x1a0] sm:$0xff]   ;;  %v7616_v25 = vmov 0 }
 0x199   : > { %v5968_v13 = vpack.c.bf16 %v1596_v36, %v1597_v44  ;;  %v1448_v41 = vsel %vm7499_vm4, %v1393_v43, %v7600_v46  ;;  %v720_v44 = vmul.f32 %v5702_v1, %v5762_v45  ;;  %v5987_v36 = vmax.f32 %v751_v30, 0.0  ;;  %v4833_v43 = vpop.f32.mrb[12].mxu0  ;;  %3927 = vmatprep.mubr.msk.bf16.mxu0 %vm5964_vm0, %v5952_v39  ;;  %4648 = vmatpush3.bf16.msra.mxu0 %v5106_v38  ;;  %v6021_v38 = vpop.f32.mrb[13].mxu1 }
 0x19a   : > { %v5993_v27 = vpack.c.bf16 %v1448_v41, %v1449_v51  ;;  %v717_v45 = vmul.f32 %v4833_v43, %v5702_v1  ;;  %v617_v30 = vpop.f32.mrb[13].mxu0  ;;  %v7601_v46 = vrot.slane %v5839_v50, 1  ;;  %v5110_v41 = vld [vmem:[#allocation8 + $0x198] sm:$0xff]   ;;  %v6007_v51 = vmax.f32 %v753_v8, 0.0  ;;  %4649 = vmatprep.subr.bf16.mxu0 %v5109_v2  ;;  %v5113_v8 = vld [vmem:[#allocation8 + $0x1e0] sm:$0xff]  }
 0x19b   : > { %7599 = vst [vmem:[#allocation32_spill] sm:$0xff] %v5968_v13  ;;  %v715_v18 = vmul.f32 %v5702_v1, %v617_v30  ;;  %v4834_v12 = vpop.f32.mrb[14].mxu0  ;;  %v1595_v43 = vsel %vm7505_vm3, %v7602_v28, %v1537_v29  ;;  %vm6017_vm2 = vcmp.ne.s32.totalorder %v7603_v37, 15  ;;  %v6029_v49 = vpack.c.bf16 %v5987_v36, %v5958_v52  ;;  %v6037_v37 = vpop.f32.mrb[14].mxu1 }
 0x19c   : > { %v1594_v9 = vsel %vm7505_vm3, %v1537_v29, %v7601_v46  ;;  %v756_v26 = vadd.f32 %v5712_v6, %v717_v45  ;;  %v718_v30 = vmul.f32 %v4834_v12, %v5702_v1  ;;  %v620_v33 = vpop.f32.mrb[15].mxu0  ;;  %vm6033_vm5 = vcmp.ne.s32.totalorder %v7607_v55, 0  ;;  %vm6151_vm10 = vmpackc.low %vm6017_vm2, %vm7503_vm1 }
 0x19d   : > { %v6025_v22 = vpack.c.bf16 %v1594_v9, %v1595_v43  ;;  %7606 = vst [vmem:[#allocation33_spill] sm:$0xff] %v6029_v49  ;;  %v754_v29 = vadd.f32 %v5712_v6, %v715_v18  ;;  %v716_v2 = vmul.f32 %v5702_v1, %v620_v33  ;;  %v7610_v12 = vrot.slane %v5987_v36, 7  ;;  %v6049_v43 = vpop.f32.mrb[15].mxu1  ;;  %4650 = vmatpush3.bf16.msra.mxu0 %v5110_v41  ;;  %vm6170_vm11 = vmpackc.low %vm7503_vm1, %vm6033_vm5 }
 0x19e   : > { %v7611_v45 = vrot.slane %v5872_v14, 7  ;;  %v1540_v55 = vrot.slane %v5958_v52, 1  ;;  %v6052_v47 = vmax.f32 %v756_v26, 0.0  ;;  %v757_v18 = vadd.f32 %v5712_v6, %v718_v30  ;;  %4651 = vmatprep.subr.bf16.mxu0 %v5113_v8  ;;  %v5115_v30 = vld [vmem:[#allocation8 + $0x1e8] sm:$0xff]  }
 0x19f   : > { %v1446_v9 = vsel %vm7499_vm4, %v1395_v31, %v7610_v12  ;;  %v7612_v33 = vmov 0  ;;  %v6066_v52 = vmax.f32 %v754_v29, 0.0  ;;  %v755_v26 = vadd.f32 %v5712_v6, %v716_v2  ;;  %3859 = vmatmul.mubr.msk.bf16.gmra.mrb[28].mxu1 %vm5964_vm0, %v5952_v39 }
 0x1a0   : > { %v1447_v56 = vsel %vm7499_vm4, %v7611_v45, %v1395_v31  ;;  %v7613_v33 = vsel %vm6058_vm6, 4294967295, %v7612_v33  ;;  %v1398_v31 = vrot.slane %v6007_v51, 7  ;;  %v7617_v25 = vsel %vm6072_vm7, 4294967295, %v7616_v25  ;;  %2333 = vmatprep.mubr.bf16.mxu1 %v5922_v53  ;;  %3931 = vmatmul.mubr.msk.bf16.gmra.mrb[24].mxu0 %vm6058_vm6, %v5968_v13 }
 0x1a1   : > { %7614 = vst [vmem:[#allocation34_spill] sm:$0xff] %v7613_v33  ;;  %v6062_v12 = vpack.c.bf16 %v1446_v9, %v1447_v56  ;;  %v1541_v41 = vrot.slane %v5987_v36, 1  ;;  %v6077_v9 = vmax.f32 %v757_v18, 0.0  ;;  %v6085_v56 = vmax.f32 %v755_v26, 0.0  ;;  %3935 = vmatprep.mubr.msk.bf16.mxu0 %vm6072_vm7, %v5993_v27  ;;  %4652 = vmatpush3.bf16.msra.mxu0 %v5114_v48 }
 0x1a2   : > { %v759_v18 = vadd.f32 %v5712_v6, %v720_v44  ;;  %v1399_v29 = vrot.slane %v6066_v52, 7  ;;  %v6100_v26 = vmax.f32 %v5774_v63, 0.0  ;;  %v6107_v45 = vpack.c.bf16 %v6007_v51, %v5942_v54  ;;  %4653 = vmatprep.subr.bf16.mxu0 %v5115_v30  ;;  %v5118_v63 = vld [vmem:[#allocation8 + $0x1f0] sm:$0xff]  }
 0x1a3   : > { %7615 = vst [vmem:[#allocation35_spill] sm:$0xff] %v6062_v12  ;;  %v1400_v44 = vrot.slane %v6085_v56, 7  ;;  %v7619_v2 = vand.u32 15, %v5682_v57  ;;  %v7622_v48 = vrot.slane %v5872_v14, 1  ;;  %v7624_v39 = vrot.slane %v5839_v50, 1 }
 0x1a4   : > { %7618 = vst [vmem:[#allocation36_spill] sm:$0xff] %v6107_v45  ;;  %v7625_v57 = vrot.slane %v5942_v54, 7  ;;  %v7627_v13 = vrot.slane %v5987_v36, 7  ;;  %v1545_v50 = vrot.slane %v6085_v56, 1  ;;  %v7632_v36 = vmov 0 }
 0x1a5   : > { %vm6111_vm8 = vcmp.ne.s32.totalorder %v7619_v2, 15  ;;  %v1592_v53 = vsel %vm7505_vm3, %v7622_v48, %v1540_v55  ;;  %v7623_v8 = vmov %v7622_v48  ;;  %v7628_v48 = vand.u32 15, %v5685_v58  ;;  %4654 = vmatpush3.bf16.msra.mxu0 %v5116_v7  ;;  %v5119_v7 = vld [vmem:[#allocation8 + $0x1b0] sm:$0xff]  }
 0x1a6   : > { %v1593_v33 = vsel %vm7505_vm3, %v7624_v39, %v7623_v8  ;;  %v1444_v2 = vsel %vm7499_vm4, %v7625_v57, %v1398_v31  ;;  %v7626_v30 = vmov %v7625_v57  ;;  %v6142_v39 = vmax.f32 %v759_v18, 0.0  ;;  %4655 = vmatprep.subr.bf16.mxu0 %v5118_v63  ;;  %vm6264_vm2 = vmpackc.low %vm6111_vm8, %vm7503_vm1 }
 0x1a7   : > { %v1445_v40 = vsel %vm7499_vm4, %v7627_v13, %v7626_v30  ;;  %vm6137_vm9 = vcmp.ne.s32.totalorder %v7628_v48, 0  ;;  %v6144_v8 = vpack.c.bf16 %v1592_v53, %v1593_v33  ;;  %v7633_v36 = vsel %vm6151_vm10, 4294967295, %v7632_v36  ;;  %3863 = vmatmul.mubr.msk.bf16.gmra.mrb[32].mxu1 %vm6072_vm7, %v5993_v27 }
 0x1a8   : > { %v6146_v57 = vpack.c.bf16 %v1444_v2, %v1445_v40  ;;  %7634 = vst [vmem:[#allocation38_spill] sm:$0xff] %v7633_v36  ;;  %v7635_v58 = vrot.slane %v5942_v54, 1  ;;  %v1591_v18 = vsel %vm7505_vm3, %v1540_v55, %v1541_v41  ;;  %v6163_v53 = vpack.c.bf16 %v6085_v56, %v6066_v52  ;;  %3939 = vmatmul.mubr.msk.bf16.gmra.mrb[28].mxu0 %vm6151_vm10, %v6025_v22  ;;  %vm6275_vm5 = vmpackc.low %vm7503_vm1, %vm6137_vm9  ;;  %v7792_v36 = vld [vmem:[#allocation33_spill] sm:$0xff] }
 0x1a9   : > { %v1442_v40 = vsel %vm7499_vm4, %v1399_v29, %v1400_v44  ;;  %v7637_v46 = vmov 0  ;;  %v1443_v55 = vsel %vm7499_vm4, %v1398_v31, %v1399_v29  ;;  %v723_v56 = vmul.f32 %v5702_v1, %v5807_v20  ;;  %v5120_v29 = vld [vmem:[#allocation8 + $0x1f8] sm:$0xff]   ;;  %2341 = vmatprep.mubr.bf16.mxu1 %v6029_v49  ;;  %3943 = vmatprep.mubr.msk.bf16.mxu0 %vm6170_vm11, %v6062_v12 }
 0x1aa   : > { %7631 = vst [vmem:[#allocation37_spill] sm:$0xff] %v6146_v57  ;;  %v1590_v13 = vsel %vm7505_vm3, %v1541_v41, %v7635_v58  ;;  %7636 = vst [vmem:[#allocation39_spill] sm:$0xff] %v6163_v53  ;;  %v7638_v46 = vsel %vm6170_vm11, 4294967295, %v7637_v46  ;;  %v725_v41 = vmul.f32 %v5795_v42, %v5702_v1  ;;  %v6185_v28 = vpack.c.bf16 %v1442_v40, %v1443_v55  ;;  %v5121_v49 = vld [vmem:[#allocation8 + $0x1b8] sm:$0xff]  }
 0x1ab   : > { %7639 = vst [vmem:[#allocation40_spill] sm:$0xff] %v7638_v46  ;;  %v6174_v33 = vpack.c.bf16 %v1590_v13, %v1591_v18  ;;  %v726_v2 = vmul.f32 %v5821_v3, %v5702_v1  ;;  %v724_v31 = vmul.f32 %v5702_v1, %v5837_v4  ;;  %v6193_v42 = vpack.c.bf16 %v6077_v9, %v6052_v47 }
 0x1ac   : > { %7640 = vst [vmem:[#allocation41_spill] sm:$0xff] %v6185_v28  ;;  %v1404_v20 = vrot.slane %v6142_v39, 7  ;;  %v764_v63 = vadd.f32 %v5712_v6, %v725_v41  ;;  %v762_v3 = vadd.f32 %v5712_v6, %v723_v56  ;;  %v7642_v30 = vrot.slane %v6066_v52, 1  ;;  %4656 = vmatpush3.bf16.msra.mxu0 %v5119_v7 }
 0x1ad   : > { %7641 = vst [vmem:[#allocation42_spill] sm:$0xff] %v6193_v42  ;;  %v7643_v4 = vrot.slane %v6007_v51, 1  ;;  %v765_v58 = vadd.f32 %v5712_v6, %v726_v2  ;;  %v763_v13 = vadd.f32 %v5712_v6, %v724_v31  ;;  %v7645_v40 = vrot.slane %v5942_v54, 1  ;;  %4657 = vmatprep.subr.bf16.mxu0 %v5120_v29 }
 0x1ae   : > { %v7646_v41 = vrot.slane %v6077_v9, 7  ;;  %v7647_v56 = vrot.slane %v6052_v47, 7  ;;  %v6231_v31 = vmax.f32 %v764_v63, 0.0  ;;  %v6233_v51 = vmax.f32 %v762_v3, 0.0 }
 0x1af   : > { %v1588_v48 = vsel %vm7505_vm3, %v7643_v4, %v7642_v30  ;;  %v7644_v18 = vmov %v7643_v4  ;;  %v7648_v4 = vand.u32 15, %v5688_v59  ;;  %v7652_v59 = vand.u32 15, %v5691_v60  ;;  %3867 = vmatmul.mubr.msk.bf16.gmra.mrb[36].mxu1 %vm6170_vm11, %v6062_v12 }
 0x1b0   : > { %v1589_v55 = vsel %vm7505_vm3, %v7645_v40, %v7644_v18  ;;  %v1440_v30 = vsel %vm7499_vm4, %v7647_v56, %v7646_v41  ;;  %v7651_v18 = vmov %v7647_v56  ;;  %v6248_v63 = vmax.f32 %v765_v58, 0.0  ;;  %4658 = vmatpush3.bf16.msra.mxu0 %v5121_v49  ;;  %2349 = vmatprep.mubr.bf16.mxu1 %v6107_v45 }
 0x1b1   : > { %vm6227_vm13 = vcmp.ne.s32.totalorder %v7648_v4, 15  ;;  %v6235_v54 = vpack.c.bf16 %v1588_v48, %v1589_v55  ;;  %v1441_v40 = vsel %vm7499_vm4, %v1400_v44, %v7651_v18  ;;  %vm6244_vm14 = vcmp.ne.s32.totalorder %v7652_v59, 0  ;;  %3947 = vmatmul.mubr.msk.bf16.gmra.mrb[32].mxu0 %vm6264_vm2, %v6144_v8 }
 0x1b2   : > { %v6250_v3 = vpack.c.bf16 %v1440_v30, %v1441_v40  ;;  %v7655_v48 = vrot.slane %v6052_v47, 1  ;;  %v1549_v7 = vrot.slane %v6142_v39, 1  ;;  %v6259_v4 = vmax.f32 %v763_v13, 0.0  ;;  %3951 = vmatprep.mubr.msk.bf16.mxu0 %vm6275_vm5, %v6146_v57  ;;  %vm6396_vm11 = vmpackc.low %vm7503_vm1, %vm6244_vm14 }
 0x1b3   : > { %v1407_v18 = vrot.slane %v6233_v51, 7  ;;  %v7658_v13 = vmov 0  ;;  %v7661_v34 = vrot.slane %v6066_v52, 1  ;;  %v7662_v30 = vrot.slane %v5981_v19, 7 }
 0x1b4   : > { %v1586_v55 = vsel %vm7505_vm3, %v1545_v50, %v7655_v48  ;;  %v7659_v13 = vsel %vm6275_vm5, 4294967295, %v7658_v13  ;;  %v6285_v48 = vpack.c.bf16 %v6142_v39, %v5981_v19  ;;  %v7664_v40 = vmov %v7646_v41 }
 0x1b5   : > { %7660 = vst [vmem:[#allocation43_spill] sm:$0xff] %v7659_v13  ;;  %v1587_v59 = vsel %vm7505_vm3, %v7661_v34, %v1545_v50  ;;  %v1438_v60 = vsel %vm7499_vm4, %v7662_v30, %v1404_v20  ;;  %v7663_v14 = vmov %v7662_v30  ;;  %v729_v39 = vmul.f32 %v5897_v10, %v5702_v1 }
 0x1b6   : > { %v1439_v44 = vsel %vm7499_vm4, %v7664_v40, %v7663_v14  ;;  %v6300_v52 = vpack.c.bf16 %v1586_v55, %v1587_v59  ;;  %v727_v30 = vmul.f32 %v5702_v1, %v5912_v62  ;;  %v1408_v49 = vrot.slane %v6259_v4, 7 }
 0x1b7   : > { %v6302_v50 = vpack.c.bf16 %v1438_v60, %v1439_v44  ;;  %v730_v55 = vmul.f32 %v5930_v15, %v5702_v1  ;;  %v728_v44 = vmul.f32 %v5702_v1, %v5940_v35  ;;  %v6319_v10 = vpack.c.bf16 %v6100_v26, %v5779_v16  ;;  %3871 = vmatmul.mubr.msk.bf16.gmra.mrb[40].mxu1 %vm6275_vm5, %v6146_v57 }
 0x1b8   : > { %v768_v62 = vadd.f32 %v5712_v6, %v729_v39  ;;  %v766_v60 = vadd.f32 %v5712_v6, %v727_v30  ;;  %v7665_v40 = vrot.slane %v5981_v19, 1  ;;  %v7666_v34 = vrot.slane %v6077_v9, 1  ;;  %2357 = vmatprep.mubr.bf16.mxu1 %v6163_v53 }
 0x1b9   : > { %v7668_v59 = vrot.slane %v6052_v47, 1  ;;  %v7669_v29 = vand.u32 15, %v5697_v0  ;;  %v769_v30 = vadd.f32 %v5712_v6, %v730_v55  ;;  %v767_v41 = vadd.f32 %v5712_v6, %v728_v44 }
 0x1ba   : > { %v1584_v15 = vsel %vm7505_vm3, %v7666_v34, %v7665_v40  ;;  %v7667_v35 = vmov %v7666_v34  ;;  %v7672_v40 = vrot.slane %v6100_v26, 7  ;;  %v7673_v9 = vrot.slane %v5779_v16, 7 }
 0x1bb   : > { %v1585_v14 = vsel %vm7505_vm3, %v7668_v59, %v7667_v35  ;;  %vm6340_vm8 = vcmp.ne.s32.totalorder %v7669_v29, 15  ;;  %v7674_v34 = vand.u32 15, %v5707_v5  ;;  %v6360_v29 = vmax.f32 %v768_v62, 0.0 }
 0x1bc   : > { %v6346_v45 = vpack.c.bf16 %v1584_v15, %v1585_v14  ;;  %v1436_v47 = vsel %vm7499_vm4, %v7673_v9, %v7672_v40  ;;  %v6362_v55 = vmax.f32 %v766_v60, 0.0  ;;  %v7677_v44 = vmov %v7673_v9 }
 0x1bd   : > { %vm6356_vm9 = vcmp.ne.s32.totalorder %v7674_v34, 0  ;;  %v1437_v15 = vsel %vm7499_vm4, %v1404_v20, %v7677_v44  ;;  %v7678_v35 = vrot.slane %v5779_v16, 1  ;;  %v6372_v14 = vmax.f32 %v769_v30, 0.0  ;;  %vm6385_vm4 = vmpackc.low %vm6227_vm13, %vm7503_vm1 }
 0x1be   : > { %v6374_v5 = vmax.f32 %v767_v41, 0.0  ;;  %v6376_v40 = vpack.c.bf16 %v1436_v47, %v1437_v15  ;;  %v7679_v62 = vrot.slane %v5981_v19, 1  ;;  %v1553_v30 = vrot.slane %v6259_v4, 1  ;;  %3955 = vmatmul.mubr.msk.bf16.gmra.mrb[36].mxu0 %vm6385_vm4, %v6174_v33 }
 0x1bf   : > { %v1582_v59 = vsel %vm7505_vm3, %v1549_v7, %v7678_v35  ;;  %v7682_v19 = vmov 0  ;;  %v1411_v2 = vrot.slane %v6362_v55, 7  ;;  %v6411_v56 = vpack.c.bf16 %v6259_v4, %v6233_v51  ;;  %3959 = vmatprep.mubr.msk.bf16.mxu0 %vm6396_vm11, %v6185_v28  ;;  %3875 = vmatmul.mubr.msk.bf16.gmra.mrb[44].mxu1 %vm6396_vm11, %v6185_v28 }
 0x1c0   : > { %v1583_v60 = vsel %vm7505_vm3, %v7679_v62, %v1549_v7  ;;  %v7683_v19 = vsel %vm6396_vm11, 4294967295, %v7682_v19  ;;  %vm7685_vm13 = vcmp.lt.s32.totalorder %v5650_v17, 1  ;;  %v7686_v62 = vrot.slane %v6100_v26, 7  ;;  %2365 = vmatprep.mubr.bf16.mxu1 %v6193_v42 }
 0x1c1   : > { %7684 = vst [vmem:[#allocation44_spill] sm:$0xff] %v7683_v19  ;;  %v6407_v15 = vpack.c.bf16 %v1582_v59, %v1583_v60  ;;  %v1434_v35 = vsel %vm7685_vm13, %v1407_v18, %v1408_v49  ;;  %vm7687_vm14 = vmmov %vm7685_vm13  ;;  %v1412_v59 = vrot.slane %v6374_v5, 7  ;;  %v733_v4 = vmul.f32 %v6005_v11, %v5702_v1 }
 0x1c2   : > { %v1435_v47 = vsel %vm7687_vm14, %v7686_v62, %v1407_v18  ;;  %v731_v44 = vmul.f32 %v5702_v1, %v6021_v38  ;;  %v734_v18 = vmul.f32 %v6037_v37, %v5702_v1  ;;  %v732_v62 = vmul.f32 %v5702_v1, %v6049_v43 }
 0x1c3   : > { %v6424_v60 = vpack.c.bf16 %v1434_v35, %v1435_v47  ;;  %v6439_v47 = vpack.c.bf16 %v6248_v63, %v6231_v31  ;;  %v7688_v35 = vrot.slane %v6233_v51, 1  ;;  %v7689_v11 = vrot.slane %v6100_v26, 1 }
 0x1c4   : > { %v7690_v41 = vand.u32 15, %v5731_v23  ;;  %v772_v37 = vadd.f32 %v5712_v6, %v733_v4  ;;  %v770_v1 = vadd.f32 %v5712_v6, %v731_v44  ;;  %v7694_v9 = vrot.slane %v5779_v16, 1 }
 0x1c5   : > { %v1580_v38 = vsel %vm7505_vm3, %v7689_v11, %v7688_v35  ;;  %v7693_v43 = vmov %v7689_v11  ;;  %v7695_v53 = vrot.slane %v6248_v63, 7  ;;  %v7696_v35 = vrot.slane %v6231_v31, 7 }
 0x1c6   : > { %vm6449_vm13 = vcmp.ne.s32.totalorder %v7690_v41, 15  ;;  %v1581_v7 = vsel %vm7505_vm3, %v7694_v9, %v7693_v43  ;;  %v7697_v41 = vand.u32 15, %v5734_v24  ;;  %v773_v26 = vadd.f32 %v5712_v6, %v734_v18  ;;  %vm7701_vm3 = vmmov %vm7687_vm14 }
 0x1c7   : > { %v1432_v23 = vsel %vm7687_vm14, %v7696_v35, %v7695_v53  ;;  %v771_v16 = vadd.f32 %v5712_v6, %v732_v62  ;;  %v6475_v44 = vpack.c.bf16 %v1580_v38, %v1581_v7  ;;  %v7700_v9 = vmov %v7696_v35 }
 0x1c8   : > { %vm6469_vm1 = vcmp.ne.s32.totalorder %v7697_v41, 0  ;;  %v1433_v11 = vsel %vm7701_vm3, %v1408_v49, %v7700_v9  ;;  %v804_v43 = vmax.f32 %v772_v37, 0.0  ;;  %v802_v13 = vmax.f32 %v770_v1, 0.0 }
 0x1c9   : > { %v6481_v53 = vpack.c.bf16 %v1432_v23, %v1433_v11  ;;  %v7702_v24 = vrot.slane %v6231_v31, 1  ;;  %vm7703_vm14 = vcmp.lt.s32.totalorder %v5650_v17, 7  ;;  %vm7704_vm5 = vmmov 1  }
 0x1ca   : > { %vm6490_vm7 = vmpackc.low %vm6340_vm8, %vm7704_vm5  ;;  %v7705_v6 = vmov 0  ;;  %v805_v7 = vmax.f32 %v773_v26, 0.0  ;;  %v803_v18 = vmax.f32 %v771_v16, 0.0  ;;  %v7707_v49 = vrot.slane %v6233_v51, 1 }
 0x1cb   : > { %v1578_v35 = vsel %vm7703_vm14, %v1553_v30, %v7702_v24  ;;  %v7706_v6 = vsel %vm6490_vm7, 4294967295, %v7705_v6  ;;  %vm7708_vm3 = vmmov %vm7703_vm14  ;;  %v6500_v38 = vpack.c.bf16 %v6374_v5, %v6362_v55  ;;  %v7709_v39 = vmov 0  ;;  %3963 = vmatmul.mubr.msk.bf16.gmra.mrb[40].mxu0 %vm6490_vm7, %v6235_v54 }
 0x1cc   : > { %v1579_v62 = vsel %vm7708_vm3, %v7707_v49, %v1553_v30  ;;  %vm6505_vm14 = vmpackc.low %vm7704_vm5, %vm6356_vm9  ;;  %v1557_v37 = vrot.slane %v6374_v5, 1  ;;  %v1417_v1 = vrot.slane %v804_v43, 7  ;;  %v1562_v23 = vrot.slane %v804_v43, 1 }
 0x1cd   : > { %v7710_v39 = vsel %vm6505_vm14, 4294967295, %v7709_v39  ;;  %v1415_v41 = vrot.slane %v802_v13, 7  ;;  %v1560_v51 = vrot.slane %v802_v13, 1  ;;  %v1418_v30 = vrot.slane %v805_v7, 7  ;;  %3967 = vmatprep.mubr.msk.bf16.mxu0 %vm6505_vm14, %v6250_v3  ;;  %3879 = vmatmul.mubr.msk.bf16.gmra.mrb[48].mxu1 %vm6505_vm14, %v6250_v3 }
 0x1ce   : > { %v1563_v26 = vrot.slane %v805_v7, 1  ;;  %v1416_v16 = vrot.slane %v803_v18, 7  ;;  %v1561_v0 = vrot.slane %v803_v18, 1  ;;  %v6517_v9 = vpack.c.bf16 %v1578_v35, %v1579_v62  ;;  %2373 = vmatprep.mubr.bf16.mxu1 %v6285_v48 }
 0x1cf   : > { %vm7711_vm8 = vcmp.lt.s32.totalorder %v5650_v17, 1  ;;  %v7712_v11 = vrot.slane %v6248_v63, 7  ;;  %v6532_v42 = vpack.c.bf16 %v6372_v14, %v6360_v29  ;;  %v7714_v35 = vrot.slane %v6362_v55, 1 }
 0x1d0   : > { %v1430_v5 = vsel %vm7711_vm8, %v1411_v2, %v1412_v59  ;;  %vm7713_vm9 = vmmov %vm7711_vm8  ;;  %v7715_v62 = vrot.slane %v6248_v63, 1  ;;  %v7720_v57 = vrot.slane %v6360_v29, 7  ;;  %v7723_v63 = vrot.slane %v6360_v29, 1 }
 0x1d1   : > { %v1431_v24 = vsel %vm7713_vm9, %v7712_v11, %v1411_v2  ;;  %v7717_v2 = vrot.slane %v6231_v31, 1  ;;  %vm7718_vm8 = vmmov %vm7708_vm3 }
 0x1d2   : > { %v6528_v49 = vpack.c.bf16 %v1430_v5, %v1431_v24  ;;  %v1576_v19 = vsel %vm7708_vm3, %v7715_v62, %v7714_v35  ;;  %v7716_v28 = vmov %v7715_v62  ;;  %v7719_v24 = vrot.slane %v6372_v14, 7  ;;  %vm7722_vm3 = vmmov %vm7713_vm9 }
 0x1d3   : > { %v1577_v11 = vsel %vm7718_vm8, %v7717_v2, %v7716_v28  ;;  %v7721_v12 = vmov %v7720_v57  ;;  %vm7724_vm11 = vmmov %vm7718_vm8  ;;  %v6568_v2 = vpack.c.bf16 %v803_v18, %v802_v13  ;;  %v7731_v13 = vmov %v7723_v63 }
 0x1d4   : > { %v6546_v5 = vpack.c.bf16 %v1576_v19, %v1577_v11  ;;  %v1428_v46 = vsel %vm7713_vm9, %v7720_v57, %v7719_v24  ;;  %v1429_v35 = vsel %vm7722_vm3, %v1412_v59, %v7721_v12  ;;  %v1574_v31 = vsel %vm7724_vm11, %v1557_v37, %v7723_v63  ;;  %vm7726_vm9 = vmmov %vm7722_vm3 }
 0x1d5   : > { %v6562_v28 = vpack.c.bf16 %v1428_v46, %v1429_v35  ;;  %v7725_v19 = vrot.slane %v6362_v55, 1  ;;  %v1426_v57 = vsel %vm7726_vm9, %v1415_v41, %v1416_v16  ;;  %v7727_v12 = vmov %v7719_v24  ;;  %vm7729_vm11 = vmmov %vm7718_vm8 }
 0x1d6   : > { %v1427_v59 = vsel %vm7722_vm3, %v7727_v12, %v1415_v41  ;;  %v7728_v46 = vrot.slane %v6372_v14, 1  ;;  %vm6591_vm9 = vmpackc.low %vm6449_vm13, %vm7704_vm5  ;;  %v1424_v63 = vsel %vm7722_vm3, %v1417_v1, %v1418_v30  ;;  %v7735_v14 = vmov 0 }
 0x1d7   : > { %v1575_v62 = vsel %vm7718_vm8, %v7725_v19, %v1557_v37  ;;  %v6595_v41 = vpack.c.bf16 %v1426_v57, %v1427_v59  ;;  %vm7738_vm13 = vcmp.lt.s32.totalorder %v5650_v17, 7  ;;  %3971 = vmatmul.mubr.msk.bf16.gmra.mrb[44].mxu0 %vm6591_vm9, %v6300_v52  ;;  %v7749_v12 = vmov 0 }
 0x1d8   : > { %v6572_v11 = vpack.c.bf16 %v1574_v31, %v1575_v62  ;;  %v1572_v55 = vsel %vm7729_vm11, %v7728_v46, %v1560_v51  ;;  %v7730_v24 = vmov %v7728_v46  ;;  %vm7734_vm11 = vmmov %vm7722_vm3  ;;  %v1570_v31 = vsel %vm7738_vm13, %v1561_v0, %v1562_v23 }
 0x1d9   : > { %v1573_v18 = vsel %vm7718_vm8, %v7731_v13, %v7730_v24  ;;  %v1425_v29 = vsel %vm7734_vm11, %v1416_v16, %v1417_v1  ;;  %vm6606_vm8 = vmpackc.low %vm7704_vm5, %vm6469_vm1  ;;  %v6626_v16 = vpack.c.bf16 %v805_v7, %v804_v43  ;;  %v6631_v57 = vsel %vm7734_vm11, %v1418_v30, %v5653_v21  ;;  %v7780_v21 = vld [vmem:[#allocation23_spill] sm:$0xff] }
 0x1da   : > { %v6597_v35 = vpack.c.bf16 %v1572_v55, %v1573_v18  ;;  %v7736_v14 = vsel %vm6606_vm8, 4294967295, %v7735_v14  ;;  %v6610_v34 = vpack.c.bf16 %v1424_v63, %v1425_v29  ;;  %vm7739_vm7 = vmmov %vm7738_vm13  ;;  %7743 = vst [vmem:[#allocation47_spill] sm:$0xff] %v6631_v57  ;;  %3975 = vmatprep.mubr.msk.bf16.mxu0 %vm6606_vm8, %v6302_v50  ;;  %v7744_v43 = vand.u32 15, %v5744_v32  ;;  %3883 = vmatmul.mubr.msk.bf16.gmra.mrb[52].mxu1 %vm6606_vm8, %v6302_v50  ;;  %v4323_v29 = vpop.f32.mrb[16].mxu1  ;;  %v7781_v57 = vld [vmem:[#allocation20_spill] sm:$0xff] }
 0x1db   : > { %v1571_v19 = vsel %vm7739_vm7, %v1560_v51, %v1561_v0  ;;  %vm7740_vm3 = vmmov %vm7739_vm7  ;;  %7742 = vst [vmem:[#allocation46_spill] sm:$0xff] %v6626_v16  ;;  %v900_v7 = vadd.s32 152, %v5650_v17  ;;  %v7747_v0 = vmov 0  ;;  %2381 = vmatprep.mubr.bf16.mxu1 %v6319_v10  ;;  %v902_v46 = vadd.s32 168, %v5650_v17  ;;  %v7787_v16 = vld [vmem:[#allocation27_spill] sm:$0xff] }
 0x1dc   : > { %7737 = vst [vmem:[#allocation45_spill] sm:$0xff] %v6610_v34  ;;  %v1568_v62 = vsel %vm7740_vm3, %v1563_v26, %v5694_v61  ;;  %v6622_v4 = vpack.c.bf16 %v1570_v31, %v1571_v19  ;;  %vm7741_vm1 = vmmov %vm7740_vm3  ;;  %vm4273_vm7 = vcmp.ne.s32.totalorder %v7744_v43, 15  ;;  %v905_v55 = vadd.s32 192, %v5650_v17  ;;  %v4324_v31 = vpop.f32.mrb[17].mxu1  ;;  %v5122_v61 = vld [vmem:[#allocation8 + $0x208] sm:$0xff]  }
 0x1dd   : > { %v1569_v1 = vsel %vm7741_vm1, %v1562_v23, %v1563_v26  ;;  %v7745_v23 = vld [vmem:[#allocation21_spill] sm:$0xff]  ;;  %v903_v26 = vadd.s32 176, %v5650_v17  ;;  %vm6649_vm3 = vmpackc.low %vm4273_vm7, %vm7704_vm5  ;;  %v1054_v59 = vand.u32 15, %v900_v7  ;;  %v7751_v24 = vmov 0 }
 0x1de   : > { %v6637_v51 = vpack.c.bf16 %v1568_v62, %v1569_v1  ;;  %v7746_v30 = vand.u32 15, %v7745_v23  ;;  %v7748_v0 = vsel %vm6649_vm3, 4294967295, %v7747_v0  ;;  %v7753_v13 = vmov 0  ;;  %v4326_v62 = vpop.f32.mrb[18].mxu1 }
 0x1df   : > { %v1075_v32 = vand.u32 15, %v903_v26  ;;  %3979 = vmatmul.mubr.msk.bf16.gmra.mrb[48].mxu0 %vm6649_vm3, %v6346_v45  ;;  %vm4274_vm11 = vcmp.ne.s32.totalorder %v1054_v59, 15  ;;  %v1068_v18 = vand.u32 15, %v902_v46  ;;  %v1089_v63 = vand.u32 15, %v905_v55  ;;  %v4327_v43 = vpop.f32.mrb[19].mxu1 }
 0x1e0   : > { %vm4260_vm13 = vcmp.ne.s32.totalorder %v7746_v30, 0  ;;  %v6690_v19 = vadd.f32 %v4324_v31, %v4323_v29  ;;  %v904_v1 = vadd.s32 184, %v5650_v17  ;;  %v907_v7 = vadd.s32 208, %v5650_v17 }
 0x1e1   : > { %vm6654_vm1 = vmpackc.low %vm7704_vm5, %vm4260_vm13  ;;  %vm4261_vm7 = vcmp.ne.s32.totalorder %v1075_v32, 0  ;;  %v6694_v23 = vadd.f32 %v4327_v43, %v4326_v62  ;;  %v7755_v30 = vmov 0  ;;  %v7757_v26 = vmov 0 }
 0x1e2   : > { %v7750_v12 = vsel %vm6654_vm1, 4294967295, %v7749_v12  ;;  %3983 = vmatprep.mubr.msk.bf16.mxu0 %vm6654_vm1, %v6376_v40  ;;  %vm6671_vm13 = vmpackc.low %vm4274_vm11, %vm7704_vm5  ;;  %3887 = vmatmul.mubr.msk.bf16.gmra.mrb[56].mxu1 %vm6654_vm1, %v6376_v40  ;;  %vm4275_vm11 = vcmp.ne.s32.totalorder %v1068_v18, 15  ;;  %v1082_v59 = vand.u32 15, %v904_v1  ;;  %v1103_v32 = vand.u32 15, %v907_v7 }
 0x1e3   : > { %v7752_v24 = vsel %vm6671_vm13, 4294967295, %v7751_v24  ;;  %vm6676_vm8 = vmpackc.low %vm7704_vm5, %vm4261_vm7  ;;  %2389 = vmatprep.mubr.bf16.mxu1 %v6411_v56  ;;  %vm4262_vm7 = vcmp.ne.s32.totalorder %v1089_v63, 0  ;;  %v906_v46 = vadd.s32 200, %v5650_v17  ;;  %v909_v55 = vadd.s32 224, %v5650_v17 }
 0x1e4   : > { %v7754_v13 = vsel %vm6676_vm8, 4294967295, %v7753_v13  ;;  %vm6697_vm1 = vmpackc.low %vm4275_vm11, %vm7704_vm5  ;;  %vm4276_vm11 = vcmp.ne.s32.totalorder %v1082_v59, 15  ;;  %v7759_v18 = vmov 0  ;;  %v7761_v63 = vmov 0 }
 0x1e5   : > { %v7756_v30 = vsel %vm6697_vm1, 4294967295, %v7755_v30  ;;  %vm6702_vm14 = vmpackc.low %vm7704_vm5, %vm4262_vm7  ;;  %vm4263_vm7 = vcmp.ne.s32.totalorder %v1103_v32, 0  ;;  %v1096_v29 = vand.u32 15, %v906_v46  ;;  %v1117_v31 = vand.u32 15, %v909_v55 }
 0x1e6   : > { %v7758_v26 = vsel %vm6702_vm14, 4294967295, %v7757_v26  ;;  %v908_v62 = vadd.s32 216, %v5650_v17  ;;  %v911_v1 = vadd.s32 240, %v5650_v17  ;;  %v7763_v43 = vmov 0 }
 0x1e7   : > { %3987 = vmatmul.mubr.msk.bf16.gmra.mrb[52].mxu0 %vm6671_vm13, %v6407_v15  ;;  %vm6719_vm13 = vmpackc.low %vm4276_vm11, %vm7704_vm5  ;;  %vm4277_vm11 = vcmp.ne.s32.totalorder %v1096_v29, 15  ;;  %v7765_v7 = vmov 0  ;;  %v910_v46 = vadd.s32 232, %v5650_v17  ;;  %v913_v55 = vadd.s32 256, %v5650_v17 }
 0x1e8   : > { %3991 = vmatprep.mubr.msk.bf16.mxu0 %vm6676_vm8, %v6424_v60  ;;  %v7760_v18 = vsel %vm6719_vm13, 4294967295, %v7759_v18  ;;  %v1110_v59 = vand.u32 15, %v908_v62  ;;  %v1131_v32 = vand.u32 15, %v911_v1 }
 0x1e9   : > { %v1124_v62 = vand.u32 15, %v910_v46  ;;  %v1145_v1 = vand.u32 15, %v913_v55  ;;  %v7773_v46 = vmov 0 }
 0x1ea   : > { %3891 = vmatmul.mubr.msk.bf16.gmra.mrb[60].mxu1 %vm6676_vm8, %v6424_v60  ;;  %vm6724_vm8 = vmpackc.low %vm7704_vm5, %vm4263_vm7  ;;  %vm4264_vm7 = vcmp.ne.s32.totalorder %v1117_v31, 0 }
 0x1eb   : > { %2397 = vmatprep.mubr.bf16.mxu1 %v6439_v47  ;;  %v7762_v63 = vsel %vm6724_vm8, 4294967295, %v7761_v63 }
 0x1ef   : > { %3995 = vmatmul.mubr.msk.bf16.gmra.mrb[56].mxu0 %vm6697_vm1, %v6475_v44  ;;  %vm6741_vm1 = vmpackc.low %vm4277_vm11, %vm7704_vm5  ;;  %vm4278_vm11 = vcmp.ne.s32.totalorder %v1110_v59, 15  ;;  %v912_v59 = vadd.s32 248, %v5650_v17 }
 0x1f0   : > { %3999 = vmatprep.mubr.msk.bf16.mxu0 %vm6702_vm14, %v6481_v53  ;;  %v7764_v43 = vsel %vm6741_vm1, 4294967295, %v7763_v43 }
 0x1f1   : > { %v1138_v55 = vand.u32 15, %v912_v59  ;;  %v7778_v59 = vmov 0 }
 0x1f2   : > { %3895 = vmatmul.mubr.msk.bf16.gmra.mrb[64].mxu1 %vm6702_vm14, %v6481_v53  ;;  %vm6746_vm14 = vmpackc.low %vm7704_vm5, %vm4264_vm7  ;;  %vm4265_vm7 = vcmp.ne.s32.totalorder %v1131_v32, 0 }
 0x1f3   : > { %2405 = vmatprep.mubr.bf16.mxu1 %v6500_v38  ;;  %v7766_v7 = vsel %vm6746_vm14, 4294967295, %v7765_v7 }
 0x1f7   : > { %4003 = vmatmul.mubr.msk.bf16.gmra.mrb[60].mxu0 %vm6719_vm13, %v6517_v9  ;;  %vm6763_vm13 = vmpackc.low %vm4278_vm11, %vm7704_vm5  ;;  %vm4279_vm11 = vcmp.ne.s32.totalorder %v1124_v62, 15  ;;  %v7776_v62 = vld [vmem:[#allocation26_spill] sm:$0xff] }
 0x1f8   : > { %4007 = vmatprep.mubr.msk.bf16.mxu0 %vm6724_vm8, %v6528_v49 }
 0x1fa   : > { %3899 = vmatmul.mubr.msk.bf16.gmra.mrb[68].mxu1 %vm6724_vm8, %v6528_v49  ;;  %vm6768_vm8 = vmpackc.low %vm7704_vm5, %vm4265_vm7  ;;  %vm4280_vm7 = vcmp.ne.s32.totalorder %v1145_v1, 0  ;;  %v5125_v1 = vld [vmem:[#allocation8 + $0x220] sm:$0xff]  }
 0x1fb   : > { %2413 = vmatprep.mubr.bf16.mxu1 %v6532_v42 }
 0x1ff   : > { %4011 = vmatmul.mubr.msk.bf16.gmra.mrb[64].mxu0 %vm6741_vm1, %v6546_v5  ;;  %vm6784_vm1 = vmpackc.low %vm4279_vm11, %vm7704_vm5  ;;  %vm4281_vm11 = vcmp.ne.s32.totalorder %v1138_v55, 15  ;;  %v5123_v55 = vld [vmem:[#allocation8 + $0x210] sm:$0xff]  }
 0x200   : > { %4015 = vmatprep.mubr.msk.bf16.mxu0 %vm6746_vm14, %v6562_v28 }
 0x202   : > { %3903 = vmatmul.mubr.msk.bf16.gmra.mrb[72].mxu1 %vm6746_vm14, %v6562_v28  ;;  %vm6789_vm14 = vmpackc.low %vm7704_vm5, %vm4280_vm7 }
 0x203   : > { %2421 = vmatprep.mubr.bf16.mxu1 %v6568_v2  ;;  %v7774_v46 = vsel %vm6789_vm14, 4294967295, %v7773_v46  ;;  %vm6806_vm7 = vmpackc.low %vm4281_vm11, %vm7704_vm5 }
 0x204   : > { %7775 = vst [vmem:[#allocation21_spill] sm:$0xff] %v7774_v46  ;;  %v7779_v59 = vsel %vm6806_vm7, 4294967295, %v7778_v59  ;;  %v7784_v46 = vld [vmem:[#allocation22_spill] sm:$0xff] }
 0x207   : > { %4019 = vmatmul.mubr.msk.bf16.gmra.mrb[68].mxu0 %vm6763_vm13, %v6572_v11 }
 0x208   : > { %4023 = vmatprep.mubr.msk.bf16.mxu0 %vm6768_vm8, %v6595_v41 }
 0x20a   : > { %3907 = vmatmul.mubr.msk.bf16.gmra.mrb[76].mxu1 %vm6768_vm8, %v6595_v41 }
 0x20b   : > { %4039 = vmatprep.mubr.msk.bf16.mxu1 %vm5948_vm15, %v7776_v62  ;;  %v7782_v62 = vld [vmem:[#allocation32_spill] sm:$0xff]  ;;  %vm7793_vm15 = vnez %v7706_v6 }
 0x20f   : > { %4027 = vmatmul.mubr.msk.bf16.gmra.mrb[72].mxu0 %vm6784_vm1, %v6597_v35 }
 0x210   : > { %4031 = vmatprep.mubr.msk.bf16.mxu0 %vm6789_vm14, %v6610_v34  ;;  %v5124_v34 = vld [vmem:[#allocation8 + $0x218] sm:$0xff]  }
 0x212   : > { %2624 = vmatmul.mubr.bf16.vlgmr.msra.gmra.mrb[80].mxu1 %v7780_v21  ;;  %v7785_v21 = vld [vmem:[#allocation25_spill] sm:$0xff] }
 0x213   : > { %4852 = vmatpush3.bf16.msra.mxu1 %v7781_v57  ;;  %4043 = vmatprep.mubr.msk.bf16.mxu1 %vm6058_vm6, %v7782_v62  ;;  %v7790_v57 = vld [vmem:[#allocation28_spill] sm:$0xff] }
 0x214   : > { %4853 = vmatprep.subr.bf16.mxu1 %v5122_v61 }
 0x217   : > { %4035 = vmatmul.mubr.msk.bf16.gmra.mrb[76].mxu0 %vm6806_vm7, %v6622_v4  ;;  %4854 = vmatpush3.bf16.msra.mxu1 %v5122_v61  ;;  %v5126_v61 = vld [vmem:[#allocation8 + $0x228] sm:$0xff]  }
 0x218   : > { %2784 = vmatprep.mubr.bf16.mxu0 %v7784_v46  ;;  %4855 = vmatprep.subr.bf16.mxu1 %v5123_v55 }
 0x21a   : > { %2632 = vmatmul.mubr.bf16.gmra.mrb[84].mxu1 %v7784_v46  ;;  %v7788_v46 = vld [vmem:[#allocation30_spill] sm:$0xff] }
 0x21b   : > { %4047 = vmatprep.mubr.msk.bf16.mxu1 %vm6151_vm10, %v6025_v22  ;;  %4856 = vmatpush3.bf16.msra.mxu1 %v5123_v55  ;;  %v5127_v55 = vld [vmem:[#allocation8 + $0x230] sm:$0xff]  }
 0x21c   : > { %4857 = vmatprep.subr.bf16.mxu1 %v5124_v34 }
 0x21f   : > { %4103 = vmatmul.mubr.msk.bf16.vlgmr.msra.gmra.mrb[80].mxu0 %vm5862_vm12, %v7785_v21  ;;  %4858 = vmatpush3.bf16.msra.mxu1 %v5124_v34  ;;  %v5128_v34 = vld [vmem:[#allocation8 + $0x238] sm:$0xff]   ;;  %vm7791_vm12 = vnez %v7617_v25  ;;  %v7797_v21 = vld [vmem:[#allocation36_spill] sm:$0xff]  ;;  %v7799_v25 = vld [vmem:[#allocation43_spill] sm:$0xff] }
 0x220   : > { %2792 = vmatprep.mubr.bf16.mxu0 %v7787_v16  ;;  %4859 = vmatprep.subr.bf16.mxu1 %v5125_v1  ;;  %vm7800_vm11 = vnez %v7799_v25 }
 0x222   : > { %2640 = vmatmul.mubr.bf16.gmra.mrb[88].mxu1 %v7787_v16  ;;  %v7794_v16 = vld [vmem:[#allocation35_spill] sm:$0xff] }
 0x223   : > { %4051 = vmatprep.mubr.msk.bf16.mxu1 %vm6264_vm2, %v6144_v8  ;;  %4860 = vmatpush3.bf16.msra.mxu1 %v5125_v1  ;;  %v7795_v1 = vld [vmem:[#allocation40_spill] sm:$0xff] }
 0x224   : > { %4861 = vmatprep.subr.bf16.mxu1 %v5126_v61 }
 0x227   : > { %4107 = vmatmul.mubr.msk.bf16.gmra.mrb[84].mxu0 %vm5964_vm0, %v7788_v46  ;;  %4862 = vmatpush3.bf16.msra.mxu1 %v5126_v61  ;;  %vm7796_vm0 = vnez %v7795_v1  ;;  %v7801_v61 = vld [vmem:[#allocation39_spill] sm:$0xff]  ;;  %v7802_v46 = vld [vmem:[#allocation41_spill] sm:$0xff] }
 0x228   : > { %2800 = vmatprep.mubr.bf16.mxu0 %v7790_v57  ;;  %4863 = vmatprep.subr.bf16.mxu1 %v5127_v55 }
 0x22a   : > { %2648 = vmatmul.mubr.bf16.gmra.mrb[92].mxu1 %v7790_v57  ;;  %v7803_v57 = vld [vmem:[#allocation44_spill] sm:$0xff] }
 0x22b   : > { %4055 = vmatprep.mubr.msk.bf16.mxu1 %vm6385_vm4, %v6174_v33  ;;  %4864 = vmatpush3.bf16.msra.mxu1 %v5127_v55  ;;  %v7805_v55 = vld [vmem:[#allocation42_spill] sm:$0xff] }
 0x22c   : > { %4865 = vmatprep.subr.bf16.mxu1 %v5128_v34 }
 0x22f   : > { %4111 = vmatmul.mubr.msk.bf16.gmra.mrb[88].mxu0 %vm7791_vm12, %v5993_v27  ;;  %4866 = vmatpush3.bf16.msra.mxu1 %v5128_v34  ;;  %v7798_v27 = vld [vmem:[#allocation37_spill] sm:$0xff]  ;;  %vm7804_vm12 = vnez %v7803_v57 }
 0x230   : > { %2808 = vmatprep.mubr.bf16.mxu0 %v7792_v36 }
 0x232   : > { %2656 = vmatmul.mubr.bf16.gmra.mrb[96].mxu1 %v7792_v36 }
 0x233   : > { %4059 = vmatprep.mubr.msk.bf16.mxu1 %vm7793_vm15, %v6235_v54 }
 0x237   : > { %4115 = vmatmul.mubr.msk.bf16.gmra.mrb[92].mxu0 %vm7796_vm0, %v7794_v16  ;;  %vm7806_vm0 = vnez %v7752_v24 }
 0x238   : > { %2816 = vmatprep.mubr.bf16.mxu0 %v7797_v21 }
 0x23a   : > { %2664 = vmatmul.mubr.bf16.gmra.mrb[100].mxu1 %v7797_v21 }
 0x23b   : > { %4063 = vmatprep.mubr.msk.bf16.mxu1 %vm6591_vm9, %v6300_v52 }
 0x23f   : > { %4119 = vmatmul.mubr.msk.bf16.gmra.mrb[96].mxu0 %vm7800_vm11, %v7798_v27  ;;  %vm7807_vm11 = vnez %v7710_v39 }
 0x240   : > { %2824 = vmatprep.mubr.bf16.mxu0 %v7801_v61 }
 0x242   : > { %2672 = vmatmul.mubr.bf16.gmra.mrb[104].mxu1 %v7801_v61 }
 0x243   : > { %4067 = vmatprep.mubr.msk.bf16.mxu1 %vm6649_vm3, %v6346_v45  ;;  %vm7808_vm3 = vnez %v7756_v30 }
 0x247   : > { %4123 = vmatmul.mubr.msk.bf16.gmra.mrb[100].mxu0 %vm7804_vm12, %v7802_v46  ;;  %vm7809_vm12 = vnez %v7736_v14 }
 0x248   : > { %2832 = vmatprep.mubr.bf16.mxu0 %v7805_v55 }
 0x24a   : > { %2680 = vmatmul.mubr.bf16.gmra.mrb[108].mxu1 %v7805_v55 }
 0x24b   : > { %4071 = vmatprep.mubr.msk.bf16.mxu1 %vm7806_vm0, %v6407_v15  ;;  %vm7810_vm0 = vnez %v7760_v18 }
 0x24f   : > { %4127 = vmatmul.mubr.msk.bf16.gmra.mrb[104].mxu0 %vm7807_vm11, %v6250_v3  ;;  %vm7811_vm11 = vnez %v7750_v12 }
 0x250   : > { %2840 = vmatprep.mubr.bf16.mxu0 %v6285_v48 }
 0x252   : > { %2688 = vmatmul.mubr.bf16.gmra.mrb[112].mxu1 %v6285_v48 }
 0x253   : > { %4075 = vmatprep.mubr.msk.bf16.mxu1 %vm7808_vm3, %v6475_v44  ;;  %vm7812_vm3 = vnez %v7764_v43 }
 0x257   : > { %4131 = vmatmul.mubr.msk.bf16.gmra.mrb[108].mxu0 %vm7809_vm12, %v6302_v50  ;;  %vm7813_vm12 = vnez %v7754_v13 }
 0x258   : > { %2848 = vmatprep.mubr.bf16.mxu0 %v6319_v10 }
 0x25a   : > { %2696 = vmatmul.mubr.bf16.gmra.mrb[116].mxu1 %v6319_v10 }
 0x25b   : > { %4079 = vmatprep.mubr.msk.bf16.mxu1 %vm7810_vm0, %v6517_v9 }
 0x25f   : > { %4135 = vmatmul.mubr.msk.bf16.gmra.mrb[112].mxu0 %vm7811_vm11, %v6376_v40  ;;  %vm7814_vm11 = vnez %v7758_v26 }
 0x260   : > { %2856 = vmatprep.mubr.bf16.mxu0 %v6411_v56 }
 0x262   : > { %2704 = vmatmul.mubr.bf16.gmra.mrb[120].mxu1 %v6411_v56  ;;  %v4329_v3 = vpop.f32.mrb[20].mxu1 }
 0x263   : > { %4083 = vmatprep.mubr.msk.bf16.mxu1 %vm7812_vm3, %v6546_v5  ;;  %v4330_v48 = vpop.f32.mrb[21].mxu1  ;;  %v4435_v50 = vpop.f32.mrb[16].mxu0 }
 0x264   : > { %v4331_v10 = vadd.f32 %v4330_v48, %v4329_v3  ;;  %v4332_v40 = vpop.f32.mrb[22].mxu1  ;;  %v4436_v56 = vpop.f32.mrb[17].mxu0 }
 0x265   : > { %v4333_v39 = vpop.f32.mrb[23].mxu1  ;;  %v4438_v14 = vpop.f32.mrb[18].mxu0 }
 0x266   : > { %v4439_v12 = vpop.f32.mrb[19].mxu0 }
 0x267   : > { %4139 = vmatmul.mubr.msk.bf16.gmra.mrb[116].mxu0 %vm7813_vm12, %v6424_v60  ;;  %v4437_v60 = vadd.f32 %v4436_v56, %v4435_v50  ;;  %v4440_v34 = vadd.f32 %v4439_v12, %v4438_v14  ;;  %vm7815_vm12 = vnez %v7762_v63 }
 0x268   : > { %2864 = vmatprep.mubr.bf16.mxu0 %v6439_v47 }
 0x269   : > { %v6908_v13 = vadd.f32 %v4437_v60, %v6690_v19  ;;  %v6918_v26 = vadd.f32 %v4440_v34, %v6694_v23  ;;  %v914_v19 = vadd.s32 264, %v5650_v17 }
 0x26a   : > { %2712 = vmatmul.mubr.bf16.gmra.mrb[124].mxu1 %v6439_v47  ;;  %v4334_v47 = vadd.f32 %v4333_v39, %v4332_v40  ;;  %v4335_v36 = vpop.f32.mrb[24].mxu1 }
 0x26b   : > { %4087 = vmatprep.mubr.msk.bf16.mxu1 %vm6763_vm13, %v6572_v11  ;;  %v4336_v16 = vpop.f32.mrb[25].mxu1  ;;  %v1152_v57 = vand.u32 15, %v914_v19  ;;  %v7819_v19 = vld [vmem:[#allocation46_spill] sm:$0xff] }
 0x26c   : > { %v4337_v1 = vadd.f32 %v4336_v16, %v4335_v36  ;;  %v4338_v21 = vpop.f32.mrb[26].mxu1 }
 0x26d   : > { %v4339_v61 = vpop.f32.mrb[27].mxu1 }
 0x26f   : > { %4143 = vmatmul.mubr.msk.bf16.gmra.mrb[120].mxu0 %vm7814_vm11, %v6481_v53  ;;  %v5129_v53 = vld [vmem:[#allocation9] sm:$0xff]   ;;  %vm7816_vm11 = vnez %v7766_v7 }
 0x270   : > { %2872 = vmatprep.mubr.bf16.mxu0 %v6500_v38  ;;  %4899 = vmatprep.subr.bf16.mxu0 %v5129_v53 }
 0x271   : > { %4900 = vmatpush3.bf16.msra.mxu0 %v5129_v53  ;;  %v5130_v53 = vld [vmem:[#allocation9 + $0x8] sm:$0xff]  }
 0x272   : > { %2720 = vmatmul.mubr.bf16.gmra.mrb[128].mxu1 %v6500_v38  ;;  %v4441_v38 = vpop.f32.mrb[20].mxu0  ;;  %v4341_v48 = vpop.f32.mrb[28].mxu1  ;;  %4901 = vmatprep.subr.bf16.mxu0 %v5130_v53 }
 0x273   : > { %4091 = vmatprep.mubr.msk.bf16.mxu1 %vm6784_vm1, %v6597_v35  ;;  %v4442_v27 = vpop.f32.mrb[21].mxu0  ;;  %v4342_v50 = vpop.f32.mrb[29].mxu1 }
 0x274   : > { %v4443_v25 = vadd.f32 %v4442_v27, %v4441_v38  ;;  %v4444_v63 = vpop.f32.mrb[22].mxu0  ;;  %v4343_v40 = vadd.f32 %v4342_v50, %v4341_v48  ;;  %v4344_v56 = vpop.f32.mrb[30].mxu1  ;;  %v915_v38 = vadd.s32 272, %v5650_v17  ;;  %v7820_v48 = vld [vmem:[#allocation45_spill] sm:$0xff] }
 0x275   : > { %v4445_v46 = vpop.f32.mrb[23].mxu0  ;;  %v4345_v39 = vpop.f32.mrb[31].mxu1  ;;  %4902 = vmatpush3.bf16.msra.mxu0 %v5130_v53 }
 0x276   : > { %v6922_v23 = vadd.f32 %v4443_v25, %v4331_v10  ;;  %v4446_v55 = vadd.f32 %v4445_v46, %v4444_v63  ;;  %v4447_v10 = vpop.f32.mrb[24].mxu0 }
 0x277   : > { %4147 = vmatmul.mubr.msk.bf16.gmra.mrb[124].mxu0 %vm7815_vm12, %v6528_v49  ;;  %v4340_v49 = vadd.f32 %v4339_v61, %v4338_v21  ;;  %vm4282_vm12 = vcmp.ne.s32.totalorder %v1152_v57, 15  ;;  %v4448_v60 = vpop.f32.mrb[25].mxu0  ;;  %v1159_v57 = vand.u32 15, %v915_v38 }
 0x278   : > { %2880 = vmatprep.mubr.bf16.mxu0 %v6532_v42  ;;  %v6931_v3 = vadd.f32 %v4446_v55, %v4334_v47  ;;  %v4450_v14 = vpop.f32.mrb[26].mxu0 }
 0x279   : > { %v4451_v7 = vpop.f32.mrb[27].mxu0 }
 0x27a   : > { %2728 = vmatmul.mubr.bf16.gmra.mrb[132].mxu1 %v6532_v42  ;;  %v4449_v42 = vadd.f32 %v4448_v60, %v4447_v10  ;;  %v4452_v34 = vadd.f32 %v4451_v7, %v4450_v14  ;;  %v4347_v16 = vpop.f32.mrb[32].mxu1  ;;  %v7823_v60 = vmov 0.0|0.0  }
 0x27b   : > { %4095 = vmatprep.mubr.msk.bf16.mxu1 %vm6806_vm7, %v6622_v4  ;;  %vm6935_vm7 = vmpackc.low %vm4282_vm12, %vm7704_vm5  ;;  %v4453_v21 = vpop.f32.mrb[28].mxu0 }
 0x27c   : > { %v6939_v47 = vadd.f32 %v4449_v42, %v4337_v1  ;;  %v6948_v36 = vadd.f32 %v4452_v34, %v4340_v49  ;;  %v4348_v1 = vpop.f32.mrb[33].mxu1  ;;  %v4454_v25 = vpop.f32.mrb[29].mxu0 }
 0x27d   : > { %v4350_v27 = vpop.f32.mrb[34].mxu1  ;;  %v4455_v61 = vadd.f32 %v4454_v25, %v4453_v21  ;;  %v4456_v46 = vpop.f32.mrb[30].mxu0  ;;  %v7824_v21 = vld [vmem:[#allocation47_spill] sm:$0xff] }
 0x27e   : > { %v4351_v63 = vpop.f32.mrb[35].mxu1 }
 0x27f   : > { %4151 = vmatmul.mubr.msk.bf16.gmra.mrb[128].mxu0 %vm7816_vm11, %v6562_v28  ;;  %v4346_v28 = vadd.f32 %v4345_v39, %v4344_v56  ;;  %v4352_v31 = vadd.f32 %v4351_v63, %v4350_v27  ;;  %v6952_v49 = vadd.f32 %v4455_v61, %v4343_v40  ;;  %v5131_v63 = vld [vmem:[#allocation9 + $0x10] sm:$0xff]  }
 0x280   : > { %2888 = vmatprep.mubr.bf16.mxu0 %v6568_v2  ;;  %4903 = vmatprep.subr.bf16.mxu0 %v5131_v63 }
 0x281   : > { %4904 = vmatpush3.bf16.msra.mxu0 %v5131_v63 }
 0x282   : > { %2736 = vmatmul.mubr.bf16.gmra.mrb[136].mxu1 %v6568_v2  ;;  %v4349_v2 = vadd.f32 %v4348_v1, %v4347_v16  ;;  %v4353_v42 = vpop.f32.mrb[36].mxu1 }
 0x283   : > { %4099 = vmatprep.mubr.msk.bf16.mxu1 %vm6935_vm7, %v6637_v51  ;;  %v4354_v39 = vpop.f32.mrb[37].mxu1 }
 0x284   : > { %v4355_v14 = vadd.f32 %v4354_v39, %v4353_v42  ;;  %v4356_v7 = vpop.f32.mrb[38].mxu1 }
 0x287   : > { %4155 = vmatmul.mubr.msk.bf16.gmra.mrb[132].mxu0 %vm6768_vm8, %v6595_v41  ;;  %v4457_v41 = vpop.f32.mrb[31].mxu0  ;;  %vm4249_vm8 = vcmp.ne.s32.totalorder %v1159_v57, 0 }
 0x288   : > { %2896 = vmatprep.mubr.bf16.mxu0 %v7819_v19  ;;  %v4458_v55 = vadd.f32 %v4457_v41, %v4456_v46  ;;  %v4459_v40 = vpop.f32.mrb[32].mxu0 }
 0x289   : > { %v4460_v34 = vpop.f32.mrb[33].mxu0 }
 0x28a   : > { %2744 = vmatmul.mubr.bf16.gmra.mrb[140].mxu1 %v7819_v19  ;;  %v6961_v56 = vadd.f32 %v4458_v55, %v4346_v28  ;;  %v4461_v53 = vadd.f32 %v4460_v34, %v4459_v40  ;;  %v4357_v19 = vpop.f32.mrb[39].mxu1  ;;  %v4462_v16 = vpop.f32.mrb[34].mxu0 }
 0x28b   : > { %4867 = vmatprep.mubr.msk.bf16.mxu1 %vm6058_vm6, %v7782_v62  ;;  %v4358_v38 = vadd.f32 %v4357_v19, %v4356_v7  ;;  %v4463_v1 = vpop.f32.mrb[35].mxu0  ;;  %v7825_v62 = vld [vmem:[#allocation18_spill] sm:$0xff]  ;;  %v4359_v41 = vpop.f32.mrb[40].mxu1  ;;  %vm7828_vm6 = vnez %v7752_v24 }
 0x28c   : > { %v4162_v28 = vpack.c.bf16 %v7825_v62, %v7824_v21  ;;  %v6967_v27 = vadd.f32 %v4461_v53, %v4349_v2  ;;  %v4464_v25 = vadd.f32 %v4463_v1, %v4462_v16  ;;  %v4360_v57 = vpop.f32.mrb[41].mxu1 }
 0x28d   : > { %v4361_v2 = vadd.f32 %v4360_v57, %v4359_v41 }
 0x28e   : > { %v6975_v46 = vadd.f32 %v4464_v25, %v4352_v31 }
 0x28f   : > { %4159 = vmatmul.mubr.msk.bf16.gmra.mrb[136].mxu0 %vm6789_vm14, %v7820_v48  ;;  %vm4161_vm14 = vmpackc.low %vm7704_vm5, %vm4249_vm8  ;;  %v4362_v48 = vpop.f32.mrb[42].mxu1 }
 0x290   : > { %2904 = vmatprep.mubr.bf16.mxu0 %v7823_v60  ;;  %v4363_v60 = vpop.f32.mrb[43].mxu1 }
 0x291   : > { %v4465_v55 = vpop.f32.mrb[36].mxu0 }
 0x292   : > { %4868 = vmatmul.mubr.msk.bf16.vlgmr.msra.gmra.mrb[144].mxu1 %vm6151_vm10, %v6025_v22  ;;  %v4466_v50 = vpop.f32.mrb[37].mxu0  ;;  %v4364_v22 = vadd.f32 %v4363_v60, %v4362_v48  ;;  %v4365_v31 = vpop.f32.mrb[44].mxu1  ;;  %vm7829_vm10 = vnez %v7756_v30 }
 0x293   : > { %4871 = vmatprep.mubr.msk.bf16.mxu1 %vm6264_vm2, %v6144_v8  ;;  %v4467_v10 = vadd.f32 %v4466_v50, %v4465_v55  ;;  %v4468_v42 = vpop.f32.mrb[38].mxu0  ;;  %v4366_v7 = vpop.f32.mrb[45].mxu1  ;;  %vm7830_vm2 = vnez %v7779_v59 }
 0x294   : > { %v4469_v39 = vpop.f32.mrb[39].mxu0  ;;  %v4367_v53 = vadd.f32 %v4366_v7, %v4365_v31  ;;  %v4368_v19 = vpop.f32.mrb[46].mxu1 }
 0x295   : > { %v6977_v40 = vadd.f32 %v4467_v10, %v4355_v14  ;;  %v4470_v58 = vadd.f32 %v4469_v39, %v4468_v42  ;;  %v4369_v14 = vpop.f32.mrb[47].mxu1 }
 0x296   : > { %v4370_v62 = vadd.f32 %v4369_v14, %v4368_v19 }
 0x297   : > { %4163 = vmatmul.mubr.msk.bf16.gmra.mrb[140].mxu0 %vm4161_vm14, %v4162_v28  ;;  %v6985_v8 = vadd.f32 %v4470_v58, %v4358_v38 }
 0x29a   : > { %4872 = vmatmul.mubr.msk.bf16.gmra.mrb[148].mxu1 %vm6385_vm4, %v6174_v33  ;;  %vm7827_vm4 = vnez %v7748_v0 }
 0x29b   : > { %4875 = vmatprep.mubr.msk.bf16.mxu1 %vm7793_vm15, %v6235_v54  ;;  %v5132_v54 = vld [vmem:[#allocation9 + $0x18] sm:$0xff]  }
 0x29c   : > { %4905 = vmatprep.subr.bf16.mxu0 %v5132_v54 }
 0x29d   : > { %4906 = vmatpush3.bf16.msra.mxu0 %v5132_v54 }
 0x29e   : > { %v4471_v34 = vpop.f32.mrb[40].mxu0 }
 0x29f   : > { %v4472_v16 = vpop.f32.mrb[41].mxu0 }
 0x2a0   : > { %v4473_v1 = vadd.f32 %v4472_v16, %v4471_v34  ;;  %v4474_v21 = vpop.f32.mrb[42].mxu0  ;;  %v4371_v6 = vpop.f32.mrb[48].mxu1 }
 0x2a1   : > { %v4475_v28 = vpop.f32.mrb[43].mxu0  ;;  %v4372_v38 = vpop.f32.mrb[49].mxu1 }
 0x2a2   : > { %v6987_v25 = vadd.f32 %v4473_v1, %v4361_v2  ;;  %v4476_v33 = vadd.f32 %v4475_v28, %v4474_v21  ;;  %4876 = vmatmul.mubr.msk.bf16.gmra.mrb[152].mxu1 %vm6591_vm9, %v6300_v52  ;;  %v4373_v63 = vadd.f32 %v4372_v38, %v4371_v6  ;;  %v4374_v41 = vpop.f32.mrb[50].mxu1 }
 0x2a3   : > { %4879 = vmatprep.mubr.msk.bf16.mxu1 %vm7827_vm4, %v6346_v45  ;;  %v4375_v2 = vpop.f32.mrb[51].mxu1 }
 0x2a4   : > { %v6995_v20 = vadd.f32 %v4476_v33, %v4364_v22  ;;  %v4376_v37 = vadd.f32 %v4375_v2, %v4374_v41 }
 0x2aa   : > { %v4477_v61 = vpop.f32.mrb[44].mxu0  ;;  %4880 = vmatmul.mubr.msk.bf16.gmra.mrb[156].mxu1 %vm7828_vm6, %v6407_v15 }
 0x2ab   : > { %v4478_v57 = vpop.f32.mrb[45].mxu0  ;;  %4883 = vmatprep.mubr.msk.bf16.mxu1 %vm7829_vm10, %v6475_v44  ;;  %v5133_v44 = vld [vmem:[#allocation9 + $0x20] sm:$0xff]  }
 0x2ac   : > { %v4479_v55 = vadd.f32 %v4478_v57, %v4477_v61  ;;  %v4480_v48 = vpop.f32.mrb[46].mxu0  ;;  %4907 = vmatprep.subr.bf16.mxu0 %v5133_v44  ;;  %v916_v61 = vadd.s32 280, %v5650_v17  ;;  %v5134_v17 = vld [vmem:[#allocation9 + $0x28] sm:$0xff]  }
 0x2ad   : > { %v4481_v52 = vpop.f32.mrb[47].mxu0  ;;  %v4377_v10 = vpop.f32.mrb[52].mxu1  ;;  %4908 = vmatpush3.bf16.msra.mxu0 %v5133_v44 }
 0x2ae   : > { %v6997_v50 = vadd.f32 %v4479_v55, %v4367_v53  ;;  %v4482_v0 = vadd.f32 %v4481_v52, %v4480_v48  ;;  %v4378_v60 = vpop.f32.mrb[53].mxu1  ;;  %4909 = vmatprep.subr.bf16.mxu0 %v5134_v17 }
 0x2af   : > { %v4379_v22 = vadd.f32 %v4378_v60, %v4377_v10  ;;  %v4380_v39 = vpop.f32.mrb[54].mxu1  ;;  %v1166_v10 = vand.u32 15, %v916_v61 }
 0x2b0   : > { %v7005_v45 = vadd.f32 %v4482_v0, %v4370_v62  ;;  %v4381_v7 = vpop.f32.mrb[55].mxu1 }
 0x2b1   : > { %v4382_v53 = vadd.f32 %v4381_v7, %v4380_v39  ;;  %vm4250_vm9 = vcmp.ne.s32.totalorder %v1166_v10, 15  ;;  %4910 = vmatpush3.bf16.msra.mxu0 %v5134_v17 }
 0x2b2   : > { %v4483_v42 = vpop.f32.mrb[48].mxu0  ;;  %4884 = vmatmul.mubr.msk.bf16.gmra.mrb[160].mxu1 %vm7810_vm0, %v6517_v9 }
 0x2b3   : > { %v4484_v58 = vpop.f32.mrb[49].mxu0  ;;  %4887 = vmatprep.mubr.msk.bf16.mxu1 %vm7812_vm3, %v6546_v5  ;;  %vm4225_vm3 = vmpackc.low %vm4250_vm9, %vm7704_vm5 }
 0x2b4   : > { %v4485_v31 = vadd.f32 %v4484_v58, %v4483_v42  ;;  %v4486_v34 = vpop.f32.mrb[50].mxu0  ;;  %v7831_v58 = vld [vmem:[#allocation19_spill] sm:$0xff] }
 0x2b5   : > { %v4487_v19 = vpop.f32.mrb[51].mxu0  ;;  %v4383_v30 = vpop.f32.mrb[56].mxu1 }
 0x2b6   : > { %v7007_v16 = vadd.f32 %v4485_v31, %v4373_v63  ;;  %v4488_v15 = vadd.f32 %v4487_v19, %v4486_v34  ;;  %v4384_v1 = vpop.f32.mrb[57].mxu1  ;;  %v4226_v31 = vpack.c.bf16 %v7831_v58, %v7831_v58 }
 0x2b7   : > { %v4385_v21 = vadd.f32 %v4384_v1, %v4383_v30  ;;  %v4386_v62 = vpop.f32.mrb[58].mxu1 }
 0x2b8   : > { %v7015_v24 = vadd.f32 %v4488_v15, %v4376_v37  ;;  %v4387_v54 = vpop.f32.mrb[59].mxu1 }
 0x2b9   : > { %v4388_v18 = vadd.f32 %v4387_v54, %v4386_v62 }
 0x2ba   : > { %v4489_v14 = vpop.f32.mrb[52].mxu0  ;;  %4888 = vmatmul.mubr.msk.bf16.gmra.mrb[164].mxu1 %vm6763_vm13, %v6572_v11 }
 0x2bb   : > { %v4490_v28 = vpop.f32.mrb[53].mxu0  ;;  %4891 = vmatprep.mubr.msk.bf16.mxu1 %vm6784_vm1, %v6597_v35 }
 0x2bc   : > { %v4491_v33 = vadd.f32 %v4490_v28, %v4489_v14  ;;  %v4492_v6 = vpop.f32.mrb[54].mxu0 }
 0x2bd   : > { %v4493_v9 = vpop.f32.mrb[55].mxu0  ;;  %v4389_v63 = vpop.f32.mrb[60].mxu1 }
 0x2be   : > { %v7017_v38 = vadd.f32 %v4491_v33, %v4379_v22  ;;  %v4494_v43 = vadd.f32 %v4493_v9, %v4492_v6  ;;  %v4390_v41 = vpop.f32.mrb[61].mxu1 }
 0x2bf   : > { %v4391_v55 = vadd.f32 %v4390_v41, %v4389_v63  ;;  %v4392_v2 = vpop.f32.mrb[62].mxu1  ;;  %v5135_v41 = vld [vmem:[#allocation9 + $0x30] sm:$0xff]  }
 0x2c0   : > { %v7025_v5 = vadd.f32 %v4494_v43, %v4382_v53  ;;  %v4393_v52 = vpop.f32.mrb[63].mxu1  ;;  %4911 = vmatprep.subr.bf16.mxu0 %v5135_v41 }
 0x2c1   : > { %v4394_v29 = vadd.f32 %v4393_v52, %v4392_v2  ;;  %4912 = vmatpush3.bf16.msra.mxu0 %v5135_v41 }
 0x2c2   : > { %v4495_v57 = vpop.f32.mrb[56].mxu0  ;;  %4892 = vmatmul.mubr.msk.bf16.gmra.mrb[168].mxu1 %vm7830_vm2, %v6622_v4 }
 0x2c3   : > { %v4496_v48 = vpop.f32.mrb[57].mxu0  ;;  %4895 = vmatprep.mubr.msk.bf16.mxu1 %vm6935_vm7, %v6637_v51 }
 0x2c4   : > { %v4497_v37 = vadd.f32 %v4496_v48, %v4495_v57  ;;  %v4498_v0 = vpop.f32.mrb[58].mxu0 }
 0x2c5   : > { %v4499_v11 = vpop.f32.mrb[59].mxu0  ;;  %v4395_v42 = vpop.f32.mrb[64].mxu1 }
 0x2c6   : > { %v7028_v60 = vadd.f32 %v4497_v37, %v4385_v21  ;;  %v4500_v32 = vadd.f32 %v4499_v11, %v4498_v0  ;;  %v4396_v22 = vpop.f32.mrb[65].mxu1 }
 0x2c7   : > { %v4397_v7 = vadd.f32 %v4396_v22, %v4395_v42  ;;  %v4398_v34 = vpop.f32.mrb[66].mxu1 }
 0x2c8   : > { %v7036_v35 = vadd.f32 %v4500_v32, %v4388_v18  ;;  %v4399_v12 = vpop.f32.mrb[67].mxu1 }
 0x2c9   : > { %v4400_v53 = vadd.f32 %v4399_v12, %v4398_v34 }
 0x2ca   : > { %v4501_v39 = vpop.f32.mrb[60].mxu0  ;;  %4896 = vmatmul.mubr.msk.bf16.gmra.mrb[172].mxu1 %vm4225_vm3, %v4226_v31 }
 0x2cb   : > { %v4502_v59 = vpop.f32.mrb[61].mxu0 }
 0x2cc   : > { %v4503_v4 = vadd.f32 %v4502_v59, %v4501_v39  ;;  %v4504_v51 = vpop.f32.mrb[62].mxu0 }
 0x2cd   : > { %v4505_v19 = vpop.f32.mrb[63].mxu0  ;;  %v4401_v1 = vpop.f32.mrb[68].mxu1 }
 0x2ce   : > { %v7041_v15 = vadd.f32 %v4503_v4, %v4391_v55  ;;  %v4506_v44 = vadd.f32 %v4505_v19, %v4504_v51  ;;  %v4402_v14 = vpop.f32.mrb[69].mxu1 }
 0x2cf   : > { %v4403_v62 = vadd.f32 %v4402_v14, %v4401_v1  ;;  %v4404_v28 = vpop.f32.mrb[70].mxu1 }
 0x2d0   : > { %v7043_v30 = vadd.f32 %v4506_v44, %v4394_v29  ;;  %v4405_v6 = vpop.f32.mrb[71].mxu1 }
 0x2d1   : > { %v4406_v9 = vadd.f32 %v4405_v6, %v4404_v28 }
 0x2d2   : > { %v4507_v21 = vpop.f32.mrb[64].mxu0 }
 0x2d3   : > { %v4508_v33 = vpop.f32.mrb[65].mxu0 }
 0x2d4   : > { %v4509_v54 = vadd.f32 %v4508_v33, %v4507_v21  ;;  %v4510_v18 = vpop.f32.mrb[66].mxu0  ;;  %v5136_v21 = vld [vmem:[#allocation9 + $0x38] sm:$0xff]  }
 0x2d5   : > { %v4511_v43 = vpop.f32.mrb[67].mxu0  ;;  %v4407_v55 = vpop.f32.mrb[72].mxu1  ;;  %4913 = vmatprep.subr.bf16.mxu0 %v5136_v21 }
 0x2d6   : > { %v7045_v61 = vadd.f32 %v4509_v54, %v4397_v7  ;;  %v4512_v63 = vadd.f32 %v4511_v43, %v4510_v18  ;;  %v4408_v2 = vpop.f32.mrb[73].mxu1  ;;  %4914 = vmatpush3.bf16.msra.mxu0 %v5136_v21 }
 0x2d7   : > { %v4409_v37 = vadd.f32 %v4408_v2, %v4407_v55  ;;  %v4410_v52 = vpop.f32.mrb[74].mxu1 }
 0x2d8   : > { %v7047_v57 = vadd.f32 %v4512_v63, %v4400_v53  ;;  %v4411_v29 = vpop.f32.mrb[75].mxu1 }
 0x2d9   : > { %v4412_v32 = vadd.f32 %v4411_v29, %v4410_v52 }
 0x2da   : > { %v4513_v48 = vpop.f32.mrb[68].mxu0 }
 0x2db   : > { %v4514_v0 = vpop.f32.mrb[69].mxu0 }
 0x2dc   : > { %v4515_v10 = vadd.f32 %v4514_v0, %v4513_v48  ;;  %v4516_v11 = vpop.f32.mrb[70].mxu0 }
 0x2dd   : > { %v4517_v17 = vpop.f32.mrb[71].mxu0  ;;  %v4413_v58 = vpop.f32.mrb[76].mxu1 }
 0x2de   : > { %v7049_v42 = vadd.f32 %v4515_v10, %v4403_v62  ;;  %v4518_v22 = vadd.f32 %v4517_v17, %v4516_v11  ;;  %v4414_v31 = vpop.f32.mrb[77].mxu1 }
 0x2df   : > { %v4415_v34 = vadd.f32 %v4414_v31, %v4413_v58  ;;  %v4416_v59 = vpop.f32.mrb[78].mxu1 }
 0x2e0   : > { %v7051_v39 = vadd.f32 %v4518_v22, %v4406_v9  ;;  %v4417_v51 = vpop.f32.mrb[79].mxu1 }
 0x2e1   : > { %v4418_v19 = vadd.f32 %v4417_v51, %v4416_v59 }
 0x2e2   : > { %v4519_v7 = vpop.f32.mrb[72].mxu0 }
 0x2e3   : > { %v4520_v4 = vpop.f32.mrb[73].mxu0 }
 0x2e4   : > { %v4521_v12 = vadd.f32 %v4520_v4, %v4519_v7  ;;  %v4522_v53 = vpop.f32.mrb[74].mxu0 }
 0x2e5   : > { %v4523_v44 = vpop.f32.mrb[75].mxu0  ;;  %v4547_v28 = vpop.f32.mrb[80].mxu1 }
 0x2e6   : > { %v7053_v1 = vadd.f32 %v4521_v12, %v4409_v37  ;;  %v4524_v14 = vadd.f32 %v4523_v44, %v4522_v53  ;;  %v4548_v54 = vpop.f32.mrb[81].mxu1 }
 0x2e7   : > { %v4549_v6 = vadd.f32 %v4548_v54, %v4547_v28  ;;  %v4550_v9 = vpop.f32.mrb[82].mxu1 }
 0x2e8   : > { %v7055_v62 = vadd.f32 %v4524_v14, %v4412_v32  ;;  %v4551_v41 = vpop.f32.mrb[83].mxu1 }
 0x2e9   : > { %v2626_v55 = vadd.f32 %v4549_v6, %v6908_v13  ;;  %v4552_v2 = vadd.f32 %v4551_v41, %v4550_v9 }
 0x2ea   : > { %v4525_v33 = vpop.f32.mrb[76].mxu0 }
 0x2eb   : > { %v4526_v18 = vpop.f32.mrb[77].mxu0  ;;  %v2629_v0 = vadd.f32 %v4552_v2, %v6918_v26 }
 0x2ec   : > { %v4527_v43 = vadd.f32 %v4526_v18, %v4525_v33  ;;  %v4528_v63 = vpop.f32.mrb[78].mxu0 }
 0x2ed   : > { %v4529_v48 = vpop.f32.mrb[79].mxu0  ;;  %v4553_v29 = vpop.f32.mrb[84].mxu1 }
 0x2ee   : > { %v7058_v37 = vadd.f32 %v4527_v43, %v4415_v34  ;;  %v4530_v52 = vadd.f32 %v4529_v48, %v4528_v63  ;;  %v4554_v11 = vpop.f32.mrb[85].mxu1 }
 0x2ef   : > { %v4555_v17 = vadd.f32 %v4554_v11, %v4553_v29  ;;  %v4556_v22 = vpop.f32.mrb[86].mxu1 }
 0x2f0   : > { %v7061_v10 = vadd.f32 %v4530_v52, %v4418_v19  ;;  %v4557_v7 = vpop.f32.mrb[87].mxu1 }
 0x2f1   : > { %v2634_v13 = vadd.f32 %v4555_v17, %v6922_v23  ;;  %v4558_v4 = vadd.f32 %v4557_v7, %v4556_v22 }
 0x2f2   : > { %v4659_v32 = vpop.f32.mrb[80].mxu0 }
 0x2f3   : > { %v4660_v58 = vpop.f32.mrb[81].mxu0  ;;  %v2637_v26 = vadd.f32 %v4558_v4, %v6931_v3 }
 0x2f4   : > { %v4661_v31 = vadd.f32 %v4660_v58, %v4659_v32  ;;  %v4662_v59 = vpop.f32.mrb[82].mxu0 }
 0x2f5   : > { %v4663_v12 = vpop.f32.mrb[83].mxu0  ;;  %v4559_v19 = vpop.f32.mrb[88].mxu1 }
 0x2f6   : > { %v4664_v34 = vadd.f32 %v4663_v12, %v4662_v59  ;;  %v7064_v51 = vadd.f32 %v4661_v31, %v2626_v55  ;;  %v4560_v44 = vpop.f32.mrb[89].mxu1 }
 0x2f7   : > { %v4561_v21 = vadd.f32 %v4560_v44, %v4559_v19  ;;  %v4562_v28 = vpop.f32.mrb[90].mxu1 }
 0x2f8   : > { %v7067_v53 = vadd.f32 %v4664_v34, %v2629_v0  ;;  %v4563_v6 = vpop.f32.mrb[91].mxu1 }
 0x2f9   : > { %v2642_v23 = vadd.f32 %v4561_v21, %v6939_v47  ;;  %v4564_v9 = vadd.f32 %v4563_v6, %v4562_v28 }
 0x2fa   : > { %v4665_v14 = vpop.f32.mrb[84].mxu0 }
 0x2fb   : > { %v4666_v33 = vpop.f32.mrb[85].mxu0  ;;  %v2645_v3 = vadd.f32 %v4564_v9, %v6948_v36 }
 0x2fc   : > { %v4667_v54 = vadd.f32 %v4666_v33, %v4665_v14  ;;  %v4668_v18 = vpop.f32.mrb[86].mxu0 }
 0x2fd   : > { %v4669_v43 = vpop.f32.mrb[87].mxu0  ;;  %v4565_v2 = vpop.f32.mrb[92].mxu1 }
 0x2fe   : > { %v4670_v63 = vadd.f32 %v4669_v43, %v4668_v18  ;;  %v7070_v41 = vadd.f32 %v4667_v54, %v2634_v13  ;;  %v4566_v48 = vpop.f32.mrb[93].mxu1 }
 0x2ff   : > { %v4567_v0 = vadd.f32 %v4566_v48, %v4565_v2  ;;  %v4568_v29 = vpop.f32.mrb[94].mxu1 }
 0x300   : > { %v7073_v55 = vadd.f32 %v4670_v63, %v2637_v26  ;;  %v4569_v17 = vpop.f32.mrb[95].mxu1 }
 0x301   : > { %v2650_v47 = vadd.f32 %v4567_v0, %v6952_v49  ;;  %v4570_v58 = vadd.f32 %v4569_v17, %v4568_v29 }
 0x302   : > { %v4671_v52 = vpop.f32.mrb[88].mxu0 }
 0x303   : > { %v4672_v11 = vpop.f32.mrb[89].mxu0  ;;  %v2653_v36 = vadd.f32 %v4570_v58, %v6961_v56 }
 0x304   : > { %v4673_v32 = vadd.f32 %v4672_v11, %v4671_v52  ;;  %v4674_v22 = vpop.f32.mrb[90].mxu0 }
 0x305   : > { %v4675_v31 = vpop.f32.mrb[91].mxu0  ;;  %v4571_v4 = vpop.f32.mrb[96].mxu1 }
 0x306   : > { %v4676_v7 = vadd.f32 %v4675_v31, %v4674_v22  ;;  %v7076_v59 = vadd.f32 %v4673_v32, %v2642_v23  ;;  %v4572_v12 = vpop.f32.mrb[97].mxu1 }
 0x307   : > { %v4573_v26 = vadd.f32 %v4572_v12, %v4571_v4  ;;  %v4574_v19 = vpop.f32.mrb[98].mxu1 }
 0x308   : > { %v7079_v13 = vadd.f32 %v4676_v7, %v2645_v3  ;;  %v4575_v21 = vpop.f32.mrb[99].mxu1 }
 0x309   : > { %v2658_v49 = vadd.f32 %v4573_v26, %v6967_v27  ;;  %v4576_v33 = vadd.f32 %v4575_v21, %v4574_v19 }
 0x30a   : > { %v4677_v34 = vpop.f32.mrb[92].mxu0 }
 0x30b   : > { %v4678_v44 = vpop.f32.mrb[93].mxu0  ;;  %v2661_v56 = vadd.f32 %v4576_v33, %v6975_v46 }
 0x30c   : > { %v4679_v14 = vadd.f32 %v4678_v44, %v4677_v34  ;;  %v4680_v28 = vpop.f32.mrb[94].mxu0 }
 0x30d   : > { %v4681_v54 = vpop.f32.mrb[95].mxu0  ;;  %v4577_v9 = vpop.f32.mrb[100].mxu1 }
 0x30e   : > { %v4682_v6 = vadd.f32 %v4681_v54, %v4680_v28  ;;  %v7082_v18 = vadd.f32 %v4679_v14, %v2650_v47  ;;  %v4578_v43 = vpop.f32.mrb[101].mxu1 }
 0x30f   : > { %v4579_v3 = vadd.f32 %v4578_v43, %v4577_v9  ;;  %v4580_v2 = vpop.f32.mrb[102].mxu1 }
 0x310   : > { %v7085_v23 = vadd.f32 %v4682_v6, %v2653_v36  ;;  %v4581_v0 = vpop.f32.mrb[103].mxu1 }
 0x311   : > { %v2666_v27 = vadd.f32 %v4579_v3, %v6977_v40  ;;  %v4582_v11 = vadd.f32 %v4581_v0, %v4580_v2 }
 0x312   : > { %v4683_v63 = vpop.f32.mrb[96].mxu0 }
 0x313   : > { %v4684_v48 = vpop.f32.mrb[97].mxu0  ;;  %v2669_v46 = vadd.f32 %v4582_v11, %v6985_v8 }
 0x314   : > { %v4685_v52 = vadd.f32 %v4684_v48, %v4683_v63  ;;  %v4686_v29 = vpop.f32.mrb[98].mxu0 }
 0x315   : > { %v4687_v32 = vpop.f32.mrb[99].mxu0  ;;  %v4583_v58 = vpop.f32.mrb[104].mxu1 }
 0x316   : > { %v4688_v17 = vadd.f32 %v4687_v32, %v4686_v29  ;;  %v7088_v22 = vadd.f32 %v4685_v52, %v2658_v49  ;;  %v4584_v31 = vpop.f32.mrb[105].mxu1 }
 0x317   : > { %v4585_v36 = vadd.f32 %v4584_v31, %v4583_v58  ;;  %v4586_v4 = vpop.f32.mrb[106].mxu1 }
 0x318   : > { %v7091_v47 = vadd.f32 %v4688_v17, %v2661_v56  ;;  %v4587_v26 = vpop.f32.mrb[107].mxu1 }
 0x319   : > { %v2674_v40 = vadd.f32 %v4585_v36, %v6987_v25  ;;  %v4588_v44 = vadd.f32 %v4587_v26, %v4586_v4 }
 0x31a   : > { %v4689_v7 = vpop.f32.mrb[100].mxu0 }
 0x31b   : > { %v4690_v12 = vpop.f32.mrb[101].mxu0  ;;  %v2677_v8 = vadd.f32 %v4588_v44, %v6995_v20 }
 0x31c   : > { %v4691_v34 = vadd.f32 %v4690_v12, %v4689_v7  ;;  %v4692_v19 = vpop.f32.mrb[102].mxu0 }
 0x31d   : > { %v4693_v14 = vpop.f32.mrb[103].mxu0  ;;  %v4589_v33 = vpop.f32.mrb[108].mxu1 }
 0x31e   : > { %v4694_v21 = vadd.f32 %v4693_v14, %v4692_v19  ;;  %v7094_v28 = vadd.f32 %v4691_v34, %v2666_v27  ;;  %v4590_v54 = vpop.f32.mrb[109].mxu1 }
 0x31f   : > { %v4591_v56 = vadd.f32 %v4590_v54, %v4589_v33  ;;  %v4592_v9 = vpop.f32.mrb[110].mxu1 }
 0x320   : > { %v7097_v49 = vadd.f32 %v4694_v21, %v2669_v46  ;;  %v4593_v3 = vpop.f32.mrb[111].mxu1 }
 0x321   : > { %v2682_v25 = vadd.f32 %v4591_v56, %v6997_v50  ;;  %v4594_v48 = vadd.f32 %v4593_v3, %v4592_v9 }
 0x322   : > { %v4695_v6 = vpop.f32.mrb[104].mxu0 }
 0x323   : > { %v4696_v43 = vpop.f32.mrb[105].mxu0  ;;  %v2685_v20 = vadd.f32 %v4594_v48, %v7005_v45 }
 0x324   : > { %v4697_v63 = vadd.f32 %v4696_v43, %v4695_v6  ;;  %v4698_v2 = vpop.f32.mrb[106].mxu0 }
 0x325   : > { %v4699_v52 = vpop.f32.mrb[107].mxu0  ;;  %v4595_v11 = vpop.f32.mrb[112].mxu1 }
 0x326   : > { %v4700_v0 = vadd.f32 %v4699_v52, %v4698_v2  ;;  %v7100_v29 = vadd.f32 %v4697_v63, %v2674_v40  ;;  %v4596_v32 = vpop.f32.mrb[113].mxu1 }
 0x327   : > { %v4597_v46 = vadd.f32 %v4596_v32, %v4595_v11  ;;  %v4598_v58 = vpop.f32.mrb[114].mxu1 }
 0x328   : > { %v7103_v27 = vadd.f32 %v4700_v0, %v2677_v8  ;;  %v4599_v36 = vpop.f32.mrb[115].mxu1 }
 0x329   : > { %v2690_v50 = vadd.f32 %v4597_v46, %v7007_v16  ;;  %v4600_v12 = vadd.f32 %v4599_v36, %v4598_v58 }
 0x32a   : > { %v4701_v17 = vpop.f32.mrb[108].mxu0 }
 0x32b   : > { %v4702_v31 = vpop.f32.mrb[109].mxu0  ;;  %v2693_v45 = vadd.f32 %v4600_v12, %v7015_v24 }
 0x32c   : > { %v4703_v7 = vadd.f32 %v4702_v31, %v4701_v17  ;;  %v4704_v4 = vpop.f32.mrb[110].mxu0 }
 0x32d   : > { %v4705_v34 = vpop.f32.mrb[111].mxu0  ;;  %v4601_v44 = vpop.f32.mrb[116].mxu1 }
 0x32e   : > { %v4706_v26 = vadd.f32 %v4705_v34, %v4704_v4  ;;  %v7106_v19 = vadd.f32 %v4703_v7, %v2682_v25  ;;  %v4602_v14 = vpop.f32.mrb[117].mxu1 }
 0x32f   : > { %v4603_v8 = vadd.f32 %v4602_v14, %v4601_v44  ;;  %v4604_v33 = vpop.f32.mrb[118].mxu1 }
 0x330   : > { %v7109_v40 = vadd.f32 %v4706_v26, %v2685_v20  ;;  %v4605_v56 = vpop.f32.mrb[119].mxu1 }
 0x331   : > { %v2698_v16 = vadd.f32 %v4603_v8, %v7017_v38  ;;  %v4606_v43 = vadd.f32 %v4605_v56, %v4604_v33 }
 0x332   : > { %v4707_v21 = vpop.f32.mrb[112].mxu0 }
 0x333   : > { %v4708_v54 = vpop.f32.mrb[113].mxu0  ;;  %v2701_v24 = vadd.f32 %v4606_v43, %v7025_v5 }
 0x334   : > { %v4709_v6 = vadd.f32 %v4708_v54, %v4707_v21  ;;  %v4710_v9 = vpop.f32.mrb[114].mxu0 }
 0x335   : > { %v4711_v63 = vpop.f32.mrb[115].mxu0  ;;  %v4607_v48 = vpop.f32.mrb[120].mxu1 }
 0x336   : > { %v4712_v3 = vadd.f32 %v4711_v63, %v4710_v9  ;;  %v7112_v2 = vadd.f32 %v4709_v6, %v2690_v50  ;;  %v4608_v52 = vpop.f32.mrb[121].mxu1 }
 0x337   : > { %v4609_v20 = vadd.f32 %v4608_v52, %v4607_v48  ;;  %v4610_v11 = vpop.f32.mrb[122].mxu1 }
 0x338   : > { %v7115_v25 = vadd.f32 %v4712_v3, %v2693_v45  ;;  %v4611_v46 = vpop.f32.mrb[123].mxu1 }
 0x339   : > { %v2706_v38 = vadd.f32 %v4609_v20, %v7028_v60  ;;  %v4612_v31 = vadd.f32 %v4611_v46, %v4610_v11 }
 0x33a   : > { %v4713_v0 = vpop.f32.mrb[116].mxu0 }
 0x33b   : > { %v4714_v32 = vpop.f32.mrb[117].mxu0  ;;  %v2709_v5 = vadd.f32 %v4612_v31, %v7036_v35 }
 0x33c   : > { %v4715_v17 = vadd.f32 %v4714_v32, %v4713_v0  ;;  %v4716_v58 = vpop.f32.mrb[118].mxu0 }
 0x33d   : > { %v4717_v7 = vpop.f32.mrb[119].mxu0  ;;  %v4613_v12 = vpop.f32.mrb[124].mxu1 }
 0x33e   : > { %v4718_v36 = vadd.f32 %v4717_v7, %v4716_v58  ;;  %v7118_v4 = vadd.f32 %v4715_v17, %v2698_v16  ;;  %v4614_v34 = vpop.f32.mrb[125].mxu1 }
 0x33f   : > { %v4615_v45 = vadd.f32 %v4614_v34, %v4613_v12  ;;  %v4616_v44 = vpop.f32.mrb[126].mxu1 }
 0x340   : > { %v7121_v50 = vadd.f32 %v4718_v36, %v2701_v24  ;;  %v4617_v8 = vpop.f32.mrb[127].mxu1 }
 0x341   : > { %v2714_v60 = vadd.f32 %v4615_v45, %v7041_v15  ;;  %v4618_v54 = vadd.f32 %v4617_v8, %v4616_v44 }
 0x342   : > { %v4719_v26 = vpop.f32.mrb[120].mxu0 }
 0x343   : > { %v4720_v14 = vpop.f32.mrb[121].mxu0  ;;  %v2717_v35 = vadd.f32 %v4618_v54, %v7043_v30 }
 0x344   : > { %v4721_v21 = vadd.f32 %v4720_v14, %v4719_v26  ;;  %v4722_v33 = vpop.f32.mrb[122].mxu0 }
 0x345   : > { %v4723_v6 = vpop.f32.mrb[123].mxu0  ;;  %v4619_v43 = vpop.f32.mrb[128].mxu1 }
 0x346   : > { %v4724_v56 = vadd.f32 %v4723_v6, %v4722_v33  ;;  %v7124_v9 = vadd.f32 %v4721_v21, %v2706_v38  ;;  %v4620_v63 = vpop.f32.mrb[129].mxu1 }
 0x347   : > { %v4621_v24 = vadd.f32 %v4620_v63, %v4619_v43  ;;  %v4622_v48 = vpop.f32.mrb[130].mxu1 }
 0x348   : > { %v7127_v16 = vadd.f32 %v4724_v56, %v2709_v5  ;;  %v4623_v20 = vpop.f32.mrb[131].mxu1 }
 0x349   : > { %v2722_v15 = vadd.f32 %v4621_v24, %v7045_v61  ;;  %v4624_v32 = vadd.f32 %v4623_v20, %v4622_v48 }
 0x34a   : > { %v4725_v3 = vpop.f32.mrb[124].mxu0 }
 0x34b   : > { %v4726_v52 = vpop.f32.mrb[125].mxu0  ;;  %v2725_v30 = vadd.f32 %v4624_v32, %v7047_v57 }
 0x34c   : > { %v4727_v0 = vadd.f32 %v4726_v52, %v4725_v3  ;;  %v4728_v11 = vpop.f32.mrb[126].mxu0 }
 0x34d   : > { %v4729_v17 = vpop.f32.mrb[127].mxu0  ;;  %v4625_v31 = vpop.f32.mrb[132].mxu1 }
 0x34e   : > { %v4730_v46 = vadd.f32 %v4729_v17, %v4728_v11  ;;  %v7130_v58 = vadd.f32 %v4727_v0, %v2714_v60  ;;  %v4626_v7 = vpop.f32.mrb[133].mxu1 }
 0x34f   : > { %v4627_v5 = vadd.f32 %v4626_v7, %v4625_v31  ;;  %v4628_v12 = vpop.f32.mrb[134].mxu1 }
 0x350   : > { %v7133_v38 = vadd.f32 %v4730_v46, %v2717_v35  ;;  %v4629_v45 = vpop.f32.mrb[135].mxu1 }
 0x351   : > { %v2730_v61 = vadd.f32 %v4627_v5, %v7049_v42  ;;  %v4630_v14 = vadd.f32 %v4629_v45, %v4628_v12 }
 0x352   : > { %v4731_v36 = vpop.f32.mrb[128].mxu0 }
 0x353   : > { %v4732_v34 = vpop.f32.mrb[129].mxu0  ;;  %v2733_v57 = vadd.f32 %v4630_v14, %v7051_v39 }
 0x354   : > { %v4733_v26 = vadd.f32 %v4732_v34, %v4731_v36  ;;  %v4734_v44 = vpop.f32.mrb[130].mxu0 }
 0x355   : > { %v4735_v21 = vpop.f32.mrb[131].mxu0  ;;  %v4631_v54 = vpop.f32.mrb[136].mxu1 }
 0x356   : > { %v4736_v8 = vadd.f32 %v4735_v21, %v4734_v44  ;;  %v7136_v33 = vadd.f32 %v4733_v26, %v2722_v15  ;;  %v4632_v6 = vpop.f32.mrb[137].mxu1  ;;  %v7156_v21 = vld [vmem:[%s7461_s5] ss:$0 sm:$0xff] }
 0x357   : > { %v4633_v35 = vadd.f32 %v4632_v6, %v4631_v54  ;;  %v4634_v43 = vpop.f32.mrb[138].mxu1 }
 0x358   : > { %v7139_v60 = vadd.f32 %v4736_v8, %v2725_v30  ;;  %v4635_v24 = vpop.f32.mrb[139].mxu1 }
 0x359   : > { %v2738_v42 = vadd.f32 %v4633_v35, %v7053_v1  ;;  %v4636_v52 = vadd.f32 %v4635_v24, %v4634_v43 }
 0x35a   : > { %v4737_v56 = vpop.f32.mrb[132].mxu0 }
 0x35b   : > { %v4738_v63 = vpop.f32.mrb[133].mxu0  ;;  %v2741_v39 = vadd.f32 %v4636_v52, %v7055_v62 }
 0x35c   : > { %v4739_v3 = vadd.f32 %v4738_v63, %v4737_v56  ;;  %v4740_v48 = vpop.f32.mrb[134].mxu0 }
 0x35d   : > { %v4741_v0 = vpop.f32.mrb[135].mxu0  ;;  %v4637_v32 = vpop.f32.mrb[140].mxu1 }
 0x35e   : > { %v4742_v20 = vadd.f32 %v4741_v0, %v4740_v48  ;;  %v7142_v11 = vadd.f32 %v4739_v3, %v2730_v61  ;;  %v4638_v17 = vpop.f32.mrb[141].mxu1 }
 0x35f   : > { %v4639_v30 = vadd.f32 %v4638_v17, %v4637_v32  ;;  %v4640_v31 = vpop.f32.mrb[142].mxu1 }
 0x360   : > { %v7145_v15 = vadd.f32 %v4742_v20, %v2733_v57  ;;  %v4641_v5 = vpop.f32.mrb[143].mxu1 }
 0x361   : > { %v2746_v1 = vadd.f32 %v4639_v30, %v7058_v37  ;;  %v4642_v34 = vadd.f32 %v4641_v5, %v4640_v31  ;;  %v7162_v37 = vld [vmem:[%s7462_s6] ss:$0 sm:$0xff] }
 0x362   : > { %v4743_v46 = vpop.f32.mrb[136].mxu0 }
 0x363   : > { %v4744_v7 = vpop.f32.mrb[137].mxu0  ;;  %v2749_v62 = vadd.f32 %v4642_v34, %v7061_v10 }
 0x364   : > { %v4745_v36 = vadd.f32 %v4744_v7, %v4743_v46  ;;  %v4746_v12 = vpop.f32.mrb[138].mxu0 }
 0x365   : > { %v4747_v26 = vpop.f32.mrb[139].mxu0  ;;  %v4869_v14 = vpop.f32.mrb[144].mxu1 }
 0x366   : > { %v4748_v45 = vadd.f32 %v4747_v26, %v4746_v12  ;;  %v7148_v44 = vadd.f32 %v4745_v36, %v2738_v42  ;;  %v2956_v8 = vadd.f32 %v4869_v14, %v7070_v41  ;;  %v2947_v54 = vpop.f32.mrb[145].mxu1 }
 0x367   : > { %v2948_v6 = vadd.f32 %v2947_v54, %v7064_v51  ;;  %v4870_v56 = vpop.f32.mrb[146].mxu1 }
 0x368   : > { %v7151_v61 = vadd.f32 %v4748_v45, %v2741_v39  ;;  %v3083_v35 = vmul.f32 %v7156_v21, %v2956_v8  ;;  %v2959_v63 = vadd.f32 %v4870_v56, %v7073_v55  ;;  %v2950_v24 = vpop.f32.mrb[147].mxu1 }
 0x369   : > { %v3081_v41 = vmul.f32 %v7156_v21, %v2948_v6  ;;  %v2951_v48 = vadd.f32 %v2950_v24, %v7067_v53 }
 0x36a   : > { %v4749_v57 = vpop.f32.mrb[140].mxu0  ;;  %v3122_v52 = vadd.f32 %v7162_v37, %v3083_v35  ;;  %v3084_v0 = vmul.f32 %v7156_v21, %v2959_v63 }
 0x36b   : > { %v4750_v10 = vpop.f32.mrb[141].mxu0  ;;  %v3120_v39 = vadd.f32 %v7162_v37, %v3081_v41  ;;  %v3082_v32 = vmul.f32 %v7156_v21, %v2951_v48 }
 0x36c   : > { %v4751_v43 = vadd.f32 %v4750_v10, %v4749_v57  ;;  %v4752_v3 = vpop.f32.mrb[142].mxu0  ;;  %v3123_v55 = vadd.f32 %v7162_v37, %v3084_v0  ;;  %v3154_v53 = vmax.f32 %v3122_v52, 0.0 }
 0x36d   : > { %v4753_v42 = vpop.f32.mrb[143].mxu0  ;;  %v3121_v46 = vadd.f32 %v7162_v37, %v3082_v32  ;;  %v4873_v30 = vpop.f32.mrb[148].mxu1  ;;  %v3152_v5 = vmax.f32 %v3120_v39, 0.0 }
 0x36e   : > { %v4754_v20 = vadd.f32 %v4753_v42, %v4752_v3  ;;  %v7171_v51 = vadd.f32 %v4751_v43, %v2746_v1  ;;  %v3155_v31 = vmax.f32 %v3123_v55, 0.0  ;;  %v2972_v7 = vadd.f32 %v4873_v30, %v7082_v18  ;;  %v2963_v36 = vpop.f32.mrb[149].mxu1 }
 0x36f   : > { %v3153_v12 = vmax.f32 %v3121_v46, 0.0  ;;  %v2964_v1 = vadd.f32 %v2963_v36, %v7076_v59  ;;  %v4874_v34 = vpop.f32.mrb[150].mxu1 }
 0x370   : > { %v7176_v17 = vadd.f32 %v4754_v20, %v2749_v62  ;;  %v3185_v26 = vpack.c.bf16 %v3155_v31, %v3154_v53  ;;  %v3087_v45 = vmul.f32 %v7156_v21, %v2972_v7  ;;  %v2975_v14 = vadd.f32 %v4874_v34, %v7085_v23  ;;  %v2966_v62 = vpop.f32.mrb[151].mxu1 }
 0x371   : > { %v3085_v8 = vmul.f32 %v7156_v21, %v2964_v1  ;;  %v2967_v57 = vadd.f32 %v2966_v62, %v7079_v13  ;;  %v3184_v54 = vpack.c.bf16 %v3153_v12, %v3152_v5 }
 0x372   : > { %v3126_v6 = vadd.f32 %v7162_v37, %v3087_v45  ;;  %v3088_v18 = vmul.f32 %v7156_v21, %v2975_v14 }
 0x373   : > { %v3124_v10 = vadd.f32 %v7162_v37, %v3085_v8  ;;  %v3086_v59 = vmul.f32 %v7156_v21, %v2967_v57  ;;  %4915 = vmatprep.mubr.bf16.mxu0 %v3184_v54 }
 0x374   : > { %v3127_v56 = vadd.f32 %v7162_v37, %v3088_v18  ;;  %4916 = vmatmul.mubr.bf16.vlgmr.msra.gmra.mrb[144].mxu0 %v3185_v26  ;;  %v3158_v43 = vmax.f32 %v3126_v6, 0.0 }
 0x375   : > { %v3125_v23 = vadd.f32 %v7162_v37, %v3086_v59  ;;  %v4877_v35 = vpop.f32.mrb[152].mxu1  ;;  %v3156_v24 = vmax.f32 %v3124_v10, 0.0 }
 0x376   : > { %v3159_v63 = vmax.f32 %v3127_v56, 0.0  ;;  %v2988_v13 = vadd.f32 %v4877_v35, %v7094_v28  ;;  %v2979_v3 = vpop.f32.mrb[153].mxu1 }
 0x377   : > { %v3157_v41 = vmax.f32 %v3125_v23, 0.0  ;;  %v2980_v48 = vadd.f32 %v2979_v3, %v7088_v22  ;;  %v4878_v42 = vpop.f32.mrb[154].mxu1 }
 0x378   : > { %v3091_v52 = vmul.f32 %v7156_v21, %v2988_v13  ;;  %v2991_v0 = vadd.f32 %v4878_v42, %v7097_v49  ;;  %v2982_v20 = vpop.f32.mrb[155].mxu1  ;;  %v3187_v39 = vpack.c.bf16 %v3159_v63, %v3158_v43 }
 0x379   : > { %v3089_v32 = vmul.f32 %v7156_v21, %v2980_v48  ;;  %v2983_v55 = vadd.f32 %v2982_v20, %v7091_v47  ;;  %v3186_v46 = vpack.c.bf16 %v3157_v41, %v3156_v24 }
 0x37a   : > { %v3130_v30 = vadd.f32 %v7162_v37, %v3091_v52  ;;  %v3092_v28 = vmul.f32 %v7156_v21, %v2991_v0 }
 0x37b   : > { %v3128_v53 = vadd.f32 %v7162_v37, %v3089_v32  ;;  %v3090_v22 = vmul.f32 %v7156_v21, %v2983_v55  ;;  %4919 = vmatprep.mubr.bf16.mxu0 %v3186_v46 }
 0x37c   : > { %v3131_v31 = vadd.f32 %v7162_v37, %v3092_v28  ;;  %4920 = vmatmul.mubr.bf16.gmra.mrb[148].mxu0 %v3187_v39  ;;  %v3162_v36 = vmax.f32 %v3130_v30, 0.0 }
 0x37d   : > { %v3129_v49 = vadd.f32 %v7162_v37, %v3090_v22  ;;  %v4881_v7 = vpop.f32.mrb[156].mxu1  ;;  %v3160_v1 = vmax.f32 %v3128_v53, 0.0 }
 0x37e   : > { %v3163_v5 = vmax.f32 %v3131_v31, 0.0  ;;  %v3004_v47 = vadd.f32 %v4881_v7, %v7106_v19  ;;  %v2995_v12 = vpop.f32.mrb[157].mxu1 }
 0x37f   : > { %v3161_v34 = vmax.f32 %v3129_v49, 0.0  ;;  %v2996_v26 = vadd.f32 %v2995_v12, %v7100_v29  ;;  %v4882_v45 = vpop.f32.mrb[158].mxu1 }
 0x380   : > { %v3095_v14 = vmul.f32 %v7156_v21, %v3004_v47  ;;  %v3007_v62 = vadd.f32 %v4882_v45, %v7109_v40  ;;  %v2998_v8 = vpop.f32.mrb[159].mxu1  ;;  %v3189_v57 = vpack.c.bf16 %v3163_v5, %v3162_v36 }
 0x381   : > { %v3093_v54 = vmul.f32 %v7156_v21, %v2996_v26  ;;  %v2999_v6 = vadd.f32 %v2998_v8, %v7103_v27  ;;  %v3188_v18 = vpack.c.bf16 %v3161_v34, %v3160_v1 }
 0x382   : > { %v3134_v10 = vadd.f32 %v7162_v37, %v3095_v14  ;;  %v3096_v19 = vmul.f32 %v7156_v21, %v3007_v62 }
 0x383   : > { %v3132_v59 = vadd.f32 %v7162_v37, %v3093_v54  ;;  %v3094_v29 = vmul.f32 %v7156_v21, %v2999_v6  ;;  %4923 = vmatprep.mubr.bf16.mxu0 %v3188_v18 }
 0x384   : > { %v3135_v56 = vadd.f32 %v7162_v37, %v3096_v19  ;;  %4924 = vmatmul.mubr.bf16.gmra.mrb[152].mxu0 %v3189_v57  ;;  %v3166_v35 = vmax.f32 %v3134_v10, 0.0 }
 0x385   : > { %v3133_v40 = vadd.f32 %v7162_v37, %v3094_v29  ;;  %v4885_v23 = vpop.f32.mrb[160].mxu1  ;;  %v3164_v13 = vmax.f32 %v3132_v59, 0.0 }
 0x386   : > { %v3167_v43 = vmax.f32 %v3135_v56, 0.0  ;;  %v3020_v27 = vadd.f32 %v4885_v23, %v7118_v4  ;;  %v3011_v63 = vpop.f32.mrb[161].mxu1 }
 0x387   : > { %v3165_v3 = vmax.f32 %v3133_v40, 0.0  ;;  %v3012_v24 = vadd.f32 %v3011_v63, %v7112_v2  ;;  %v4886_v41 = vpop.f32.mrb[162].mxu1 }
 0x388   : > { %v3099_v48 = vmul.f32 %v7156_v21, %v3020_v27  ;;  %v3023_v42 = vadd.f32 %v4886_v41, %v7121_v50  ;;  %v3014_v52 = vpop.f32.mrb[163].mxu1  ;;  %v3191_v0 = vpack.c.bf16 %v3167_v43, %v3166_v35 }
 0x389   : > { %v3097_v20 = vmul.f32 %v7156_v21, %v3012_v24  ;;  %v3015_v39 = vadd.f32 %v3014_v52, %v7115_v25  ;;  %v3190_v32 = vpack.c.bf16 %v3165_v3, %v3164_v13 }
 0x38a   : > { %v3138_v55 = vadd.f32 %v7162_v37, %v3099_v48  ;;  %v3100_v4 = vmul.f32 %v7156_v21, %v3023_v42 }
 0x38b   : > { %v3136_v46 = vadd.f32 %v7162_v37, %v3097_v20  ;;  %v3098_v2 = vmul.f32 %v7156_v21, %v3015_v39  ;;  %4927 = vmatprep.mubr.bf16.mxu0 %v3190_v32 }
 0x38c   : > { %v3139_v30 = vadd.f32 %v7162_v37, %v3100_v4  ;;  %4928 = vmatmul.mubr.bf16.gmra.mrb[156].mxu0 %v3191_v0  ;;  %v3170_v53 = vmax.f32 %v3138_v55, 0.0 }
 0x38d   : > { %v3137_v50 = vadd.f32 %v7162_v37, %v3098_v2  ;;  %v4889_v28 = vpop.f32.mrb[164].mxu1  ;;  %v3168_v49 = vmax.f32 %v3136_v46, 0.0 }
 0x38e   : > { %v3171_v22 = vmax.f32 %v3139_v30, 0.0  ;;  %v3036_v25 = vadd.f32 %v4889_v28, %v7130_v58  ;;  %v3027_v31 = vpop.f32.mrb[165].mxu1 }
 0x38f   : > { %v3169_v7 = vmax.f32 %v3137_v50, 0.0  ;;  %v3028_v36 = vadd.f32 %v3027_v31, %v7124_v9  ;;  %v4890_v5 = vpop.f32.mrb[166].mxu1 }
 0x390   : > { %v3103_v47 = vmul.f32 %v7156_v21, %v3036_v25  ;;  %v3039_v12 = vadd.f32 %v4890_v5, %v7133_v38  ;;  %v3030_v1 = vpop.f32.mrb[167].mxu1  ;;  %v3193_v34 = vpack.c.bf16 %v3171_v22, %v3170_v53 }
 0x391   : > { %v3101_v26 = vmul.f32 %v7156_v21, %v3028_v36  ;;  %v3031_v45 = vadd.f32 %v3030_v1, %v7127_v16  ;;  %v3192_v14 = vpack.c.bf16 %v3169_v7, %v3168_v49 }
 0x392   : > { %v3142_v62 = vadd.f32 %v7162_v37, %v3103_v47  ;;  %v3104_v58 = vmul.f32 %v7156_v21, %v3039_v12 }
 0x393   : > { %v3140_v8 = vadd.f32 %v7162_v37, %v3101_v26  ;;  %v3102_v9 = vmul.f32 %v7156_v21, %v3031_v45  ;;  %4931 = vmatprep.mubr.bf16.mxu0 %v3192_v14  ;;  %v3505_v26 = vld [vmem:[%s5604_s12 + $0x10] sm:$0xff] }
 0x394   : > { %v3143_v57 = vadd.f32 %v7162_v37, %v3104_v58  ;;  %4932 = vmatmul.mubr.bf16.gmra.mrb[160].mxu0 %v3193_v34  ;;  %v3174_v6 = vmax.f32 %v3142_v62, 0.0  ;;  %v3503_v58 = vld [vmem:[%s5604_s12] sm:$0xff] }
 0x395   : > { %v3141_v38 = vadd.f32 %v7162_v37, %v3102_v9  ;;  %v4893_v54 = vpop.f32.mrb[168].mxu1  ;;  %v3172_v19 = vmax.f32 %v3140_v8, 0.0 }
 0x396   : > { %v3175_v18 = vmax.f32 %v3143_v57, 0.0  ;;  %v3052_v16 = vadd.f32 %v4893_v54, %v7142_v11  ;;  %v3043_v10 = vpop.f32.mrb[169].mxu1 }
 0x397   : > { %v3173_v59 = vmax.f32 %v3141_v38, 0.0  ;;  %v3044_v29 = vadd.f32 %v3043_v10, %v7136_v33  ;;  %v4894_v56 = vpop.f32.mrb[170].mxu1  ;;  %v3506_v38 = vld [vmem:[%s5604_s12 + $0x18] sm:$0xff] }
 0x398   : > { %v3107_v40 = vmul.f32 %v7156_v21, %v3052_v16  ;;  %v3055_v23 = vadd.f32 %v4894_v56, %v7145_v15  ;;  %v3046_v35 = vpop.f32.mrb[171].mxu1  ;;  %v3195_v43 = vpack.c.bf16 %v3175_v18, %v3174_v6  ;;  %v3504_v16 = vld [vmem:[%s5604_s12 + $0x8] sm:$0xff] }
 0x399   : > { %v3105_v27 = vmul.f32 %v7156_v21, %v3044_v29  ;;  %v3047_v63 = vadd.f32 %v3046_v35, %v7139_v60  ;;  %v3194_v13 = vpack.c.bf16 %v3173_v59, %v3172_v19 }
 0x39a   : > { %v3146_v3 = vadd.f32 %v7162_v37, %v3107_v40  ;;  %v3108_v11 = vmul.f32 %v7156_v21, %v3055_v23 }
 0x39b   : > { %v3144_v24 = vadd.f32 %v7162_v37, %v3105_v27  ;;  %v3106_v33 = vmul.f32 %v7156_v21, %v3047_v63  ;;  %4935 = vmatprep.mubr.bf16.mxu0 %v3194_v13  ;;  %v3509_v13 = vld [vmem:[%s5604_s12 + $0x30] sm:$0xff] }
 0x39c   : > { %v3147_v41 = vadd.f32 %v7162_v37, %v3108_v11  ;;  %4936 = vmatmul.mubr.bf16.gmra.mrb[164].mxu0 %v3195_v43  ;;  %v3178_v42 = vmax.f32 %v3146_v3, 0.0 }
 0x39d   : > { %v3145_v15 = vadd.f32 %v7162_v37, %v3106_v33  ;;  %v4897_v48 = vpop.f32.mrb[172].mxu1  ;;  %v3176_v20 = vmax.f32 %v3144_v24, 0.0  ;;  %v3507_v33 = vld [vmem:[%s5604_s12 + $0x20] sm:$0xff] }
 0x39e   : > { %v3179_v52 = vmax.f32 %v3147_v41, 0.0  ;;  %v3068_v60 = vadd.f32 %v4897_v48, %v7171_v51  ;;  %v3059_v0 = vpop.f32.mrb[173].mxu1 }
 0x39f   : > { %v3177_v39 = vmax.f32 %v3145_v15, 0.0  ;;  %v3060_v32 = vadd.f32 %v3059_v0, %v7148_v44  ;;  %v4898_v55 = vpop.f32.mrb[174].mxu1 }
 0x3a0   : > { %v3111_v4 = vmul.f32 %v7156_v21, %v3068_v60  ;;  %v3071_v46 = vadd.f32 %v4898_v55, %v7176_v17  ;;  %v3062_v2 = vpop.f32.mrb[175].mxu1  ;;  %v3197_v30 = vpack.c.bf16 %v3179_v52, %v3178_v42  ;;  %v3510_v42 = vld [vmem:[%s5604_s12 + $0x38] sm:$0xff] }
 0x3a1   : > { %v3109_v50 = vmul.f32 %v7156_v21, %v3060_v32  ;;  %v3063_v28 = vadd.f32 %v3062_v2, %v7151_v61  ;;  %v3196_v53 = vpack.c.bf16 %v3177_v39, %v3176_v20  ;;  %v3508_v20 = vld [vmem:[%s5604_s12 + $0x28] sm:$0xff] }
 0x3a2   : > { %v3150_v22 = vadd.f32 %v7162_v37, %v3111_v4  ;;  %v3112_v51 = vmul.f32 %v7156_v21, %v3071_v46 }
 0x3a3   : > { %v3148_v25 = vadd.f32 %v7162_v37, %v3109_v50  ;;  %v3110_v44 = vmul.f32 %v7156_v21, %v3063_v28  ;;  %4939 = vmatprep.mubr.bf16.mxu0 %v3196_v53  ;;  %v7266_v21 = vld [vmem:[%s7464_s8] ss:$0 sm:$0xff] }
 0x3a4   : > { %v3151_v31 = vadd.f32 %v7162_v37, %v3112_v51  ;;  %4940 = vmatmul.mubr.bf16.gmra.mrb[168].mxu0 %v3197_v30  ;;  %v3182_v49 = vmax.f32 %v3150_v22, 0.0  ;;  %v3513_v51 = vld [vmem:[%s5604_s12 + $0x50] sm:$0xff] }
 0x3a5   : > { %v3149_v17 = vadd.f32 %v7162_v37, %v3110_v44  ;;  %v3180_v61 = vmax.f32 %v3148_v25, 0.0  ;;  %v7271_v37 = vld [vmem:[%s7832_s19] ss:$0 sm:$0xff] }
 0x3a6   : > { %v3183_v7 = vmax.f32 %v3151_v31, 0.0 }
 0x3a7   : > { %v3181_v36 = vmax.f32 %v3149_v17, 0.0  ;;  %v3511_v17 = vld [vmem:[%s5604_s12 + $0x40] sm:$0xff] }
 0x3a8   : > { %v3199_v5 = vpack.c.bf16 %v3183_v7, %v3182_v49 }
 0x3a9   : > { %v3198_v47 = vpack.c.bf16 %v3181_v36, %v3180_v61  ;;  %v3514_v36 = vld [vmem:[%s5604_s12 + $0x58] sm:$0xff] }
 0x3ab   : > { %4943 = vmatprep.mubr.bf16.mxu0 %v3198_v47 }
 0x3ac   : > { %4944 = vmatmul.mubr.bf16.gmra.mrb[172].mxu0 %v3199_v5 }
 0x447   : > { %v4917_v12 = vpop.f32.mrb[144].mxu0 }
 0x448   : > { %v3434_v1 = vmul.f32 %v4917_v12, %v7266_v21  ;;  %v3298_v34 = vpop.f32.mrb[145].mxu0 }
 0x449   : > { %v3432_v45 = vmul.f32 %v7266_v21, %v3298_v34  ;;  %v4918_v14 = vpop.f32.mrb[146].mxu0 }
 0x44a   : > { %v3473_v62 = vadd.f32 %v7271_v37, %v3434_v1  ;;  %v3435_v8 = vmul.f32 %v4918_v14, %v7266_v21  ;;  %v3301_v9 = vpop.f32.mrb[147].mxu0  ;;  %v3512_v1 = vld [vmem:[%s5604_s12 + $0x48] sm:$0xff] }
 0x44b   : > { %v3471_v57 = vadd.f32 %v7271_v37, %v3432_v45  ;;  %v3433_v54 = vmul.f32 %v7266_v21, %v3301_v9 }
 0x44c   : > { %v3537_v6 = vadd.f32 %v3505_v26, %v3473_v62  ;;  %v3474_v18 = vadd.f32 %v7271_v37, %v3435_v8 }
 0x44d   : > { %v3535_v10 = vadd.f32 %v3503_v58, %v3471_v57  ;;  %v3472_v19 = vadd.f32 %v7271_v37, %v3433_v54 }
 0x44e   : > { %v3569_v59 = vmax.f32 %v3537_v6, 0.0  ;;  %v3538_v29 = vadd.f32 %v3506_v38, %v3474_v18  ;;  %v3517_v6 = vld [vmem:[%s5604_s12 + $0x70] sm:$0xff] }
 0x44f   : > { %v3567_v56 = vmax.f32 %v3535_v10, 0.0  ;;  %v3536_v40 = vadd.f32 %v3504_v16, %v3472_v19  ;;  %v4921_v23 = vpop.f32.mrb[148].mxu0  ;;  %v3515_v19 = vld [vmem:[%s5604_s12 + $0x60] sm:$0xff] }
 0x450   : > { %3601 = vst [vmem:[%s7287_s21 + $0x10] sm:$0xff] %v3569_v59  ;;  %v3570_v35 = vmax.f32 %v3538_v29, 0.0  ;;  %v3438_v43 = vmul.f32 %v4921_v23, %v7266_v21  ;;  %v3314_v27 = vpop.f32.mrb[149].mxu0 }
 0x451   : > { %3599 = vst [vmem:[%s7287_s21] sm:$0xff] %v3567_v56  ;;  %v3568_v63 = vmax.f32 %v3536_v40, 0.0  ;;  %v3436_v3 = vmul.f32 %v7266_v21, %v3314_v27  ;;  %v4922_v11 = vpop.f32.mrb[150].mxu0  ;;  %v3518_v40 = vld [vmem:[%s5604_s12 + $0x78] sm:$0xff]  ;;  %v3516_v27 = vld [vmem:[%s5604_s12 + $0x68] sm:$0xff] }
 0x452   : > { %3602 = vst [vmem:[%s7287_s21 + $0x18] sm:$0xff] %v3570_v35  ;;  %v3477_v24 = vadd.f32 %v7271_v37, %v3438_v43  ;;  %v3439_v41 = vmul.f32 %v4922_v11, %v7266_v21  ;;  %v3317_v15 = vpop.f32.mrb[151].mxu0 }
 0x453   : > { %3600 = vst [vmem:[%s7287_s21 + $0x8] sm:$0xff] %v3568_v63  ;;  %v3475_v48 = vadd.f32 %v7271_v37, %v3436_v3  ;;  %v3437_v52 = vmul.f32 %v7266_v21, %v3317_v15 }
 0x454   : > { %v3541_v60 = vadd.f32 %v3509_v13, %v3477_v24  ;;  %v3478_v0 = vadd.f32 %v7271_v37, %v3439_v41 }
 0x455   : > { %v3539_v39 = vadd.f32 %v3507_v33, %v3475_v48  ;;  %v3476_v32 = vadd.f32 %v7271_v37, %v3437_v52 }
 0x456   : > { %v3573_v55 = vmax.f32 %v3541_v60, 0.0  ;;  %v3542_v4 = vadd.f32 %v3510_v42, %v3478_v0  ;;  %v3521_v60 = vld [vmem:[%s5604_s12 + $0x90] sm:$0xff] }
 0x457   : > { %v3571_v46 = vmax.f32 %v3539_v39, 0.0  ;;  %v3540_v2 = vadd.f32 %v3508_v20, %v3476_v32  ;;  %v4925_v30 = vpop.f32.mrb[152].mxu0  ;;  %v3519_v32 = vld [vmem:[%s5604_s12 + $0x80] sm:$0xff] }
 0x458   : > { %3605 = vst [vmem:[%s7287_s21 + $0x30] sm:$0xff] %v3573_v55  ;;  %v3574_v50 = vmax.f32 %v3542_v4, 0.0  ;;  %v3442_v28 = vmul.f32 %v4925_v30, %v7266_v21  ;;  %v3330_v53 = vpop.f32.mrb[153].mxu0 }
 0x459   : > { %3603 = vst [vmem:[%s7287_s21 + $0x20] sm:$0xff] %v3571_v46  ;;  %v3572_v22 = vmax.f32 %v3540_v2, 0.0  ;;  %v3440_v25 = vmul.f32 %v7266_v21, %v3330_v53  ;;  %v4926_v44 = vpop.f32.mrb[154].mxu0  ;;  %v3522_v2 = vld [vmem:[%s5604_s12 + $0x98] sm:$0xff]  ;;  %v3520_v53 = vld [vmem:[%s5604_s12 + $0x88] sm:$0xff] }
 0x45a   : > { %3606 = vst [vmem:[%s7287_s21 + $0x38] sm:$0xff] %v3574_v50  ;;  %v3481_v31 = vadd.f32 %v7271_v37, %v3442_v28  ;;  %v3443_v49 = vmul.f32 %v4926_v44, %v7266_v21  ;;  %v3333_v7 = vpop.f32.mrb[155].mxu0 }
 0x45b   : > { %3604 = vst [vmem:[%s7287_s21 + $0x28] sm:$0xff] %v3572_v22  ;;  %v3479_v61 = vadd.f32 %v7271_v37, %v3440_v25  ;;  %v3441_v5 = vmul.f32 %v7266_v21, %v3333_v7 }
 0x45c   : > { %v3545_v47 = vadd.f32 %v3513_v51, %v3481_v31  ;;  %v3482_v12 = vadd.f32 %v7271_v37, %v3443_v49 }
 0x45d   : > { %v3543_v34 = vadd.f32 %v3511_v17, %v3479_v61  ;;  %v3480_v26 = vadd.f32 %v7271_v37, %v3441_v5 }
 0x45e   : > { %v3577_v45 = vmax.f32 %v3545_v47, 0.0  ;;  %v3546_v14 = vadd.f32 %v3514_v36, %v3482_v12  ;;  %v3525_v47 = vld [vmem:[%s5604_s12 + $0xb0] sm:$0xff] }
 0x45f   : > { %v3575_v62 = vmax.f32 %v3543_v34, 0.0  ;;  %v3544_v58 = vadd.f32 %v3512_v1, %v3480_v26  ;;  %v4929_v8 = vpop.f32.mrb[156].mxu0  ;;  %v3523_v26 = vld [vmem:[%s5604_s12 + $0xa0] sm:$0xff] }
 0x460   : > { %3609 = vst [vmem:[%s7287_s21 + $0x50] sm:$0xff] %v3577_v45  ;;  %v3578_v9 = vmax.f32 %v3546_v14, 0.0  ;;  %v3446_v57 = vmul.f32 %v4929_v8, %v7266_v21  ;;  %v3346_v38 = vpop.f32.mrb[157].mxu0 }
 0x461   : > { %3607 = vst [vmem:[%s7287_s21 + $0x40] sm:$0xff] %v3575_v62  ;;  %v3576_v54 = vmax.f32 %v3544_v58, 0.0  ;;  %v3444_v18 = vmul.f32 %v7266_v21, %v3346_v38  ;;  %v4930_v16 = vpop.f32.mrb[158].mxu0  ;;  %v3526_v58 = vld [vmem:[%s5604_s12 + $0xb8] sm:$0xff]  ;;  %v3524_v38 = vld [vmem:[%s5604_s12 + $0xa8] sm:$0xff] }
 0x462   : > { %3610 = vst [vmem:[%s7287_s21 + $0x58] sm:$0xff] %v3578_v9  ;;  %v3485_v10 = vadd.f32 %v7271_v37, %v3446_v57  ;;  %v3447_v59 = vmul.f32 %v4930_v16, %v7266_v21  ;;  %v3349_v29 = vpop.f32.mrb[159].mxu0 }
 0x463   : > { %3608 = vst [vmem:[%s7287_s21 + $0x48] sm:$0xff] %v3576_v54  ;;  %v3483_v56 = vadd.f32 %v7271_v37, %v3444_v18  ;;  %v3445_v23 = vmul.f32 %v7266_v21, %v3349_v29 }
 0x464   : > { %v3549_v35 = vadd.f32 %v3517_v6, %v3485_v10  ;;  %v3486_v43 = vadd.f32 %v7271_v37, %v3447_v59 }
 0x465   : > { %v3547_v63 = vadd.f32 %v3515_v19, %v3483_v56  ;;  %v3484_v13 = vadd.f32 %v7271_v37, %v3445_v23 }
 0x466   : > { %v3581_v3 = vmax.f32 %v3549_v35, 0.0  ;;  %v3550_v11 = vadd.f32 %v3518_v40, %v3486_v43  ;;  %v3529_v35 = vld [vmem:[%s5604_s12 + $0xd0] sm:$0xff] }
 0x467   : > { %v3579_v24 = vmax.f32 %v3547_v63, 0.0  ;;  %v3548_v33 = vadd.f32 %v3516_v27, %v3484_v13  ;;  %v4933_v41 = vpop.f32.mrb[160].mxu0  ;;  %v3527_v13 = vld [vmem:[%s5604_s12 + $0xc0] sm:$0xff] }
 0x468   : > { %3613 = vst [vmem:[%s7287_s21 + $0x70] sm:$0xff] %v3581_v3  ;;  %v3582_v15 = vmax.f32 %v3550_v11, 0.0  ;;  %v3450_v48 = vmul.f32 %v4933_v41, %v7266_v21  ;;  %v3362_v42 = vpop.f32.mrb[161].mxu0 }
 0x469   : > { %3611 = vst [vmem:[%s7287_s21 + $0x60] sm:$0xff] %v3579_v24  ;;  %v3580_v52 = vmax.f32 %v3548_v33, 0.0  ;;  %v3448_v0 = vmul.f32 %v7266_v21, %v3362_v42  ;;  %v4934_v20 = vpop.f32.mrb[162].mxu0  ;;  %v3530_v33 = vld [vmem:[%s5604_s12 + $0xd8] sm:$0xff]  ;;  %v3528_v42 = vld [vmem:[%s5604_s12 + $0xc8] sm:$0xff] }
 0x46a   : > { %3614 = vst [vmem:[%s7287_s21 + $0x78] sm:$0xff] %v3582_v15  ;;  %v3489_v39 = vadd.f32 %v7271_v37, %v3450_v48  ;;  %v3451_v55 = vmul.f32 %v4934_v20, %v7266_v21  ;;  %v3365_v4 = vpop.f32.mrb[163].mxu0 }
 0x46b   : > { %3612 = vst [vmem:[%s7287_s21 + $0x68] sm:$0xff] %v3580_v52  ;;  %v3487_v46 = vadd.f32 %v7271_v37, %v3448_v0  ;;  %v3449_v30 = vmul.f32 %v7266_v21, %v3365_v4 }
 0x46c   : > { %v3553_v50 = vadd.f32 %v3521_v60, %v3489_v39  ;;  %v3490_v28 = vadd.f32 %v7271_v37, %v3451_v55 }
 0x46d   : > { %v3551_v22 = vadd.f32 %v3519_v32, %v3487_v46  ;;  %v3488_v51 = vadd.f32 %v7271_v37, %v3449_v30 }
 0x46e   : > { %v3585_v25 = vmax.f32 %v3553_v50, 0.0  ;;  %v3554_v44 = vadd.f32 %v3522_v2, %v3490_v28  ;;  %v3533_v50 = vld [vmem:[%s5604_s12 + $0xf0] sm:$0xff] }
 0x46f   : > { %v3583_v31 = vmax.f32 %v3551_v22, 0.0  ;;  %v3552_v17 = vadd.f32 %v3520_v53, %v3488_v51  ;;  %v4937_v49 = vpop.f32.mrb[164].mxu0  ;;  %v3531_v51 = vld [vmem:[%s5604_s12 + $0xe0] sm:$0xff] }
 0x470   : > { %3617 = vst [vmem:[%s7287_s21 + $0x90] sm:$0xff] %v3585_v25  ;;  %v3586_v7 = vmax.f32 %v3554_v44, 0.0  ;;  %v3454_v61 = vmul.f32 %v4937_v49, %v7266_v21  ;;  %v3378_v36 = vpop.f32.mrb[165].mxu0 }
 0x471   : > { %3615 = vst [vmem:[%s7287_s21 + $0x80] sm:$0xff] %v3583_v31  ;;  %v3584_v5 = vmax.f32 %v3552_v17, 0.0  ;;  %v3452_v12 = vmul.f32 %v7266_v21, %v3378_v36  ;;  %v4938_v1 = vpop.f32.mrb[166].mxu0  ;;  %v3534_v17 = vld [vmem:[%s5604_s12 + $0xf8] sm:$0xff]  ;;  %v3532_v36 = vld [vmem:[%s5604_s12 + $0xe8] sm:$0xff]  ;;  %s5251_s12 = scalar_lea.vmem %s7409_s25, 4096 }
 0x472   : > { %3618 = vst [vmem:[%s7287_s21 + $0x98] sm:$0xff] %v3586_v7  ;;  %v3493_v34 = vadd.f32 %v7271_v37, %v3454_v61  ;;  %v3455_v45 = vmul.f32 %v4938_v1, %v7266_v21  ;;  %v3381_v14 = vpop.f32.mrb[167].mxu0  ;;  %p5252_p10 = scmp.ne.s32.totalorder %s7409_s25, %s5251_s12  ;;  %p5259_p1 = scmp.lt.s32.totalorder %s5257_s9, %s5251_s12 }
 0x473   : > { %3616 = vst [vmem:[%s7287_s21 + $0x88] sm:$0xff] %v3584_v5  ;;  %v3491_v62 = vadd.f32 %v7271_v37, %v3452_v12  ;;  %v3453_v8 = vmul.f32 %v7266_v21, %v3381_v14 }
 0x474   : > { %v3557_v9 = vadd.f32 %v3525_v47, %v3493_v34  ;;  %v3494_v57 = vadd.f32 %v7271_v37, %v3455_v45  ;;  %p5253_p3 = pnand %p5252_p10, %p5550_p5  ;;  %p5260_p2 = por %p5259_p1, %p5258_p12 }
 0x475   : > { %v3555_v54 = vadd.f32 %v3523_v26, %v3491_v62  ;;  %v3492_v6 = vadd.f32 %v7271_v37, %v3453_v8 }
 0x476   : > { %v3589_v18 = vmax.f32 %v3557_v9, 0.0  ;;  %v3558_v16 = vadd.f32 %v3526_v58, %v3494_v57  ;;  %p5254_p7 = pneg %p5253_p3 }
 0x477   : > { %v3587_v10 = vmax.f32 %v3555_v54, 0.0  ;;  %v3556_v19 = vadd.f32 %v3524_v38, %v3492_v6  ;;  %v4941_v59 = vpop.f32.mrb[168].mxu0 }
 0x478   : > { %3621 = vst [vmem:[%s7287_s21 + $0xb0] sm:$0xff] %v3589_v18  ;;  %v3590_v29 = vmax.f32 %v3558_v16, 0.0  ;;  %v3458_v56 = vmul.f32 %v4941_v59, %v7266_v21  ;;  %v3394_v40 = vpop.f32.mrb[169].mxu0  ;;  %p5261_p4 = pnand %p5260_p2, %p5254_p7 }
 0x479   : > { %3619 = vst [vmem:[%s7287_s21 + $0xa0] sm:$0xff] %v3587_v10  ;;  %v3588_v23 = vmax.f32 %v3556_v19, 0.0  ;;  %v3456_v43 = vmul.f32 %v7266_v21, %v3394_v40  ;;  %v4942_v27 = vpop.f32.mrb[170].mxu0 }
 0x47a   : > { %3622 = vst [vmem:[%s7287_s21 + $0xb8] sm:$0xff] %v3590_v29  ;;  %v3497_v63 = vadd.f32 %v7271_v37, %v3458_v56  ;;  %v3459_v3 = vmul.f32 %v4942_v27, %v7266_v21  ;;  %v3397_v11 = vpop.f32.mrb[171].mxu0 }
 0x47b   : > { %3620 = vst [vmem:[%s7287_s21 + $0xa8] sm:$0xff] %v3588_v23  ;;  %v3495_v24 = vadd.f32 %v7271_v37, %v3456_v43  ;;  %v3457_v41 = vmul.f32 %v7266_v21, %v3397_v11 }
 0x47c   : > { %v3561_v15 = vadd.f32 %v3529_v35, %v3497_v63  ;;  %v3498_v48 = vadd.f32 %v7271_v37, %v3459_v3 }
 0x47d   : > { %v3559_v52 = vadd.f32 %v3527_v13, %v3495_v24  ;;  %v3496_v60 = vadd.f32 %v7271_v37, %v3457_v41 }
 0x47e   : > { %v3593_v0 = vmax.f32 %v3561_v15, 0.0  ;;  %v3562_v20 = vadd.f32 %v3530_v33, %v3498_v48 }
 0x47f   : > { %v3591_v39 = vmax.f32 %v3559_v52, 0.0  ;;  %v3560_v32 = vadd.f32 %v3528_v42, %v3496_v60  ;;  %v4945_v55 = vpop.f32.mrb[172].mxu0 }
 0x480   : > { %3625 = vst [vmem:[%s7287_s21 + $0xd0] sm:$0xff] %v3593_v0  ;;  %v3594_v4 = vmax.f32 %v3562_v20, 0.0  ;;  %v3462_v46 = vmul.f32 %v4945_v55, %v7266_v21  ;;  %v3410_v2 = vpop.f32.mrb[173].mxu0 }
 0x481   : > { %3623 = vst [vmem:[%s7287_s21 + $0xc0] sm:$0xff] %v3591_v39  ;;  %v3592_v30 = vmax.f32 %v3560_v32, 0.0  ;;  %v3460_v28 = vmul.f32 %v7266_v21, %v3410_v2  ;;  %v4946_v53 = vpop.f32.mrb[174].mxu0 }
 0x482   : > { %3626 = vst [vmem:[%s7287_s21 + $0xd8] sm:$0xff] %v3594_v4  ;;  %v3501_v22 = vadd.f32 %v7271_v37, %v3462_v46  ;;  %v3463_v25 = vmul.f32 %v4946_v53, %v7266_v21  ;;  %v3413_v44 = vpop.f32.mrb[175].mxu0 }
 0x483   : > { %3624 = vst [vmem:[%s7287_s21 + $0xc8] sm:$0xff] %v3592_v30  ;;  %v3499_v31 = vadd.f32 %v7271_v37, %v3460_v28  ;;  %v3461_v49 = vmul.f32 %v7266_v21, %v3413_v44 }
 0x484   : > { %v3565_v7 = vadd.f32 %v3533_v50, %v3501_v22  ;;  %v3502_v61 = vadd.f32 %v7271_v37, %v3463_v25 }
 0x485   : > { %v3563_v5 = vadd.f32 %v3531_v51, %v3499_v31  ;;  %v3500_v47 = vadd.f32 %v7271_v37, %v3461_v49 }
 0x486   : > { %v3597_v12 = vmax.f32 %v3565_v7, 0.0  ;;  %v3566_v1 = vadd.f32 %v3534_v17, %v3502_v61 }
 0x487   : > { %v3595_v34 = vmax.f32 %v3563_v5, 0.0  ;;  %v3564_v26 = vadd.f32 %v3532_v36, %v3500_v47 }
 0x488   : > { %3629 = vst [vmem:[%s7287_s21 + $0xf0] sm:$0xff] %v3597_v12  ;;  %v3598_v21 = vmax.f32 %v3566_v1, 0.0 }
 0x489   : > { %3627 = vst [vmem:[%s7287_s21 + $0xe0] sm:$0xff] %v3595_v34  ;;  %v3596_v37 = vmax.f32 %v3564_v26, 0.0 }
 0x48a   : > { %3630 = vst [vmem:[%s7287_s21 + $0xf8] sm:$0xff] %v3598_v21 }
 0x48b   : > { %3628 = vst [vmem:[%s7287_s21 + $0xe8] sm:$0xff] %v3596_v37 }
 0x48c   : > { %5264 = shalt.err (!%p5261_p4)
}
 0x48d   : > { %s5265_s10 = scalar_lea.hbm %s7407_s11, 4096  ;;  %s5269_s21 = scalar_lea.hbm %s7833_s26, 8192 }
 0x48e   : > { %p5266_p9 = scmp.ne.s32.totalorder %s7407_s11, %s5265_s10  ;;  %p5270_p8 = scmp.lt.u32.totalorder %s7407_s11, %s7833_s26 }
 0x48f   : > { %p5271_p13 = scmp.lt.u32.totalorder %s5269_s21, %s5265_s10  ;;  %p5273_p10 = scmp.lt.u32.totalorder %s5265_s10, %s7407_s11 }
 0x490   : > { %p5267_p0 = pnand %p5266_p9, %p5550_p5 }
 0x491   : > { %p5272_p6 = por %p5271_p13, %p5270_p8 }
 0x492   : > { %p5268_p11 = pneg %p5267_p0 }
 0x493   : > { %p5274_p3 = por %p5273_p10, %p5272_p6 }
 0x495   : > { %p5275_p7 = pnand %p5274_p3, %p5268_p11 }
 0x497   : > { %5278 = shalt.err (!%p5275_p7)
}
 0x498   : > { %s5339_s23 = smov 128   ;;  %s5340_s12 = smov 8  }
 0x499   : > { %4977 = dma.vmem_to_hbm [thread:$0]  (%p5550_p5), %s7409_s25, 4096, %s7407_s11, %s3632_s17, %s5339_s23, %s5339_s23, %s5340_s12  }
 0x49a PF: > { %s7834_s27 = sld [smem:[#allocation16_spill]]  ;;  %s7835_s24 = sld [smem:[#allocation17_spill]] }
 0x49b   : > { %p7837_p1 = scmp.ge.s32.totalorder %s5325_s16, 2 }
 0x4a0   : > { %s3660_s9 = sand.u32 1, %s7834_s27   ;;  %p7836_p12 = scmp.ne.s32.totalorder %s7835_s24, 0 }
 0x4a1   : > { %s3661_s10 = scalar_lea.sflag [#allocation5], %s3660_s9 }
 0x4a2   : > { %p4994_p2 = pnand %p7837_p1, %p7836_p12 }
 0x4a4   : > { %5308 = dma.done.wait (!%p4994_p2), %s3661_s10, 4096  }
 0x4a5   : > { %5310 = vsyncadd (!%p4994_p2), %s3661_s10, 4294963200  ;;  %s7838_s30 = smov %s5546_s13  ;;  %p25_p4 = scmp.ge.s32.totalorder %s5536_s22, 4  }
 0x4a6   : > { %s7839_s13 = smov %s5317_s14  ;;  %s7840_s14 = smov %s5321_s15 }
 0x4a7   : > { %s7841_s15 = smov %s7838_s30  ;;  %s7842_s16 = smov %s5536_s22 }
 0x4a8   :  { %27 = sbr.rel (!%p25_p4) target bundleno = 10 (0xa), region = 119 }
 0x4af   :  { %3666 = vsyncpa [#allocation4], 1 }
 0x4b0   :  { %3668 = vsyncpa [#allocation4 + $0x1], 1 }
 0x4b1   :  { %3669 = vsyncpa [#allocation7], 1 }
 0x4b2   :  { %3670 = vsyncpa [#allocation10], 1 }
 0x4b3   :  { %3671 = vsyncpa [#allocation5], 1 }
 0x4b4   :  { %3673 = vsyncpa [#allocation5 + $0x1], 1 }

</bundles_post_ra>
